<compile_context>
chip_gen: v7x
topology: tpu7x:2x2x1
jax: 0.10.0
libtpu: 0.0.40
codegen_flags: <defaults>
</compile_context>

<pallas_src>
import functools
import math

import jax
import jax.numpy as jnp
from jax import lax
from jax.experimental import pallas as pl
from jax.experimental.pallas import tpu as pltpu


# -----------------------------------------------------------------------------
# In-kernel helpers (operate on values, traced into the fused kernel body)
# -----------------------------------------------------------------------------
def _layer_norm(y, g, b):
    # LayerNorm over last axis, eps = 1e-5 (PyTorch default). rsqrt -> EUP slot.
    mean = jnp.mean(y, axis=-1, keepdims=True)
    c = y - mean
    var = jnp.mean(c * c, axis=-1, keepdims=True)
    return c * lax.rsqrt(var + 1e-5) * g + b


def _mha_heads(q_in, k_in, v_in, wqkv_ref, bqkv_ref, wo_ref, *,
               bsz, num_heads, head_dim, mxu_dtype):
    """Multi-head attention + output projection (output-proj bias added by caller).

    q_in/k_in/v_in: flattened (bsz*L, E) activations already cast to mxu_dtype.
    wqkv_ref: (3, H, E, hd) per-head Q/K/V weights, (in, out) layout, softmax
    scale pre-folded into the Q slice.  bqkv_ref: (3, H, 1, hd) fp32 biases.
    wo_ref: (H, hd, E) per-head output-projection weights.  Returns (bsz*Lq, E)
    fp32.  The reference module's bmm requires len(k) == len(v).
    """
    E = num_heads * head_dim
    Lq = q_in.shape[0] // bsz
    Lk = k_in.shape[0] // bsz
    acc = jnp.zeros((bsz * Lq, E), jnp.float32)
    for h in range(num_heads):                 # static unroll, H small (<=4)
        # Per-head projections via leading-axis static indexing (no lane slicing).
        qh = jnp.dot(q_in, wqkv_ref[0, h],
                     preferred_element_type=jnp.float32) + bqkv_ref[0, h]
        kh = jnp.dot(k_in, wqkv_ref[1, h],
                     preferred_element_type=jnp.float32) + bqkv_ref[1, h]
        vh = jnp.dot(v_in, wqkv_ref[2, h],
                     preferred_element_type=jnp.float32) + bqkv_ref[2, h]
        # Recover the batch structure only for the score / P@V matmuls.
        q3 = qh.reshape(bsz, Lq, head_dim).astype(mxu_dtype)
        k3 = kh.reshape(bsz, Lk, head_dim).astype(mxu_dtype)
        v3 = vh.reshape(bsz, Lk, head_dim).astype(mxu_dtype)
        # scores: contract head dims, batch over B (no in-kernel transpose)
        s = lax.dot_general(q3, k3, (((2,), (2,)), ((0,), (0,))),
                            preferred_element_type=jnp.float32)     # (B, Lq, Lk)
        m = jnp.max(s, axis=-1, keepdims=True)
        p = jnp.exp(s - m)
        l = jnp.sum(p, axis=-1, keepdims=True)
        # TODO(synk): attention dropout is stochastic; identity in eval mode.
        o = lax.dot_general(p.astype(mxu_dtype), v3,
                            (((2,), (1,)), ((0,), (0,))),
                            preferred_element_type=jnp.float32)     # (B, Lq, hd)
        # normalize after P@V; exact reciprocal (approx=True hurts the 1e-3 check)
        o = o * pl.reciprocal(l, approx=False)
        # fold this head's slice of the output projection in directly
        acc = acc + jnp.dot(o.reshape(bsz * Lq, head_dim).astype(mxu_dtype),
                            wo_ref[h], preferred_element_type=jnp.float32)
    return acc


# -----------------------------------------------------------------------------
# Fused decoder-layer kernel (single grid step covers the whole batch)
# -----------------------------------------------------------------------------
def decoder_layer_kernel(x_ref, mem_ref,
                         wqkv_s_ref, bqkv_s_ref, wo_s_ref, bo_s_ref,
                         ln1_g_ref, ln1_b_ref,
                         wqkv_c_ref, bqkv_c_ref, wo_c_ref, bo_c_ref,
                         ln2_g_ref, ln2_b_ref,
                         w1_ref, b1_ref, w2_ref, b2_ref,
                         ln3_g_ref, ln3_b_ref,
                         out_ref, *, num_heads, head_dim, mxu_dtype):
    B, T, E = x_ref.shape
    S = mem_ref.shape[1]

    # Flatten batch into the sublane/M dimension for all position-wise math.
    x = x_ref[...].reshape(B * T, E)          # (B*T, E) fp32
    mem = mem_ref[...].reshape(B * S, E)      # (B*S, E) fp32

    kw = dict(bsz=B, num_heads=num_heads, head_dim=head_dim, mxu_dtype=mxu_dtype)

    # ---- self attention (q = k = v = x); softmax scale pre-folded into Wq ----
    x_mx = x.astype(mxu_dtype)
    sa = _mha_heads(x_mx, x_mx, x_mx,
                    wqkv_s_ref, bqkv_s_ref, wo_s_ref, **kw) + bo_s_ref[...]
    # TODO(synk): dropout1 is stochastic; identity in eval mode.
    x1 = _layer_norm(x + sa, ln1_g_ref[...], ln1_b_ref[...])

    # ---- cross attention: query/key = memory, value = x1 (reference wiring) ----
    mem_mx = mem.astype(mxu_dtype)
    x1_mx = x1.astype(mxu_dtype)
    ca = _mha_heads(mem_mx, mem_mx, x1_mx,
                    wqkv_c_ref, bqkv_c_ref, wo_c_ref, **kw) + bo_c_ref[...]
    # TODO(synk): dropout2 is stochastic; identity in eval mode.
    x2 = _layer_norm(x1 + ca, ln2_g_ref[...], ln2_b_ref[...])

    # ---- feed-forward (LN / ReLU / bias math kept in fp32) ----
    hmid = jnp.maximum(
        jnp.dot(x2.astype(mxu_dtype), w1_ref[...],
                preferred_element_type=jnp.float32) + b1_ref[...],
        0.0)
    ff = jnp.dot(hmid.astype(mxu_dtype), w2_ref[...],
                 preferred_element_type=jnp.float32) + b2_ref[...]
    y = _layer_norm(x2 + ff, ln3_g_ref[...], ln3_b_ref[...])

    out_ref[...] = y.reshape(B, T, E).astype(out_ref.dtype)


# -----------------------------------------------------------------------------
# Wrapper
# -----------------------------------------------------------------------------
def transformer_decoder_layer(params, x, memory, tgt_mask=None, memory_mask=None,
                              num_heads=4, mxu_dtype=jnp.float32):
    """x, memory: (T, B, E) ("Time x Batch x Channel").

    tgt_mask / memory_mask are accepted but ignored, matching the reference
    LinformerAttention plain q/k/v branch (it never applies attn_mask).
    """
    T, B, E = x.shape
    S, Bm, Em = memory.shape
    assert (S, Bm, Em) == (T, B, E), "reference module requires matching shapes"
    H = num_heads
    hd = E // H
    scale = hd ** (-0.5)

    def pack_attn(p):
        # torch Linear weight is (out, in); pack per-head, pre-transposed to
        # (in, out), heads on a leading axis (avoids in-kernel lane slicing).
        def heads(w):                                   # (E, E) -> (H, E, hd)
            return jnp.transpose(w.reshape(H, hd, E), (0, 2, 1))
        wqkv = jnp.stack([heads(p["wq"]) * scale,       # fold softmax scale into Q
                          heads(p["wk"]),
                          heads(p["wv"])], axis=0).astype(mxu_dtype)  # (3,H,E,hd)
        bqkv = jnp.stack([(p["bq"] * scale).reshape(H, 1, hd),
                          p["bk"].reshape(H, 1, hd),
                          p["bv"].reshape(H, 1, hd)], axis=0)         # (3,H,1,hd)
        wo = p["wo"].T.reshape(H, hd, E).astype(mxu_dtype)            # (H,hd,E)
        bo = p["bo"].reshape(1, E)
        return wqkv, bqkv, wo, bo

    wqkv_s, bqkv_s, wo_s, bo_s = pack_attn(params["self_attn"])
    wqkv_c, bqkv_c, wo_c, bo_c = pack_attn(params["cross_attn"])
    row = lambda a: a.reshape(1, -1)

    # TODO(synk): at production sizes accept batch-major activations to avoid
    # these two HBM-round-trip transposes around the kernel.
    xb = jnp.transpose(x, (1, 0, 2))        # (B, T, E) batch-major
    memb = jnp.transpose(memory, (1, 0, 2))

    args = (xb, memb,
            wqkv_s, bqkv_s, wo_s, bo_s,
            row(params["ln1_g"]), row(params["ln1_b"]),
            wqkv_c, bqkv_c, wo_c, bo_c,
            row(params["ln2_g"]), row(params["ln2_b"]),
            params["w1"].T.astype(mxu_dtype), row(params["b1"]),
            params["w2"].T.astype(mxu_dtype), row(params["b2"]),
            row(params["ln3_g"]), row(params["ln3_b"]))

    # Everything is a full-array block: the whole layer runs in ONE grid step.
    idx = {2: lambda i: (0, 0),
           3: lambda i: (0, 0, 0),
           4: lambda i: (0, 0, 0, 0)}
    in_specs = [pl.BlockSpec(a.shape, idx[a.ndim]) for a in args]

    kern = functools.partial(decoder_layer_kernel,
                             num_heads=H, head_dim=hd, mxu_dtype=mxu_dtype)
    out = pl.pallas_call(
        kern,
        out_shape=jax.ShapeDtypeStruct((B, T, E), jnp.float32),
        grid=(1,),
        in_specs=in_specs,
        out_specs=pl.BlockSpec((B, T, E), idx[3]),
        compiler_params=pltpu.CompilerParams(
            dimension_semantics=("arbitrary",),
            vmem_limit_bytes=48 * 1024 * 1024),   # above v5e/v6e defaults
    )(*args)
    return jnp.transpose(out, (1, 0, 2))          # back to (T, B, E)


# -----------------------------------------------------------------------------
# Pure-JAX reference (for correctness check)
# -----------------------------------------------------------------------------
def _ref_attn(p, query, key, value, H):
    T, B, E = query.shape
    S = key.shape[0]
    hd = E // H
    scale = hd ** (-0.5)
    q = (query @ p["wq"].T + p["bq"]) * scale
    k = key @ p["wk"].T + p["bk"]
    v = value @ p["wv"].T + p["bv"]
    qh = jnp.transpose(q.reshape(T, B * H, hd), (1, 0, 2))
    kh = jnp.transpose(k.reshape(S, B * H, hd), (1, 0, 2))
    vh = jnp.transpose(v.reshape(value.shape[0], B * H, hd), (1, 0, 2))
    w = jax.nn.softmax(qh @ jnp.transpose(kh, (0, 2, 1)), axis=-1)
    a = jnp.transpose(w @ vh, (1, 0, 2)).reshape(T, B, E)
    return a @ p["wo"].T + p["bo"]


def _ref_ln(y, g, b):
    m = jnp.mean(y, axis=-1, keepdims=True)
    v = jnp.mean((y - m) ** 2, axis=-1, keepdims=True)
    return (y - m) / jnp.sqrt(v + 1e-5) * g + b


def _ref_decoder(params, x, memory, H):
    x1 = _ref_ln(x + _ref_attn(params["self_attn"], x, x, x, H),
                 params["ln1_g"], params["ln1_b"])
    x2 = _ref_ln(x1 + _ref_attn(params["cross_attn"], memory, memory, x1, H),
                 params["ln2_g"], params["ln2_b"])
    h = jnp.maximum(x2 @ params["w1"].T + params["b1"], 0.0)
    ff = h @ params["w2"].T + params["b2"]
    return _ref_ln(x2 + ff, params["ln3_g"], params["ln3_b"])


# -----------------------------------------------------------------------------
# Parameter init (deterministic, synthetic, PyTorch-like)
# -----------------------------------------------------------------------------
def _xavier(key, shape):
    fan_out, fan_in = shape
    bound = math.sqrt(6.0 / (fan_in + fan_out))
    return jax.random.uniform(key, shape, jnp.float32, -bound, bound)


def _bias(key, fan_in, size):
    bound = 1.0 / math.sqrt(fan_in)
    return jax.random.uniform(key, (size,), jnp.float32, -bound, bound)


def init_attention_params(key, E):
    ks = jax.random.split(key, 8)
    return {
        "wq": _xavier(ks[0], (E, E)), "bq": _bias(ks[1], E, E),
        "wk": _xavier(ks[2], (E, E)), "bk": _bias(ks[3], E, E),
        "wv": _xavier(ks[4], (E, E)), "bv": _bias(ks[5], E, E),
        "wo": _xavier(ks[6], (E, E)), "bo": _bias(ks[7], E, E),
    }


def init_decoder_params(key, d_model, d_ff):
    ks = jax.random.split(key, 6)
    return {
        "self_attn": init_attention_params(ks[0], d_model),
        "cross_attn": init_attention_params(ks[1], d_model),
        "w1": _xavier(ks[2], (d_ff, d_model)), "b1": _bias(ks[3], d_model, d_ff),
        "w2": _xavier(ks[4], (d_model, d_ff)), "b2": _bias(ks[5], d_ff, d_model),
        "ln1_g": jnp.ones((d_model,), jnp.float32),
        "ln1_b": jnp.zeros((d_model,), jnp.float32),
        "ln2_g": jnp.ones((d_model,), jnp.float32),
        "ln2_b": jnp.zeros((d_model,), jnp.float32),
        "ln3_g": jnp.ones((d_model,), jnp.float32),
        "ln3_b": jnp.zeros((d_model,), jnp.float32),
    }


if __name__ == "__main__":
    d_model, num_heads, d_ff = 32, 4, 64
    T, B = 8, 2                      # seq len, batch (Time x Batch x Channel)

    root = jax.random.PRNGKey(0)
    k_params, k_x, k_mem = jax.random.split(root, 3)
    params = init_decoder_params(k_params, d_model, d_ff)

    x = jax.random.normal(k_x, (T, B, d_model), jnp.float32)
    memory = jax.random.normal(k_mem, (T, B, d_model), jnp.float32)
    tgt_mask = jnp.zeros((T, T), jnp.float32)       # ignored by the reference
    memory_mask = jnp.zeros((T, T), jnp.float32)    # ignored by the reference

    ref = _ref_decoder(params, x, memory, num_heads)

    # fp32 MXU path (default): strict correctness check.
    fwd = jax.jit(lambda p, a, m: transformer_decoder_layer(
        p, a, m, tgt_mask, memory_mask, num_heads=num_heads))
    out = jax.block_until_ready(fwd(params, x, memory))
    assert out.shape == (T, B, d_model)
    assert jnp.allclose(out, ref, atol=2e-3, rtol=2e-3), "fp32 mismatch vs reference"

    # bf16-MXU-operand path (v6e/v7x optimization): fp32 accumulation + fp32
    # LN/softmax, so only a loose sanity check is expected to hold.
    fwd_bf16 = jax.jit(lambda p, a, m: transformer_decoder_layer(
        p, a, m, tgt_mask, memory_mask, num_heads=num_heads,
        mxu_dtype=jnp.bfloat16))
    out_bf16 = jax.block_until_ready(fwd_bf16(params, x, memory))
    assert jnp.allclose(out_bf16, ref, atol=1.5e-1, rtol=1e-1), \
        "bf16-MXU mismatch vs reference"

    print("KERNEL_OK")
</pallas_src>

<mosaic_0001>
module attributes {stable_mosaic.version = 11 : i64} {
  func.func @decoder_layer_kernel(%arg0: i32, %arg1: memref<2x8x32xf32, #tpu.memory_space<vmem>>, %arg2: memref<2x8x32xf32, #tpu.memory_space<vmem>>, %arg3: memref<3x4x32x8xf32, #tpu.memory_space<vmem>>, %arg4: memref<3x4x1x8xf32, #tpu.memory_space<vmem>>, %arg5: memref<4x8x32xf32, #tpu.memory_space<vmem>>, %arg6: memref<1x32xf32, #tpu.memory_space<vmem>>, %arg7: memref<1x32xf32, #tpu.memory_space<vmem>>, %arg8: memref<1x32xf32, #tpu.memory_space<vmem>>, %arg9: memref<3x4x32x8xf32, #tpu.memory_space<vmem>>, %arg10: memref<3x4x1x8xf32, #tpu.memory_space<vmem>>, %arg11: memref<4x8x32xf32, #tpu.memory_space<vmem>>, %arg12: memref<1x32xf32, #tpu.memory_space<vmem>>, %arg13: memref<1x32xf32, #tpu.memory_space<vmem>>, %arg14: memref<1x32xf32, #tpu.memory_space<vmem>>, %arg15: memref<32x64xf32, #tpu.memory_space<vmem>>, %arg16: memref<1x64xf32, #tpu.memory_space<vmem>>, %arg17: memref<64x32xf32, #tpu.memory_space<vmem>>, %arg18: memref<1x32xf32, #tpu.memory_space<vmem>>, %arg19: memref<1x32xf32, #tpu.memory_space<vmem>>, %arg20: memref<1x32xf32, #tpu.memory_space<vmem>>, %arg21: memref<2x8x32xf32, #tpu.memory_space<vmem>>) attributes {dimension_semantics = [#tpu.dimension_semantics<arbitrary>], iteration_bounds = array<i64: 1>, scalar_prefetch = 0 : i64, scratch_operands = 0 : i64, tpu.core_type = #tpu.core_type<tc>, window_params = [{pipeline_mode = #tpu.pipeline_mode<synchronous>, transform_indices = @transform_0, window_bounds = array<i64: 2, 8, 32>}, {pipeline_mode = #tpu.pipeline_mode<synchronous>, transform_indices = @transform_1, window_bounds = array<i64: 2, 8, 32>}, {pipeline_mode = #tpu.pipeline_mode<synchronous>, transform_indices = @transform_2, window_bounds = array<i64: 3, 4, 32, 8>}, {pipeline_mode = #tpu.pipeline_mode<synchronous>, transform_indices = @transform_3, window_bounds = array<i64: 3, 4, 1, 8>}, {pipeline_mode = #tpu.pipeline_mode<synchronous>, transform_indices = @transform_4, window_bounds = array<i64: 4, 8, 32>}, {pipeline_mode = #tpu.pipeline_mode<synchronous>, transform_indices = @transform_5, window_bounds = array<i64: 1, 32>}, {pipeline_mode = #tpu.pipeline_mode<synchronous>, transform_indices = @transform_6, window_bounds = array<i64: 1, 32>}, {pipeline_mode = #tpu.pipeline_mode<synchronous>, transform_indices = @transform_7, window_bounds = array<i64: 1, 32>}, {pipeline_mode = #tpu.pipeline_mode<synchronous>, transform_indices = @transform_8, window_bounds = array<i64: 3, 4, 32, 8>}, {pipeline_mode = #tpu.pipeline_mode<synchronous>, transform_indices = @transform_9, window_bounds = array<i64: 3, 4, 1, 8>}, {pipeline_mode = #tpu.pipeline_mode<synchronous>, transform_indices = @transform_10, window_bounds = array<i64: 4, 8, 32>}, {pipeline_mode = #tpu.pipeline_mode<synchronous>, transform_indices = @transform_11, window_bounds = array<i64: 1, 32>}, {pipeline_mode = #tpu.pipeline_mode<synchronous>, transform_indices = @transform_12, window_bounds = array<i64: 1, 32>}, {pipeline_mode = #tpu.pipeline_mode<synchronous>, transform_indices = @transform_13, window_bounds = array<i64: 1, 32>}, {pipeline_mode = #tpu.pipeline_mode<synchronous>, transform_indices = @transform_14, window_bounds = array<i64: 32, 64>}, {pipeline_mode = #tpu.pipeline_mode<synchronous>, transform_indices = @transform_15, window_bounds = array<i64: 1, 64>}, {pipeline_mode = #tpu.pipeline_mode<synchronous>, transform_indices = @transform_16, window_bounds = array<i64: 64, 32>}, {pipeline_mode = #tpu.pipeline_mode<synchronous>, transform_indices = @transform_17, window_bounds = array<i64: 1, 32>}, {pipeline_mode = #tpu.pipeline_mode<synchronous>, transform_indices = @transform_18, window_bounds = array<i64: 1, 32>}, {pipeline_mode = #tpu.pipeline_mode<synchronous>, transform_indices = @transform_19, window_bounds = array<i64: 1, 32>}, {pipeline_mode = #tpu.pipeline_mode<synchronous>, transform_indices = @transform_20, window_bounds = array<i64: 2, 8, 32>}]} {
    %c0 = arith.constant 0 : index
    %c0_0 = arith.constant 0 : index
    %c0_1 = arith.constant 0 : index
    %0 = vector.load %arg1[%c0, %c0_0, %c0_1] : memref<2x8x32xf32, #tpu.memory_space<vmem>>, vector<2x8x32xf32>
    %1 = vector.shape_cast %0 : vector<2x8x32xf32> to vector<16x32xf32>
    %c0_2 = arith.constant 0 : index
    %c0_3 = arith.constant 0 : index
    %c0_4 = arith.constant 0 : index
    %2 = vector.load %arg2[%c0_2, %c0_3, %c0_4] : memref<2x8x32xf32, #tpu.memory_space<vmem>>, vector<2x8x32xf32>
    %3 = vector.shape_cast %2 : vector<2x8x32xf32> to vector<16x32xf32>
    %cst = arith.constant 0.000000e+00 : f32
    %4 = vector.broadcast %cst : f32 to vector<16x32xf32>
    %c0_5 = arith.constant 0 : index
    %c0_6 = arith.constant 0 : index
    %c0_7 = arith.constant 0 : index
    %c0_8 = arith.constant 0 : index
    %5 = vector.load %arg3[%c0_5, %c0_6, %c0_7, %c0_8] : memref<3x4x32x8xf32, #tpu.memory_space<vmem>>, vector<1x1x32x8xf32>
    %6 = vector.shape_cast %5 : vector<1x1x32x8xf32> to vector<32x8xf32>
    %cst_9 = arith.constant dense<0.000000e+00> : vector<16x8xf32>
    %7 = tpu.matmul %1, %6, %cst_9 {dimension_numbers = #tpu.dot_dimension_numbers<[1], [0], [0], [1], [0, 0, 1, 1], [], []>} : vector<16x32xf32>, vector<32x8xf32>, vector<16x8xf32> -> vector<16x8xf32>
    %c0_10 = arith.constant 0 : index
    %c0_11 = arith.constant 0 : index
    %c0_12 = arith.constant 0 : index
    %c0_13 = arith.constant 0 : index
    %8 = vector.load %arg4[%c0_10, %c0_11, %c0_12, %c0_13] : memref<3x4x1x8xf32, #tpu.memory_space<vmem>>, vector<1x1x1x8xf32>
    %9 = vector.shape_cast %8 : vector<1x1x1x8xf32> to vector<1x8xf32>
    %10 = vector.broadcast %9 : vector<1x8xf32> to vector<16x8xf32>
    %11 = arith.addf %7, %10 : vector<16x8xf32>
    %c1 = arith.constant 1 : index
    %c0_14 = arith.constant 0 : index
    %c0_15 = arith.constant 0 : index
    %c0_16 = arith.constant 0 : index
    %12 = vector.load %arg3[%c1, %c0_14, %c0_15, %c0_16] : memref<3x4x32x8xf32, #tpu.memory_space<vmem>>, vector<1x1x32x8xf32>
    %13 = vector.shape_cast %12 : vector<1x1x32x8xf32> to vector<32x8xf32>
    %cst_17 = arith.constant dense<0.000000e+00> : vector<16x8xf32>
    %14 = tpu.matmul %1, %13, %cst_17 {dimension_numbers = #tpu.dot_dimension_numbers<[1], [0], [0], [1], [0, 0, 1, 1], [], []>} : vector<16x32xf32>, vector<32x8xf32>, vector<16x8xf32> -> vector<16x8xf32>
    %c1_18 = arith.constant 1 : index
    %c0_19 = arith.constant 0 : index
    %c0_20 = arith.constant 0 : index
    %c0_21 = arith.constant 0 : index
    %15 = vector.load %arg4[%c1_18, %c0_19, %c0_20, %c0_21] : memref<3x4x1x8xf32, #tpu.memory_space<vmem>>, vector<1x1x1x8xf32>
    %16 = vector.shape_cast %15 : vector<1x1x1x8xf32> to vector<1x8xf32>
    %17 = vector.broadcast %16 : vector<1x8xf32> to vector<16x8xf32>
    %18 = arith.addf %14, %17 : vector<16x8xf32>
    %c2 = arith.constant 2 : index
    %c0_22 = arith.constant 0 : index
    %c0_23 = arith.constant 0 : index
    %c0_24 = arith.constant 0 : index
    %19 = vector.load %arg3[%c2, %c0_22, %c0_23, %c0_24] : memref<3x4x32x8xf32, #tpu.memory_space<vmem>>, vector<1x1x32x8xf32>
    %20 = vector.shape_cast %19 : vector<1x1x32x8xf32> to vector<32x8xf32>
    %cst_25 = arith.constant dense<0.000000e+00> : vector<16x8xf32>
    %21 = tpu.matmul %1, %20, %cst_25 {dimension_numbers = #tpu.dot_dimension_numbers<[1], [0], [0], [1], [0, 0, 1, 1], [], []>} : vector<16x32xf32>, vector<32x8xf32>, vector<16x8xf32> -> vector<16x8xf32>
    %c2_26 = arith.constant 2 : index
    %c0_27 = arith.constant 0 : index
    %c0_28 = arith.constant 0 : index
    %c0_29 = arith.constant 0 : index
    %22 = vector.load %arg4[%c2_26, %c0_27, %c0_28, %c0_29] : memref<3x4x1x8xf32, #tpu.memory_space<vmem>>, vector<1x1x1x8xf32>
    %23 = vector.shape_cast %22 : vector<1x1x1x8xf32> to vector<1x8xf32>
    %24 = vector.broadcast %23 : vector<1x8xf32> to vector<16x8xf32>
    %25 = arith.addf %21, %24 : vector<16x8xf32>
    %26 = vector.shape_cast %11 : vector<16x8xf32> to vector<2x8x8xf32>
    %27 = vector.shape_cast %18 : vector<16x8xf32> to vector<2x8x8xf32>
    %28 = vector.shape_cast %25 : vector<16x8xf32> to vector<2x8x8xf32>
    %cst_30 = arith.constant dense<0.000000e+00> : vector<2x8x8xf32>
    %29 = tpu.matmul %26, %27, %cst_30 {dimension_numbers = #tpu.dot_dimension_numbers<[2], [2], [1], [1], [0, 0, 0, 1, 1, 1], [0], [0]>} : vector<2x8x8xf32>, vector<2x8x8xf32>, vector<2x8x8xf32> -> vector<2x8x8xf32>
    %cst_31 = arith.constant dense<0xFF800000> : vector<2x8xf32>
    %30 = vector.multi_reduction <maximumf>, %29, %cst_31 [2] : vector<2x8x8xf32> to vector<2x8xf32>
    %31 = vector.shape_cast %30 : vector<2x8xf32> to vector<2x8x1xf32>
    %32 = vector.broadcast %31 : vector<2x8x1xf32> to vector<2x8x8xf32>
    %33 = arith.subf %29, %32 : vector<2x8x8xf32>
    %34 = math.exp %33 : vector<2x8x8xf32>
    %cst_32 = arith.constant dense<0.000000e+00> : vector<2x8xf32>
    %35 = vector.multi_reduction <add>, %34, %cst_32 [2] : vector<2x8x8xf32> to vector<2x8xf32>
    %36 = vector.shape_cast %35 : vector<2x8xf32> to vector<2x8x1xf32>
    %cst_33 = arith.constant dense<0.000000e+00> : vector<2x8x8xf32>
    %37 = tpu.matmul %34, %28, %cst_33 {dimension_numbers = #tpu.dot_dimension_numbers<[2], [1], [1], [2], [0, 0, 0, 1, 1, 2], [0], [0]>} : vector<2x8x8xf32>, vector<2x8x8xf32>, vector<2x8x8xf32> -> vector<2x8x8xf32>
    %38 = tpu.reciprocal %36 : vector<2x8x1xf32> -> vector<2x8x1xf32>
    %39 = vector.broadcast %38 : vector<2x8x1xf32> to vector<2x8x8xf32>
    %40 = arith.mulf %37, %39 : vector<2x8x8xf32>
    %41 = vector.shape_cast %40 : vector<2x8x8xf32> to vector<16x8xf32>
    %c0_34 = arith.constant 0 : index
    %c0_35 = arith.constant 0 : index
    %c0_36 = arith.constant 0 : index
    %42 = vector.load %arg5[%c0_34, %c0_35, %c0_36] : memref<4x8x32xf32, #tpu.memory_space<vmem>>, vector<1x8x32xf32>
    %43 = vector.shape_cast %42 : vector<1x8x32xf32> to vector<8x32xf32>
    %cst_37 = arith.constant dense<0.000000e+00> : vector<16x32xf32>
    %44 = tpu.matmul %41, %43, %cst_37 {dimension_numbers = #tpu.dot_dimension_numbers<[1], [0], [0], [1], [0, 0, 1, 1], [], []>} : vector<16x8xf32>, vector<8x32xf32>, vector<16x32xf32> -> vector<16x32xf32>
    %45 = arith.addf %4, %44 : vector<16x32xf32>
    %c0_38 = arith.constant 0 : index
    %c1_39 = arith.constant 1 : index
    %c0_40 = arith.constant 0 : index
    %c0_41 = arith.constant 0 : index
    %46 = vector.load %arg3[%c0_38, %c1_39, %c0_40, %c0_41] : memref<3x4x32x8xf32, #tpu.memory_space<vmem>>, vector<1x1x32x8xf32>
    %47 = vector.shape_cast %46 : vector<1x1x32x8xf32> to vector<32x8xf32>
    %cst_42 = arith.constant dense<0.000000e+00> : vector<16x8xf32>
    %48 = tpu.matmul %1, %47, %cst_42 {dimension_numbers = #tpu.dot_dimension_numbers<[1], [0], [0], [1], [0, 0, 1, 1], [], []>} : vector<16x32xf32>, vector<32x8xf32>, vector<16x8xf32> -> vector<16x8xf32>
    %c0_43 = arith.constant 0 : index
    %c1_44 = arith.constant 1 : index
    %c0_45 = arith.constant 0 : index
    %c0_46 = arith.constant 0 : index
    %49 = vector.load %arg4[%c0_43, %c1_44, %c0_45, %c0_46] : memref<3x4x1x8xf32, #tpu.memory_space<vmem>>, vector<1x1x1x8xf32>
    %50 = vector.shape_cast %49 : vector<1x1x1x8xf32> to vector<1x8xf32>
    %51 = vector.broadcast %50 : vector<1x8xf32> to vector<16x8xf32>
    %52 = arith.addf %48, %51 : vector<16x8xf32>
    %c1_47 = arith.constant 1 : index
    %c1_48 = arith.constant 1 : index
    %c0_49 = arith.constant 0 : index
    %c0_50 = arith.constant 0 : index
    %53 = vector.load %arg3[%c1_47, %c1_48, %c0_49, %c0_50] : memref<3x4x32x8xf32, #tpu.memory_space<vmem>>, vector<1x1x32x8xf32>
    %54 = vector.shape_cast %53 : vector<1x1x32x8xf32> to vector<32x8xf32>
    %cst_51 = arith.constant dense<0.000000e+00> : vector<16x8xf32>
    %55 = tpu.matmul %1, %54, %cst_51 {dimension_numbers = #tpu.dot_dimension_numbers<[1], [0], [0], [1], [0, 0, 1, 1], [], []>} : vector<16x32xf32>, vector<32x8xf32>, vector<16x8xf32> -> vector<16x8xf32>
    %c1_52 = arith.constant 1 : index
    %c1_53 = arith.constant 1 : index
    %c0_54 = arith.constant 0 : index
    %c0_55 = arith.constant 0 : index
    %56 = vector.load %arg4[%c1_52, %c1_53, %c0_54, %c0_55] : memref<3x4x1x8xf32, #tpu.memory_space<vmem>>, vector<1x1x1x8xf32>
    %57 = vector.shape_cast %56 : vector<1x1x1x8xf32> to vector<1x8xf32>
    %58 = vector.broadcast %57 : vector<1x8xf32> to vector<16x8xf32>
    %59 = arith.addf %55, %58 : vector<16x8xf32>
    %c2_56 = arith.constant 2 : index
    %c1_57 = arith.constant 1 : index
    %c0_58 = arith.constant 0 : index
    %c0_59 = arith.constant 0 : index
    %60 = vector.load %arg3[%c2_56, %c1_57, %c0_58, %c0_59] : memref<3x4x32x8xf32, #tpu.memory_space<vmem>>, vector<1x1x32x8xf32>
    %61 = vector.shape_cast %60 : vector<1x1x32x8xf32> to vector<32x8xf32>
    %cst_60 = arith.constant dense<0.000000e+00> : vector<16x8xf32>
    %62 = tpu.matmul %1, %61, %cst_60 {dimension_numbers = #tpu.dot_dimension_numbers<[1], [0], [0], [1], [0, 0, 1, 1], [], []>} : vector<16x32xf32>, vector<32x8xf32>, vector<16x8xf32> -> vector<16x8xf32>
    %c2_61 = arith.constant 2 : index
    %c1_62 = arith.constant 1 : index
    %c0_63 = arith.constant 0 : index
    %c0_64 = arith.constant 0 : index
    %63 = vector.load %arg4[%c2_61, %c1_62, %c0_63, %c0_64] : memref<3x4x1x8xf32, #tpu.memory_space<vmem>>, vector<1x1x1x8xf32>
    %64 = vector.shape_cast %63 : vector<1x1x1x8xf32> to vector<1x8xf32>
    %65 = vector.broadcast %64 : vector<1x8xf32> to vector<16x8xf32>
    %66 = arith.addf %62, %65 : vector<16x8xf32>
    %67 = vector.shape_cast %52 : vector<16x8xf32> to vector<2x8x8xf32>
    %68 = vector.shape_cast %59 : vector<16x8xf32> to vector<2x8x8xf32>
    %69 = vector.shape_cast %66 : vector<16x8xf32> to vector<2x8x8xf32>
    %cst_65 = arith.constant dense<0.000000e+00> : vector<2x8x8xf32>
    %70 = tpu.matmul %67, %68, %cst_65 {dimension_numbers = #tpu.dot_dimension_numbers<[2], [2], [1], [1], [0, 0, 0, 1, 1, 1], [0], [0]>} : vector<2x8x8xf32>, vector<2x8x8xf32>, vector<2x8x8xf32> -> vector<2x8x8xf32>
    %cst_66 = arith.constant dense<0xFF800000> : vector<2x8xf32>
    %71 = vector.multi_reduction <maximumf>, %70, %cst_66 [2] : vector<2x8x8xf32> to vector<2x8xf32>
    %72 = vector.shape_cast %71 : vector<2x8xf32> to vector<2x8x1xf32>
    %73 = vector.broadcast %72 : vector<2x8x1xf32> to vector<2x8x8xf32>
    %74 = arith.subf %70, %73 : vector<2x8x8xf32>
    %75 = math.exp %74 : vector<2x8x8xf32>
    %cst_67 = arith.constant dense<0.000000e+00> : vector<2x8xf32>
    %76 = vector.multi_reduction <add>, %75, %cst_67 [2] : vector<2x8x8xf32> to vector<2x8xf32>
    %77 = vector.shape_cast %76 : vector<2x8xf32> to vector<2x8x1xf32>
    %cst_68 = arith.constant dense<0.000000e+00> : vector<2x8x8xf32>
    %78 = tpu.matmul %75, %69, %cst_68 {dimension_numbers = #tpu.dot_dimension_numbers<[2], [1], [1], [2], [0, 0, 0, 1, 1, 2], [0], [0]>} : vector<2x8x8xf32>, vector<2x8x8xf32>, vector<2x8x8xf32> -> vector<2x8x8xf32>
    %79 = tpu.reciprocal %77 : vector<2x8x1xf32> -> vector<2x8x1xf32>
    %80 = vector.broadcast %79 : vector<2x8x1xf32> to vector<2x8x8xf32>
    %81 = arith.mulf %78, %80 : vector<2x8x8xf32>
    %82 = vector.shape_cast %81 : vector<2x8x8xf32> to vector<16x8xf32>
    %c1_69 = arith.constant 1 : index
    %c0_70 = arith.constant 0 : index
    %c0_71 = arith.constant 0 : index
    %83 = vector.load %arg5[%c1_69, %c0_70, %c0_71] : memref<4x8x32xf32, #tpu.memory_space<vmem>>, vector<1x8x32xf32>
    %84 = vector.shape_cast %83 : vector<1x8x32xf32> to vector<8x32xf32>
    %cst_72 = arith.constant dense<0.000000e+00> : vector<16x32xf32>
    %85 = tpu.matmul %82, %84, %cst_72 {dimension_numbers = #tpu.dot_dimension_numbers<[1], [0], [0], [1], [0, 0, 1, 1], [], []>} : vector<16x8xf32>, vector<8x32xf32>, vector<16x32xf32> -> vector<16x32xf32>
    %86 = arith.addf %45, %85 : vector<16x32xf32>
    %c0_73 = arith.constant 0 : index
    %c2_74 = arith.constant 2 : index
    %c0_75 = arith.constant 0 : index
    %c0_76 = arith.constant 0 : index
    %87 = vector.load %arg3[%c0_73, %c2_74, %c0_75, %c0_76] : memref<3x4x32x8xf32, #tpu.memory_space<vmem>>, vector<1x1x32x8xf32>
    %88 = vector.shape_cast %87 : vector<1x1x32x8xf32> to vector<32x8xf32>
    %cst_77 = arith.constant dense<0.000000e+00> : vector<16x8xf32>
    %89 = tpu.matmul %1, %88, %cst_77 {dimension_numbers = #tpu.dot_dimension_numbers<[1], [0], [0], [1], [0, 0, 1, 1], [], []>} : vector<16x32xf32>, vector<32x8xf32>, vector<16x8xf32> -> vector<16x8xf32>
    %c0_78 = arith.constant 0 : index
    %c2_79 = arith.constant 2 : index
    %c0_80 = arith.constant 0 : index
    %c0_81 = arith.constant 0 : index
    %90 = vector.load %arg4[%c0_78, %c2_79, %c0_80, %c0_81] : memref<3x4x1x8xf32, #tpu.memory_space<vmem>>, vector<1x1x1x8xf32>
    %91 = vector.shape_cast %90 : vector<1x1x1x8xf32> to vector<1x8xf32>
    %92 = vector.broadcast %91 : vector<1x8xf32> to vector<16x8xf32>
    %93 = arith.addf %89, %92 : vector<16x8xf32>
    %c1_82 = arith.constant 1 : index
    %c2_83 = arith.constant 2 : index
    %c0_84 = arith.constant 0 : index
    %c0_85 = arith.constant 0 : index
    %94 = vector.load %arg3[%c1_82, %c2_83, %c0_84, %c0_85] : memref<3x4x32x8xf32, #tpu.memory_space<vmem>>, vector<1x1x32x8xf32>
    %95 = vector.shape_cast %94 : vector<1x1x32x8xf32> to vector<32x8xf32>
    %cst_86 = arith.constant dense<0.000000e+00> : vector<16x8xf32>
    %96 = tpu.matmul %1, %95, %cst_86 {dimension_numbers = #tpu.dot_dimension_numbers<[1], [0], [0], [1], [0, 0, 1, 1], [], []>} : vector<16x32xf32>, vector<32x8xf32>, vector<16x8xf32> -> vector<16x8xf32>
    %c1_87 = arith.constant 1 : index
    %c2_88 = arith.constant 2 : index
    %c0_89 = arith.constant 0 : index
    %c0_90 = arith.constant 0 : index
    %97 = vector.load %arg4[%c1_87, %c2_88, %c0_89, %c0_90] : memref<3x4x1x8xf32, #tpu.memory_space<vmem>>, vector<1x1x1x8xf32>
    %98 = vector.shape_cast %97 : vector<1x1x1x8xf32> to vector<1x8xf32>
    %99 = vector.broadcast %98 : vector<1x8xf32> to vector<16x8xf32>
    %100 = arith.addf %96, %99 : vector<16x8xf32>
    %c2_91 = arith.constant 2 : index
    %c2_92 = arith.constant 2 : index
    %c0_93 = arith.constant 0 : index
    %c0_94 = arith.constant 0 : index
    %101 = vector.load %arg3[%c2_91, %c2_92, %c0_93, %c0_94] : memref<3x4x32x8xf32, #tpu.memory_space<vmem>>, vector<1x1x32x8xf32>
    %102 = vector.shape_cast %101 : vector<1x1x32x8xf32> to vector<32x8xf32>
    %cst_95 = arith.constant dense<0.000000e+00> : vector<16x8xf32>
    %103 = tpu.matmul %1, %102, %cst_95 {dimension_numbers = #tpu.dot_dimension_numbers<[1], [0], [0], [1], [0, 0, 1, 1], [], []>} : vector<16x32xf32>, vector<32x8xf32>, vector<16x8xf32> -> vector<16x8xf32>
    %c2_96 = arith.constant 2 : index
    %c2_97 = arith.constant 2 : index
    %c0_98 = arith.constant 0 : index
    %c0_99 = arith.constant 0 : index
    %104 = vector.load %arg4[%c2_96, %c2_97, %c0_98, %c0_99] : memref<3x4x1x8xf32, #tpu.memory_space<vmem>>, vector<1x1x1x8xf32>
    %105 = vector.shape_cast %104 : vector<1x1x1x8xf32> to vector<1x8xf32>
    %106 = vector.broadcast %105 : vector<1x8xf32> to vector<16x8xf32>
    %107 = arith.addf %103, %106 : vector<16x8xf32>
    %108 = vector.shape_cast %93 : vector<16x8xf32> to vector<2x8x8xf32>
    %109 = vector.shape_cast %100 : vector<16x8xf32> to vector<2x8x8xf32>
    %110 = vector.shape_cast %107 : vector<16x8xf32> to vector<2x8x8xf32>
    %cst_100 = arith.constant dense<0.000000e+00> : vector<2x8x8xf32>
    %111 = tpu.matmul %108, %109, %cst_100 {dimension_numbers = #tpu.dot_dimension_numbers<[2], [2], [1], [1], [0, 0, 0, 1, 1, 1], [0], [0]>} : vector<2x8x8xf32>, vector<2x8x8xf32>, vector<2x8x8xf32> -> vector<2x8x8xf32>
    %cst_101 = arith.constant dense<0xFF800000> : vector<2x8xf32>
    %112 = vector.multi_reduction <maximumf>, %111, %cst_101 [2] : vector<2x8x8xf32> to vector<2x8xf32>
    %113 = vector.shape_cast %112 : vector<2x8xf32> to vector<2x8x1xf32>
    %114 = vector.broadcast %113 : vector<2x8x1xf32> to vector<2x8x8xf32>
    %115 = arith.subf %111, %114 : vector<2x8x8xf32>
    %116 = math.exp %115 : vector<2x8x8xf32>
    %cst_102 = arith.constant dense<0.000000e+00> : vector<2x8xf32>
    %117 = vector.multi_reduction <add>, %116, %cst_102 [2] : vector<2x8x8xf32> to vector<2x8xf32>
    %118 = vector.shape_cast %117 : vector<2x8xf32> to vector<2x8x1xf32>
    %cst_103 = arith.constant dense<0.000000e+00> : vector<2x8x8xf32>
    %119 = tpu.matmul %116, %110, %cst_103 {dimension_numbers = #tpu.dot_dimension_numbers<[2], [1], [1], [2], [0, 0, 0, 1, 1, 2], [0], [0]>} : vector<2x8x8xf32>, vector<2x8x8xf32>, vector<2x8x8xf32> -> vector<2x8x8xf32>
    %120 = tpu.reciprocal %118 : vector<2x8x1xf32> -> vector<2x8x1xf32>
    %121 = vector.broadcast %120 : vector<2x8x1xf32> to vector<2x8x8xf32>
    %122 = arith.mulf %119, %121 : vector<2x8x8xf32>
    %123 = vector.shape_cast %122 : vector<2x8x8xf32> to vector<16x8xf32>
    %c2_104 = arith.constant 2 : index
    %c0_105 = arith.constant 0 : index
    %c0_106 = arith.constant 0 : index
    %124 = vector.load %arg5[%c2_104, %c0_105, %c0_106] : memref<4x8x32xf32, #tpu.memory_space<vmem>>, vector<1x8x32xf32>
    %125 = vector.shape_cast %124 : vector<1x8x32xf32> to vector<8x32xf32>
    %cst_107 = arith.constant dense<0.000000e+00> : vector<16x32xf32>
    %126 = tpu.matmul %123, %125, %cst_107 {dimension_numbers = #tpu.dot_dimension_numbers<[1], [0], [0], [1], [0, 0, 1, 1], [], []>} : vector<16x8xf32>, vector<8x32xf32>, vector<16x32xf32> -> vector<16x32xf32>
    %127 = arith.addf %86, %126 : vector<16x32xf32>
    %c0_108 = arith.constant 0 : index
    %c3 = arith.constant 3 : index
    %c0_109 = arith.constant 0 : index
    %c0_110 = arith.constant 0 : index
    %128 = vector.load %arg3[%c0_108, %c3, %c0_109, %c0_110] : memref<3x4x32x8xf32, #tpu.memory_space<vmem>>, vector<1x1x32x8xf32>
    %129 = vector.shape_cast %128 : vector<1x1x32x8xf32> to vector<32x8xf32>
    %cst_111 = arith.constant dense<0.000000e+00> : vector<16x8xf32>
    %130 = tpu.matmul %1, %129, %cst_111 {dimension_numbers = #tpu.dot_dimension_numbers<[1], [0], [0], [1], [0, 0, 1, 1], [], []>} : vector<16x32xf32>, vector<32x8xf32>, vector<16x8xf32> -> vector<16x8xf32>
    %c0_112 = arith.constant 0 : index
    %c3_113 = arith.constant 3 : index
    %c0_114 = arith.constant 0 : index
    %c0_115 = arith.constant 0 : index
    %131 = vector.load %arg4[%c0_112, %c3_113, %c0_114, %c0_115] : memref<3x4x1x8xf32, #tpu.memory_space<vmem>>, vector<1x1x1x8xf32>
    %132 = vector.shape_cast %131 : vector<1x1x1x8xf32> to vector<1x8xf32>
    %133 = vector.broadcast %132 : vector<1x8xf32> to vector<16x8xf32>
    %134 = arith.addf %130, %133 : vector<16x8xf32>
    %c1_116 = arith.constant 1 : index
    %c3_117 = arith.constant 3 : index
    %c0_118 = arith.constant 0 : index
    %c0_119 = arith.constant 0 : index
    %135 = vector.load %arg3[%c1_116, %c3_117, %c0_118, %c0_119] : memref<3x4x32x8xf32, #tpu.memory_space<vmem>>, vector<1x1x32x8xf32>
    %136 = vector.shape_cast %135 : vector<1x1x32x8xf32> to vector<32x8xf32>
    %cst_120 = arith.constant dense<0.000000e+00> : vector<16x8xf32>
    %137 = tpu.matmul %1, %136, %cst_120 {dimension_numbers = #tpu.dot_dimension_numbers<[1], [0], [0], [1], [0, 0, 1, 1], [], []>} : vector<16x32xf32>, vector<32x8xf32>, vector<16x8xf32> -> vector<16x8xf32>
    %c1_121 = arith.constant 1 : index
    %c3_122 = arith.constant 3 : index
    %c0_123 = arith.constant 0 : index
    %c0_124 = arith.constant 0 : index
    %138 = vector.load %arg4[%c1_121, %c3_122, %c0_123, %c0_124] : memref<3x4x1x8xf32, #tpu.memory_space<vmem>>, vector<1x1x1x8xf32>
    %139 = vector.shape_cast %138 : vector<1x1x1x8xf32> to vector<1x8xf32>
    %140 = vector.broadcast %139 : vector<1x8xf32> to vector<16x8xf32>
    %141 = arith.addf %137, %140 : vector<16x8xf32>
    %c2_125 = arith.constant 2 : index
    %c3_126 = arith.constant 3 : index
    %c0_127 = arith.constant 0 : index
    %c0_128 = arith.constant 0 : index
    %142 = vector.load %arg3[%c2_125, %c3_126, %c0_127, %c0_128] : memref<3x4x32x8xf32, #tpu.memory_space<vmem>>, vector<1x1x32x8xf32>
    %143 = vector.shape_cast %142 : vector<1x1x32x8xf32> to vector<32x8xf32>
    %cst_129 = arith.constant dense<0.000000e+00> : vector<16x8xf32>
    %144 = tpu.matmul %1, %143, %cst_129 {dimension_numbers = #tpu.dot_dimension_numbers<[1], [0], [0], [1], [0, 0, 1, 1], [], []>} : vector<16x32xf32>, vector<32x8xf32>, vector<16x8xf32> -> vector<16x8xf32>
    %c2_130 = arith.constant 2 : index
    %c3_131 = arith.constant 3 : index
    %c0_132 = arith.constant 0 : index
    %c0_133 = arith.constant 0 : index
    %145 = vector.load %arg4[%c2_130, %c3_131, %c0_132, %c0_133] : memref<3x4x1x8xf32, #tpu.memory_space<vmem>>, vector<1x1x1x8xf32>
    %146 = vector.shape_cast %145 : vector<1x1x1x8xf32> to vector<1x8xf32>
    %147 = vector.broadcast %146 : vector<1x8xf32> to vector<16x8xf32>
    %148 = arith.addf %144, %147 : vector<16x8xf32>
    %149 = vector.shape_cast %134 : vector<16x8xf32> to vector<2x8x8xf32>
    %150 = vector.shape_cast %141 : vector<16x8xf32> to vector<2x8x8xf32>
    %151 = vector.shape_cast %148 : vector<16x8xf32> to vector<2x8x8xf32>
    %cst_134 = arith.constant dense<0.000000e+00> : vector<2x8x8xf32>
    %152 = tpu.matmul %149, %150, %cst_134 {dimension_numbers = #tpu.dot_dimension_numbers<[2], [2], [1], [1], [0, 0, 0, 1, 1, 1], [0], [0]>} : vector<2x8x8xf32>, vector<2x8x8xf32>, vector<2x8x8xf32> -> vector<2x8x8xf32>
    %cst_135 = arith.constant dense<0xFF800000> : vector<2x8xf32>
    %153 = vector.multi_reduction <maximumf>, %152, %cst_135 [2] : vector<2x8x8xf32> to vector<2x8xf32>
    %154 = vector.shape_cast %153 : vector<2x8xf32> to vector<2x8x1xf32>
    %155 = vector.broadcast %154 : vector<2x8x1xf32> to vector<2x8x8xf32>
    %156 = arith.subf %152, %155 : vector<2x8x8xf32>
    %157 = math.exp %156 : vector<2x8x8xf32>
    %cst_136 = arith.constant dense<0.000000e+00> : vector<2x8xf32>
    %158 = vector.multi_reduction <add>, %157, %cst_136 [2] : vector<2x8x8xf32> to vector<2x8xf32>
    %159 = vector.shape_cast %158 : vector<2x8xf32> to vector<2x8x1xf32>
    %cst_137 = arith.constant dense<0.000000e+00> : vector<2x8x8xf32>
    %160 = tpu.matmul %157, %151, %cst_137 {dimension_numbers = #tpu.dot_dimension_numbers<[2], [1], [1], [2], [0, 0, 0, 1, 1, 2], [0], [0]>} : vector<2x8x8xf32>, vector<2x8x8xf32>, vector<2x8x8xf32> -> vector<2x8x8xf32>
    %161 = tpu.reciprocal %159 : vector<2x8x1xf32> -> vector<2x8x1xf32>
    %162 = vector.broadcast %161 : vector<2x8x1xf32> to vector<2x8x8xf32>
    %163 = arith.mulf %160, %162 : vector<2x8x8xf32>
    %164 = vector.shape_cast %163 : vector<2x8x8xf32> to vector<16x8xf32>
    %c3_138 = arith.constant 3 : index
    %c0_139 = arith.constant 0 : index
    %c0_140 = arith.constant 0 : index
    %165 = vector.load %arg5[%c3_138, %c0_139, %c0_140] : memref<4x8x32xf32, #tpu.memory_space<vmem>>, vector<1x8x32xf32>
    %166 = vector.shape_cast %165 : vector<1x8x32xf32> to vector<8x32xf32>
    %cst_141 = arith.constant dense<0.000000e+00> : vector<16x32xf32>
    %167 = tpu.matmul %164, %166, %cst_141 {dimension_numbers = #tpu.dot_dimension_numbers<[1], [0], [0], [1], [0, 0, 1, 1], [], []>} : vector<16x8xf32>, vector<8x32xf32>, vector<16x32xf32> -> vector<16x32xf32>
    %168 = arith.addf %127, %167 : vector<16x32xf32>
    %c0_142 = arith.constant 0 : index
    %c0_143 = arith.constant 0 : index
    %169 = vector.load %arg6[%c0_142, %c0_143] : memref<1x32xf32, #tpu.memory_space<vmem>>, vector<1x32xf32>
    %170 = vector.broadcast %169 : vector<1x32xf32> to vector<16x32xf32>
    %171 = arith.addf %168, %170 : vector<16x32xf32>
    %172 = arith.addf %1, %171 : vector<16x32xf32>
    %c0_144 = arith.constant 0 : index
    %c0_145 = arith.constant 0 : index
    %173 = vector.load %arg7[%c0_144, %c0_145] : memref<1x32xf32, #tpu.memory_space<vmem>>, vector<1x32xf32>
    %c0_146 = arith.constant 0 : index
    %c0_147 = arith.constant 0 : index
    %174 = vector.load %arg8[%c0_146, %c0_147] : memref<1x32xf32, #tpu.memory_space<vmem>>, vector<1x32xf32>
    %cst_148 = arith.constant dense<0.000000e+00> : vector<16xf32>
    %175 = vector.multi_reduction <add>, %172, %cst_148 [1] : vector<16x32xf32> to vector<16xf32>
    %176 = vector.shape_cast %175 : vector<16xf32> to vector<16x1xf32>
    %cst_149 = arith.constant 3.200000e+01 : f32
    %177 = vector.broadcast %cst_149 : f32 to vector<16x1xf32>
    %178 = arith.divf %176, %177 : vector<16x1xf32>
    %179 = vector.broadcast %178 : vector<16x1xf32> to vector<16x32xf32>
    %180 = arith.subf %172, %179 : vector<16x32xf32>
    %181 = arith.mulf %180, %180 : vector<16x32xf32>
    %cst_150 = arith.constant dense<0.000000e+00> : vector<16xf32>
    %182 = vector.multi_reduction <add>, %181, %cst_150 [1] : vector<16x32xf32> to vector<16xf32>
    %183 = vector.shape_cast %182 : vector<16xf32> to vector<16x1xf32>
    %cst_151 = arith.constant 3.200000e+01 : f32
    %184 = vector.broadcast %cst_151 : f32 to vector<16x1xf32>
    %185 = arith.divf %183, %184 : vector<16x1xf32>
    %cst_152 = arith.constant 9.99999974E-6 : f32
    %186 = vector.broadcast %cst_152 : f32 to vector<16x1xf32>
    %187 = arith.addf %185, %186 : vector<16x1xf32>
    %188 = math.rsqrt %187 : vector<16x1xf32>
    %189 = vector.broadcast %188 : vector<16x1xf32> to vector<16x32xf32>
    %190 = arith.mulf %180, %189 : vector<16x32xf32>
    %191 = vector.broadcast %173 : vector<1x32xf32> to vector<16x32xf32>
    %192 = arith.mulf %190, %191 : vector<16x32xf32>
    %193 = vector.broadcast %174 : vector<1x32xf32> to vector<16x32xf32>
    %194 = arith.addf %192, %193 : vector<16x32xf32>
    %cst_153 = arith.constant 0.000000e+00 : f32
    %195 = vector.broadcast %cst_153 : f32 to vector<16x32xf32>
    %c0_154 = arith.constant 0 : index
    %c0_155 = arith.constant 0 : index
    %c0_156 = arith.constant 0 : index
    %c0_157 = arith.constant 0 : index
    %196 = vector.load %arg9[%c0_154, %c0_155, %c0_156, %c0_157] : memref<3x4x32x8xf32, #tpu.memory_space<vmem>>, vector<1x1x32x8xf32>
    %197 = vector.shape_cast %196 : vector<1x1x32x8xf32> to vector<32x8xf32>
    %cst_158 = arith.constant dense<0.000000e+00> : vector<16x8xf32>
    %198 = tpu.matmul %3, %197, %cst_158 {dimension_numbers = #tpu.dot_dimension_numbers<[1], [0], [0], [1], [0, 0, 1, 1], [], []>} : vector<16x32xf32>, vector<32x8xf32>, vector<16x8xf32> -> vector<16x8xf32>
    %c0_159 = arith.constant 0 : index
    %c0_160 = arith.constant 0 : index
    %c0_161 = arith.constant 0 : index
    %c0_162 = arith.constant 0 : index
    %199 = vector.load %arg10[%c0_159, %c0_160, %c0_161, %c0_162] : memref<3x4x1x8xf32, #tpu.memory_space<vmem>>, vector<1x1x1x8xf32>
    %200 = vector.shape_cast %199 : vector<1x1x1x8xf32> to vector<1x8xf32>
    %201 = vector.broadcast %200 : vector<1x8xf32> to vector<16x8xf32>
    %202 = arith.addf %198, %201 : vector<16x8xf32>
    %c1_163 = arith.constant 1 : index
    %c0_164 = arith.constant 0 : index
    %c0_165 = arith.constant 0 : index
    %c0_166 = arith.constant 0 : index
    %203 = vector.load %arg9[%c1_163, %c0_164, %c0_165, %c0_166] : memref<3x4x32x8xf32, #tpu.memory_space<vmem>>, vector<1x1x32x8xf32>
    %204 = vector.shape_cast %203 : vector<1x1x32x8xf32> to vector<32x8xf32>
    %cst_167 = arith.constant dense<0.000000e+00> : vector<16x8xf32>
    %205 = tpu.matmul %3, %204, %cst_167 {dimension_numbers = #tpu.dot_dimension_numbers<[1], [0], [0], [1], [0, 0, 1, 1], [], []>} : vector<16x32xf32>, vector<32x8xf32>, vector<16x8xf32> -> vector<16x8xf32>
    %c1_168 = arith.constant 1 : index
    %c0_169 = arith.constant 0 : index
    %c0_170 = arith.constant 0 : index
    %c0_171 = arith.constant 0 : index
    %206 = vector.load %arg10[%c1_168, %c0_169, %c0_170, %c0_171] : memref<3x4x1x8xf32, #tpu.memory_space<vmem>>, vector<1x1x1x8xf32>
    %207 = vector.shape_cast %206 : vector<1x1x1x8xf32> to vector<1x8xf32>
    %208 = vector.broadcast %207 : vector<1x8xf32> to vector<16x8xf32>
    %209 = arith.addf %205, %208 : vector<16x8xf32>
    %c2_172 = arith.constant 2 : index
    %c0_173 = arith.constant 0 : index
    %c0_174 = arith.constant 0 : index
    %c0_175 = arith.constant 0 : index
    %210 = vector.load %arg9[%c2_172, %c0_173, %c0_174, %c0_175] : memref<3x4x32x8xf32, #tpu.memory_space<vmem>>, vector<1x1x32x8xf32>
    %211 = vector.shape_cast %210 : vector<1x1x32x8xf32> to vector<32x8xf32>
    %cst_176 = arith.constant dense<0.000000e+00> : vector<16x8xf32>
    %212 = tpu.matmul %194, %211, %cst_176 {dimension_numbers = #tpu.dot_dimension_numbers<[1], [0], [0], [1], [0, 0, 1, 1], [], []>} : vector<16x32xf32>, vector<32x8xf32>, vector<16x8xf32> -> vector<16x8xf32>
    %c2_177 = arith.constant 2 : index
    %c0_178 = arith.constant 0 : index
    %c0_179 = arith.constant 0 : index
    %c0_180 = arith.constant 0 : index
    %213 = vector.load %arg10[%c2_177, %c0_178, %c0_179, %c0_180] : memref<3x4x1x8xf32, #tpu.memory_space<vmem>>, vector<1x1x1x8xf32>
    %214 = vector.shape_cast %213 : vector<1x1x1x8xf32> to vector<1x8xf32>
    %215 = vector.broadcast %214 : vector<1x8xf32> to vector<16x8xf32>
    %216 = arith.addf %212, %215 : vector<16x8xf32>
    %217 = vector.shape_cast %202 : vector<16x8xf32> to vector<2x8x8xf32>
    %218 = vector.shape_cast %209 : vector<16x8xf32> to vector<2x8x8xf32>
    %219 = vector.shape_cast %216 : vector<16x8xf32> to vector<2x8x8xf32>
    %cst_181 = arith.constant dense<0.000000e+00> : vector<2x8x8xf32>
    %220 = tpu.matmul %217, %218, %cst_181 {dimension_numbers = #tpu.dot_dimension_numbers<[2], [2], [1], [1], [0, 0, 0, 1, 1, 1], [0], [0]>} : vector<2x8x8xf32>, vector<2x8x8xf32>, vector<2x8x8xf32> -> vector<2x8x8xf32>
    %cst_182 = arith.constant dense<0xFF800000> : vector<2x8xf32>
    %221 = vector.multi_reduction <maximumf>, %220, %cst_182 [2] : vector<2x8x8xf32> to vector<2x8xf32>
    %222 = vector.shape_cast %221 : vector<2x8xf32> to vector<2x8x1xf32>
    %223 = vector.broadcast %222 : vector<2x8x1xf32> to vector<2x8x8xf32>
    %224 = arith.subf %220, %223 : vector<2x8x8xf32>
    %225 = math.exp %224 : vector<2x8x8xf32>
    %cst_183 = arith.constant dense<0.000000e+00> : vector<2x8xf32>
    %226 = vector.multi_reduction <add>, %225, %cst_183 [2] : vector<2x8x8xf32> to vector<2x8xf32>
    %227 = vector.shape_cast %226 : vector<2x8xf32> to vector<2x8x1xf32>
    %cst_184 = arith.constant dense<0.000000e+00> : vector<2x8x8xf32>
    %228 = tpu.matmul %225, %219, %cst_184 {dimension_numbers = #tpu.dot_dimension_numbers<[2], [1], [1], [2], [0, 0, 0, 1, 1, 2], [0], [0]>} : vector<2x8x8xf32>, vector<2x8x8xf32>, vector<2x8x8xf32> -> vector<2x8x8xf32>
    %229 = tpu.reciprocal %227 : vector<2x8x1xf32> -> vector<2x8x1xf32>
    %230 = vector.broadcast %229 : vector<2x8x1xf32> to vector<2x8x8xf32>
    %231 = arith.mulf %228, %230 : vector<2x8x8xf32>
    %232 = vector.shape_cast %231 : vector<2x8x8xf32> to vector<16x8xf32>
    %c0_185 = arith.constant 0 : index
    %c0_186 = arith.constant 0 : index
    %c0_187 = arith.constant 0 : index
    %233 = vector.load %arg11[%c0_185, %c0_186, %c0_187] : memref<4x8x32xf32, #tpu.memory_space<vmem>>, vector<1x8x32xf32>
    %234 = vector.shape_cast %233 : vector<1x8x32xf32> to vector<8x32xf32>
    %cst_188 = arith.constant dense<0.000000e+00> : vector<16x32xf32>
    %235 = tpu.matmul %232, %234, %cst_188 {dimension_numbers = #tpu.dot_dimension_numbers<[1], [0], [0], [1], [0, 0, 1, 1], [], []>} : vector<16x8xf32>, vector<8x32xf32>, vector<16x32xf32> -> vector<16x32xf32>
    %236 = arith.addf %195, %235 : vector<16x32xf32>
    %c0_189 = arith.constant 0 : index
    %c1_190 = arith.constant 1 : index
    %c0_191 = arith.constant 0 : index
    %c0_192 = arith.constant 0 : index
    %237 = vector.load %arg9[%c0_189, %c1_190, %c0_191, %c0_192] : memref<3x4x32x8xf32, #tpu.memory_space<vmem>>, vector<1x1x32x8xf32>
    %238 = vector.shape_cast %237 : vector<1x1x32x8xf32> to vector<32x8xf32>
    %cst_193 = arith.constant dense<0.000000e+00> : vector<16x8xf32>
    %239 = tpu.matmul %3, %238, %cst_193 {dimension_numbers = #tpu.dot_dimension_numbers<[1], [0], [0], [1], [0, 0, 1, 1], [], []>} : vector<16x32xf32>, vector<32x8xf32>, vector<16x8xf32> -> vector<16x8xf32>
    %c0_194 = arith.constant 0 : index
    %c1_195 = arith.constant 1 : index
    %c0_196 = arith.constant 0 : index
    %c0_197 = arith.constant 0 : index
    %240 = vector.load %arg10[%c0_194, %c1_195, %c0_196, %c0_197] : memref<3x4x1x8xf32, #tpu.memory_space<vmem>>, vector<1x1x1x8xf32>
    %241 = vector.shape_cast %240 : vector<1x1x1x8xf32> to vector<1x8xf32>
    %242 = vector.broadcast %241 : vector<1x8xf32> to vector<16x8xf32>
    %243 = arith.addf %239, %242 : vector<16x8xf32>
    %c1_198 = arith.constant 1 : index
    %c1_199 = arith.constant 1 : index
    %c0_200 = arith.constant 0 : index
    %c0_201 = arith.constant 0 : index
    %244 = vector.load %arg9[%c1_198, %c1_199, %c0_200, %c0_201] : memref<3x4x32x8xf32, #tpu.memory_space<vmem>>, vector<1x1x32x8xf32>
    %245 = vector.shape_cast %244 : vector<1x1x32x8xf32> to vector<32x8xf32>
    %cst_202 = arith.constant dense<0.000000e+00> : vector<16x8xf32>
    %246 = tpu.matmul %3, %245, %cst_202 {dimension_numbers = #tpu.dot_dimension_numbers<[1], [0], [0], [1], [0, 0, 1, 1], [], []>} : vector<16x32xf32>, vector<32x8xf32>, vector<16x8xf32> -> vector<16x8xf32>
    %c1_203 = arith.constant 1 : index
    %c1_204 = arith.constant 1 : index
    %c0_205 = arith.constant 0 : index
    %c0_206 = arith.constant 0 : index
    %247 = vector.load %arg10[%c1_203, %c1_204, %c0_205, %c0_206] : memref<3x4x1x8xf32, #tpu.memory_space<vmem>>, vector<1x1x1x8xf32>
    %248 = vector.shape_cast %247 : vector<1x1x1x8xf32> to vector<1x8xf32>
    %249 = vector.broadcast %248 : vector<1x8xf32> to vector<16x8xf32>
    %250 = arith.addf %246, %249 : vector<16x8xf32>
    %c2_207 = arith.constant 2 : index
    %c1_208 = arith.constant 1 : index
    %c0_209 = arith.constant 0 : index
    %c0_210 = arith.constant 0 : index
    %251 = vector.load %arg9[%c2_207, %c1_208, %c0_209, %c0_210] : memref<3x4x32x8xf32, #tpu.memory_space<vmem>>, vector<1x1x32x8xf32>
    %252 = vector.shape_cast %251 : vector<1x1x32x8xf32> to vector<32x8xf32>
    %cst_211 = arith.constant dense<0.000000e+00> : vector<16x8xf32>
    %253 = tpu.matmul %194, %252, %cst_211 {dimension_numbers = #tpu.dot_dimension_numbers<[1], [0], [0], [1], [0, 0, 1, 1], [], []>} : vector<16x32xf32>, vector<32x8xf32>, vector<16x8xf32> -> vector<16x8xf32>
    %c2_212 = arith.constant 2 : index
    %c1_213 = arith.constant 1 : index
    %c0_214 = arith.constant 0 : index
    %c0_215 = arith.constant 0 : index
    %254 = vector.load %arg10[%c2_212, %c1_213, %c0_214, %c0_215] : memref<3x4x1x8xf32, #tpu.memory_space<vmem>>, vector<1x1x1x8xf32>
    %255 = vector.shape_cast %254 : vector<1x1x1x8xf32> to vector<1x8xf32>
    %256 = vector.broadcast %255 : vector<1x8xf32> to vector<16x8xf32>
    %257 = arith.addf %253, %256 : vector<16x8xf32>
    %258 = vector.shape_cast %243 : vector<16x8xf32> to vector<2x8x8xf32>
    %259 = vector.shape_cast %250 : vector<16x8xf32> to vector<2x8x8xf32>
    %260 = vector.shape_cast %257 : vector<16x8xf32> to vector<2x8x8xf32>
    %cst_216 = arith.constant dense<0.000000e+00> : vector<2x8x8xf32>
    %261 = tpu.matmul %258, %259, %cst_216 {dimension_numbers = #tpu.dot_dimension_numbers<[2], [2], [1], [1], [0, 0, 0, 1, 1, 1], [0], [0]>} : vector<2x8x8xf32>, vector<2x8x8xf32>, vector<2x8x8xf32> -> vector<2x8x8xf32>
    %cst_217 = arith.constant dense<0xFF800000> : vector<2x8xf32>
    %262 = vector.multi_reduction <maximumf>, %261, %cst_217 [2] : vector<2x8x8xf32> to vector<2x8xf32>
    %263 = vector.shape_cast %262 : vector<2x8xf32> to vector<2x8x1xf32>
    %264 = vector.broadcast %263 : vector<2x8x1xf32> to vector<2x8x8xf32>
    %265 = arith.subf %261, %264 : vector<2x8x8xf32>
    %266 = math.exp %265 : vector<2x8x8xf32>
    %cst_218 = arith.constant dense<0.000000e+00> : vector<2x8xf32>
    %267 = vector.multi_reduction <add>, %266, %cst_218 [2] : vector<2x8x8xf32> to vector<2x8xf32>
    %268 = vector.shape_cast %267 : vector<2x8xf32> to vector<2x8x1xf32>
    %cst_219 = arith.constant dense<0.000000e+00> : vector<2x8x8xf32>
    %269 = tpu.matmul %266, %260, %cst_219 {dimension_numbers = #tpu.dot_dimension_numbers<[2], [1], [1], [2], [0, 0, 0, 1, 1, 2], [0], [0]>} : vector<2x8x8xf32>, vector<2x8x8xf32>, vector<2x8x8xf32> -> vector<2x8x8xf32>
    %270 = tpu.reciprocal %268 : vector<2x8x1xf32> -> vector<2x8x1xf32>
    %271 = vector.broadcast %270 : vector<2x8x1xf32> to vector<2x8x8xf32>
    %272 = arith.mulf %269, %271 : vector<2x8x8xf32>
    %273 = vector.shape_cast %272 : vector<2x8x8xf32> to vector<16x8xf32>
    %c1_220 = arith.constant 1 : index
    %c0_221 = arith.constant 0 : index
    %c0_222 = arith.constant 0 : index
    %274 = vector.load %arg11[%c1_220, %c0_221, %c0_222] : memref<4x8x32xf32, #tpu.memory_space<vmem>>, vector<1x8x32xf32>
    %275 = vector.shape_cast %274 : vector<1x8x32xf32> to vector<8x32xf32>
    %cst_223 = arith.constant dense<0.000000e+00> : vector<16x32xf32>
    %276 = tpu.matmul %273, %275, %cst_223 {dimension_numbers = #tpu.dot_dimension_numbers<[1], [0], [0], [1], [0, 0, 1, 1], [], []>} : vector<16x8xf32>, vector<8x32xf32>, vector<16x32xf32> -> vector<16x32xf32>
    %277 = arith.addf %236, %276 : vector<16x32xf32>
    %c0_224 = arith.constant 0 : index
    %c2_225 = arith.constant 2 : index
    %c0_226 = arith.constant 0 : index
    %c0_227 = arith.constant 0 : index
    %278 = vector.load %arg9[%c0_224, %c2_225, %c0_226, %c0_227] : memref<3x4x32x8xf32, #tpu.memory_space<vmem>>, vector<1x1x32x8xf32>
    %279 = vector.shape_cast %278 : vector<1x1x32x8xf32> to vector<32x8xf32>
    %cst_228 = arith.constant dense<0.000000e+00> : vector<16x8xf32>
    %280 = tpu.matmul %3, %279, %cst_228 {dimension_numbers = #tpu.dot_dimension_numbers<[1], [0], [0], [1], [0, 0, 1, 1], [], []>} : vector<16x32xf32>, vector<32x8xf32>, vector<16x8xf32> -> vector<16x8xf32>
    %c0_229 = arith.constant 0 : index
    %c2_230 = arith.constant 2 : index
    %c0_231 = arith.constant 0 : index
    %c0_232 = arith.constant 0 : index
    %281 = vector.load %arg10[%c0_229, %c2_230, %c0_231, %c0_232] : memref<3x4x1x8xf32, #tpu.memory_space<vmem>>, vector<1x1x1x8xf32>
    %282 = vector.shape_cast %281 : vector<1x1x1x8xf32> to vector<1x8xf32>
    %283 = vector.broadcast %282 : vector<1x8xf32> to vector<16x8xf32>
    %284 = arith.addf %280, %283 : vector<16x8xf32>
    %c1_233 = arith.constant 1 : index
    %c2_234 = arith.constant 2 : index
    %c0_235 = arith.constant 0 : index
    %c0_236 = arith.constant 0 : index
    %285 = vector.load %arg9[%c1_233, %c2_234, %c0_235, %c0_236] : memref<3x4x32x8xf32, #tpu.memory_space<vmem>>, vector<1x1x32x8xf32>
    %286 = vector.shape_cast %285 : vector<1x1x32x8xf32> to vector<32x8xf32>
    %cst_237 = arith.constant dense<0.000000e+00> : vector<16x8xf32>
    %287 = tpu.matmul %3, %286, %cst_237 {dimension_numbers = #tpu.dot_dimension_numbers<[1], [0], [0], [1], [0, 0, 1, 1], [], []>} : vector<16x32xf32>, vector<32x8xf32>, vector<16x8xf32> -> vector<16x8xf32>
    %c1_238 = arith.constant 1 : index
    %c2_239 = arith.constant 2 : index
    %c0_240 = arith.constant 0 : index
    %c0_241 = arith.constant 0 : index
    %288 = vector.load %arg10[%c1_238, %c2_239, %c0_240, %c0_241] : memref<3x4x1x8xf32, #tpu.memory_space<vmem>>, vector<1x1x1x8xf32>
    %289 = vector.shape_cast %288 : vector<1x1x1x8xf32> to vector<1x8xf32>
    %290 = vector.broadcast %289 : vector<1x8xf32> to vector<16x8xf32>
    %291 = arith.addf %287, %290 : vector<16x8xf32>
    %c2_242 = arith.constant 2 : index
    %c2_243 = arith.constant 2 : index
    %c0_244 = arith.constant 0 : index
    %c0_245 = arith.constant 0 : index
    %292 = vector.load %arg9[%c2_242, %c2_243, %c0_244, %c0_245] : memref<3x4x32x8xf32, #tpu.memory_space<vmem>>, vector<1x1x32x8xf32>
    %293 = vector.shape_cast %292 : vector<1x1x32x8xf32> to vector<32x8xf32>
    %cst_246 = arith.constant dense<0.000000e+00> : vector<16x8xf32>
    %294 = tpu.matmul %194, %293, %cst_246 {dimension_numbers = #tpu.dot_dimension_numbers<[1], [0], [0], [1], [0, 0, 1, 1], [], []>} : vector<16x32xf32>, vector<32x8xf32>, vector<16x8xf32> -> vector<16x8xf32>
    %c2_247 = arith.constant 2 : index
    %c2_248 = arith.constant 2 : index
    %c0_249 = arith.constant 0 : index
    %c0_250 = arith.constant 0 : index
    %295 = vector.load %arg10[%c2_247, %c2_248, %c0_249, %c0_250] : memref<3x4x1x8xf32, #tpu.memory_space<vmem>>, vector<1x1x1x8xf32>
    %296 = vector.shape_cast %295 : vector<1x1x1x8xf32> to vector<1x8xf32>
    %297 = vector.broadcast %296 : vector<1x8xf32> to vector<16x8xf32>
    %298 = arith.addf %294, %297 : vector<16x8xf32>
    %299 = vector.shape_cast %284 : vector<16x8xf32> to vector<2x8x8xf32>
    %300 = vector.shape_cast %291 : vector<16x8xf32> to vector<2x8x8xf32>
    %301 = vector.shape_cast %298 : vector<16x8xf32> to vector<2x8x8xf32>
    %cst_251 = arith.constant dense<0.000000e+00> : vector<2x8x8xf32>
    %302 = tpu.matmul %299, %300, %cst_251 {dimension_numbers = #tpu.dot_dimension_numbers<[2], [2], [1], [1], [0, 0, 0, 1, 1, 1], [0], [0]>} : vector<2x8x8xf32>, vector<2x8x8xf32>, vector<2x8x8xf32> -> vector<2x8x8xf32>
    %cst_252 = arith.constant dense<0xFF800000> : vector<2x8xf32>
    %303 = vector.multi_reduction <maximumf>, %302, %cst_252 [2] : vector<2x8x8xf32> to vector<2x8xf32>
    %304 = vector.shape_cast %303 : vector<2x8xf32> to vector<2x8x1xf32>
    %305 = vector.broadcast %304 : vector<2x8x1xf32> to vector<2x8x8xf32>
    %306 = arith.subf %302, %305 : vector<2x8x8xf32>
    %307 = math.exp %306 : vector<2x8x8xf32>
    %cst_253 = arith.constant dense<0.000000e+00> : vector<2x8xf32>
    %308 = vector.multi_reduction <add>, %307, %cst_253 [2] : vector<2x8x8xf32> to vector<2x8xf32>
    %309 = vector.shape_cast %308 : vector<2x8xf32> to vector<2x8x1xf32>
    %cst_254 = arith.constant dense<0.000000e+00> : vector<2x8x8xf32>
    %310 = tpu.matmul %307, %301, %cst_254 {dimension_numbers = #tpu.dot_dimension_numbers<[2], [1], [1], [2], [0, 0, 0, 1, 1, 2], [0], [0]>} : vector<2x8x8xf32>, vector<2x8x8xf32>, vector<2x8x8xf32> -> vector<2x8x8xf32>
    %311 = tpu.reciprocal %309 : vector<2x8x1xf32> -> vector<2x8x1xf32>
    %312 = vector.broadcast %311 : vector<2x8x1xf32> to vector<2x8x8xf32>
    %313 = arith.mulf %310, %312 : vector<2x8x8xf32>
    %314 = vector.shape_cast %313 : vector<2x8x8xf32> to vector<16x8xf32>
    %c2_255 = arith.constant 2 : index
    %c0_256 = arith.constant 0 : index
    %c0_257 = arith.constant 0 : index
    %315 = vector.load %arg11[%c2_255, %c0_256, %c0_257] : memref<4x8x32xf32, #tpu.memory_space<vmem>>, vector<1x8x32xf32>
    %316 = vector.shape_cast %315 : vector<1x8x32xf32> to vector<8x32xf32>
    %cst_258 = arith.constant dense<0.000000e+00> : vector<16x32xf32>
    %317 = tpu.matmul %314, %316, %cst_258 {dimension_numbers = #tpu.dot_dimension_numbers<[1], [0], [0], [1], [0, 0, 1, 1], [], []>} : vector<16x8xf32>, vector<8x32xf32>, vector<16x32xf32> -> vector<16x32xf32>
    %318 = arith.addf %277, %317 : vector<16x32xf32>
    %c0_259 = arith.constant 0 : index
    %c3_260 = arith.constant 3 : index
    %c0_261 = arith.constant 0 : index
    %c0_262 = arith.constant 0 : index
    %319 = vector.load %arg9[%c0_259, %c3_260, %c0_261, %c0_262] : memref<3x4x32x8xf32, #tpu.memory_space<vmem>>, vector<1x1x32x8xf32>
    %320 = vector.shape_cast %319 : vector<1x1x32x8xf32> to vector<32x8xf32>
    %cst_263 = arith.constant dense<0.000000e+00> : vector<16x8xf32>
    %321 = tpu.matmul %3, %320, %cst_263 {dimension_numbers = #tpu.dot_dimension_numbers<[1], [0], [0], [1], [0, 0, 1, 1], [], []>} : vector<16x32xf32>, vector<32x8xf32>, vector<16x8xf32> -> vector<16x8xf32>
    %c0_264 = arith.constant 0 : index
    %c3_265 = arith.constant 3 : index
    %c0_266 = arith.constant 0 : index
    %c0_267 = arith.constant 0 : index
    %322 = vector.load %arg10[%c0_264, %c3_265, %c0_266, %c0_267] : memref<3x4x1x8xf32, #tpu.memory_space<vmem>>, vector<1x1x1x8xf32>
    %323 = vector.shape_cast %322 : vector<1x1x1x8xf32> to vector<1x8xf32>
    %324 = vector.broadcast %323 : vector<1x8xf32> to vector<16x8xf32>
    %325 = arith.addf %321, %324 : vector<16x8xf32>
    %c1_268 = arith.constant 1 : index
    %c3_269 = arith.constant 3 : index
    %c0_270 = arith.constant 0 : index
    %c0_271 = arith.constant 0 : index
    %326 = vector.load %arg9[%c1_268, %c3_269, %c0_270, %c0_271] : memref<3x4x32x8xf32, #tpu.memory_space<vmem>>, vector<1x1x32x8xf32>
    %327 = vector.shape_cast %326 : vector<1x1x32x8xf32> to vector<32x8xf32>
    %cst_272 = arith.constant dense<0.000000e+00> : vector<16x8xf32>
    %328 = tpu.matmul %3, %327, %cst_272 {dimension_numbers = #tpu.dot_dimension_numbers<[1], [0], [0], [1], [0, 0, 1, 1], [], []>} : vector<16x32xf32>, vector<32x8xf32>, vector<16x8xf32> -> vector<16x8xf32>
    %c1_273 = arith.constant 1 : index
    %c3_274 = arith.constant 3 : index
    %c0_275 = arith.constant 0 : index
    %c0_276 = arith.constant 0 : index
    %329 = vector.load %arg10[%c1_273, %c3_274, %c0_275, %c0_276] : memref<3x4x1x8xf32, #tpu.memory_space<vmem>>, vector<1x1x1x8xf32>
    %330 = vector.shape_cast %329 : vector<1x1x1x8xf32> to vector<1x8xf32>
    %331 = vector.broadcast %330 : vector<1x8xf32> to vector<16x8xf32>
    %332 = arith.addf %328, %331 : vector<16x8xf32>
    %c2_277 = arith.constant 2 : index
    %c3_278 = arith.constant 3 : index
    %c0_279 = arith.constant 0 : index
    %c0_280 = arith.constant 0 : index
    %333 = vector.load %arg9[%c2_277, %c3_278, %c0_279, %c0_280] : memref<3x4x32x8xf32, #tpu.memory_space<vmem>>, vector<1x1x32x8xf32>
    %334 = vector.shape_cast %333 : vector<1x1x32x8xf32> to vector<32x8xf32>
    %cst_281 = arith.constant dense<0.000000e+00> : vector<16x8xf32>
    %335 = tpu.matmul %194, %334, %cst_281 {dimension_numbers = #tpu.dot_dimension_numbers<[1], [0], [0], [1], [0, 0, 1, 1], [], []>} : vector<16x32xf32>, vector<32x8xf32>, vector<16x8xf32> -> vector<16x8xf32>
    %c2_282 = arith.constant 2 : index
    %c3_283 = arith.constant 3 : index
    %c0_284 = arith.constant 0 : index
    %c0_285 = arith.constant 0 : index
    %336 = vector.load %arg10[%c2_282, %c3_283, %c0_284, %c0_285] : memref<3x4x1x8xf32, #tpu.memory_space<vmem>>, vector<1x1x1x8xf32>
    %337 = vector.shape_cast %336 : vector<1x1x1x8xf32> to vector<1x8xf32>
    %338 = vector.broadcast %337 : vector<1x8xf32> to vector<16x8xf32>
    %339 = arith.addf %335, %338 : vector<16x8xf32>
    %340 = vector.shape_cast %325 : vector<16x8xf32> to vector<2x8x8xf32>
    %341 = vector.shape_cast %332 : vector<16x8xf32> to vector<2x8x8xf32>
    %342 = vector.shape_cast %339 : vector<16x8xf32> to vector<2x8x8xf32>
    %cst_286 = arith.constant dense<0.000000e+00> : vector<2x8x8xf32>
    %343 = tpu.matmul %340, %341, %cst_286 {dimension_numbers = #tpu.dot_dimension_numbers<[2], [2], [1], [1], [0, 0, 0, 1, 1, 1], [0], [0]>} : vector<2x8x8xf32>, vector<2x8x8xf32>, vector<2x8x8xf32> -> vector<2x8x8xf32>
    %cst_287 = arith.constant dense<0xFF800000> : vector<2x8xf32>
    %344 = vector.multi_reduction <maximumf>, %343, %cst_287 [2] : vector<2x8x8xf32> to vector<2x8xf32>
    %345 = vector.shape_cast %344 : vector<2x8xf32> to vector<2x8x1xf32>
    %346 = vector.broadcast %345 : vector<2x8x1xf32> to vector<2x8x8xf32>
    %347 = arith.subf %343, %346 : vector<2x8x8xf32>
    %348 = math.exp %347 : vector<2x8x8xf32>
    %cst_288 = arith.constant dense<0.000000e+00> : vector<2x8xf32>
    %349 = vector.multi_reduction <add>, %348, %cst_288 [2] : vector<2x8x8xf32> to vector<2x8xf32>
    %350 = vector.shape_cast %349 : vector<2x8xf32> to vector<2x8x1xf32>
    %cst_289 = arith.constant dense<0.000000e+00> : vector<2x8x8xf32>
    %351 = tpu.matmul %348, %342, %cst_289 {dimension_numbers = #tpu.dot_dimension_numbers<[2], [1], [1], [2], [0, 0, 0, 1, 1, 2], [0], [0]>} : vector<2x8x8xf32>, vector<2x8x8xf32>, vector<2x8x8xf32> -> vector<2x8x8xf32>
    %352 = tpu.reciprocal %350 : vector<2x8x1xf32> -> vector<2x8x1xf32>
    %353 = vector.broadcast %352 : vector<2x8x1xf32> to vector<2x8x8xf32>
    %354 = arith.mulf %351, %353 : vector<2x8x8xf32>
    %355 = vector.shape_cast %354 : vector<2x8x8xf32> to vector<16x8xf32>
    %c3_290 = arith.constant 3 : index
    %c0_291 = arith.constant 0 : index
    %c0_292 = arith.constant 0 : index
    %356 = vector.load %arg11[%c3_290, %c0_291, %c0_292] : memref<4x8x32xf32, #tpu.memory_space<vmem>>, vector<1x8x32xf32>
    %357 = vector.shape_cast %356 : vector<1x8x32xf32> to vector<8x32xf32>
    %cst_293 = arith.constant dense<0.000000e+00> : vector<16x32xf32>
    %358 = tpu.matmul %355, %357, %cst_293 {dimension_numbers = #tpu.dot_dimension_numbers<[1], [0], [0], [1], [0, 0, 1, 1], [], []>} : vector<16x8xf32>, vector<8x32xf32>, vector<16x32xf32> -> vector<16x32xf32>
    %359 = arith.addf %318, %358 : vector<16x32xf32>
    %c0_294 = arith.constant 0 : index
    %c0_295 = arith.constant 0 : index
    %360 = vector.load %arg12[%c0_294, %c0_295] : memref<1x32xf32, #tpu.memory_space<vmem>>, vector<1x32xf32>
    %361 = vector.broadcast %360 : vector<1x32xf32> to vector<16x32xf32>
    %362 = arith.addf %359, %361 : vector<16x32xf32>
    %363 = arith.addf %194, %362 : vector<16x32xf32>
    %c0_296 = arith.constant 0 : index
    %c0_297 = arith.constant 0 : index
    %364 = vector.load %arg13[%c0_296, %c0_297] : memref<1x32xf32, #tpu.memory_space<vmem>>, vector<1x32xf32>
    %c0_298 = arith.constant 0 : index
    %c0_299 = arith.constant 0 : index
    %365 = vector.load %arg14[%c0_298, %c0_299] : memref<1x32xf32, #tpu.memory_space<vmem>>, vector<1x32xf32>
    %cst_300 = arith.constant dense<0.000000e+00> : vector<16xf32>
    %366 = vector.multi_reduction <add>, %363, %cst_300 [1] : vector<16x32xf32> to vector<16xf32>
    %367 = vector.shape_cast %366 : vector<16xf32> to vector<16x1xf32>
    %cst_301 = arith.constant 3.200000e+01 : f32
    %368 = vector.broadcast %cst_301 : f32 to vector<16x1xf32>
    %369 = arith.divf %367, %368 : vector<16x1xf32>
    %370 = vector.broadcast %369 : vector<16x1xf32> to vector<16x32xf32>
    %371 = arith.subf %363, %370 : vector<16x32xf32>
    %372 = arith.mulf %371, %371 : vector<16x32xf32>
    %cst_302 = arith.constant dense<0.000000e+00> : vector<16xf32>
    %373 = vector.multi_reduction <add>, %372, %cst_302 [1] : vector<16x32xf32> to vector<16xf32>
    %374 = vector.shape_cast %373 : vector<16xf32> to vector<16x1xf32>
    %cst_303 = arith.constant 3.200000e+01 : f32
    %375 = vector.broadcast %cst_303 : f32 to vector<16x1xf32>
    %376 = arith.divf %374, %375 : vector<16x1xf32>
    %cst_304 = arith.constant 9.99999974E-6 : f32
    %377 = vector.broadcast %cst_304 : f32 to vector<16x1xf32>
    %378 = arith.addf %376, %377 : vector<16x1xf32>
    %379 = math.rsqrt %378 : vector<16x1xf32>
    %380 = vector.broadcast %379 : vector<16x1xf32> to vector<16x32xf32>
    %381 = arith.mulf %371, %380 : vector<16x32xf32>
    %382 = vector.broadcast %364 : vector<1x32xf32> to vector<16x32xf32>
    %383 = arith.mulf %381, %382 : vector<16x32xf32>
    %384 = vector.broadcast %365 : vector<1x32xf32> to vector<16x32xf32>
    %385 = arith.addf %383, %384 : vector<16x32xf32>
    %c0_305 = arith.constant 0 : index
    %c0_306 = arith.constant 0 : index
    %386 = vector.load %arg15[%c0_305, %c0_306] : memref<32x64xf32, #tpu.memory_space<vmem>>, vector<32x64xf32>
    %cst_307 = arith.constant dense<0.000000e+00> : vector<16x64xf32>
    %387 = tpu.matmul %385, %386, %cst_307 {dimension_numbers = #tpu.dot_dimension_numbers<[1], [0], [0], [1], [0, 0, 1, 1], [], []>} : vector<16x32xf32>, vector<32x64xf32>, vector<16x64xf32> -> vector<16x64xf32>
    %c0_308 = arith.constant 0 : index
    %c0_309 = arith.constant 0 : index
    %388 = vector.load %arg16[%c0_308, %c0_309] : memref<1x64xf32, #tpu.memory_space<vmem>>, vector<1x64xf32>
    %389 = vector.broadcast %388 : vector<1x64xf32> to vector<16x64xf32>
    %390 = arith.addf %387, %389 : vector<16x64xf32>
    %cst_310 = arith.constant 0.000000e+00 : f32
    %391 = vector.broadcast %cst_310 : f32 to vector<16x64xf32>
    %392 = arith.maximumf %390, %391 : vector<16x64xf32>
    %c0_311 = arith.constant 0 : index
    %c0_312 = arith.constant 0 : index
    %393 = vector.load %arg17[%c0_311, %c0_312] : memref<64x32xf32, #tpu.memory_space<vmem>>, vector<64x32xf32>
    %cst_313 = arith.constant dense<0.000000e+00> : vector<16x32xf32>
    %394 = tpu.matmul %392, %393, %cst_313 {dimension_numbers = #tpu.dot_dimension_numbers<[1], [0], [0], [1], [0, 0, 1, 1], [], []>} : vector<16x64xf32>, vector<64x32xf32>, vector<16x32xf32> -> vector<16x32xf32>
    %c0_314 = arith.constant 0 : index
    %c0_315 = arith.constant 0 : index
    %395 = vector.load %arg18[%c0_314, %c0_315] : memref<1x32xf32, #tpu.memory_space<vmem>>, vector<1x32xf32>
    %396 = vector.broadcast %395 : vector<1x32xf32> to vector<16x32xf32>
    %397 = arith.addf %394, %396 : vector<16x32xf32>
    %398 = arith.addf %385, %397 : vector<16x32xf32>
    %c0_316 = arith.constant 0 : index
    %c0_317 = arith.constant 0 : index
    %399 = vector.load %arg19[%c0_316, %c0_317] : memref<1x32xf32, #tpu.memory_space<vmem>>, vector<1x32xf32>
    %c0_318 = arith.constant 0 : index
    %c0_319 = arith.constant 0 : index
    %400 = vector.load %arg20[%c0_318, %c0_319] : memref<1x32xf32, #tpu.memory_space<vmem>>, vector<1x32xf32>
    %cst_320 = arith.constant dense<0.000000e+00> : vector<16xf32>
    %401 = vector.multi_reduction <add>, %398, %cst_320 [1] : vector<16x32xf32> to vector<16xf32>
    %402 = vector.shape_cast %401 : vector<16xf32> to vector<16x1xf32>
    %cst_321 = arith.constant 3.200000e+01 : f32
    %403 = vector.broadcast %cst_321 : f32 to vector<16x1xf32>
    %404 = arith.divf %402, %403 : vector<16x1xf32>
    %405 = vector.broadcast %404 : vector<16x1xf32> to vector<16x32xf32>
    %406 = arith.subf %398, %405 : vector<16x32xf32>
    %407 = arith.mulf %406, %406 : vector<16x32xf32>
    %cst_322 = arith.constant dense<0.000000e+00> : vector<16xf32>
    %408 = vector.multi_reduction <add>, %407, %cst_322 [1] : vector<16x32xf32> to vector<16xf32>
    %409 = vector.shape_cast %408 : vector<16xf32> to vector<16x1xf32>
    %cst_323 = arith.constant 3.200000e+01 : f32
    %410 = vector.broadcast %cst_323 : f32 to vector<16x1xf32>
    %411 = arith.divf %409, %410 : vector<16x1xf32>
    %cst_324 = arith.constant 9.99999974E-6 : f32
    %412 = vector.broadcast %cst_324 : f32 to vector<16x1xf32>
    %413 = arith.addf %411, %412 : vector<16x1xf32>
    %414 = math.rsqrt %413 : vector<16x1xf32>
    %415 = vector.broadcast %414 : vector<16x1xf32> to vector<16x32xf32>
    %416 = arith.mulf %406, %415 : vector<16x32xf32>
    %417 = vector.broadcast %399 : vector<1x32xf32> to vector<16x32xf32>
    %418 = arith.mulf %416, %417 : vector<16x32xf32>
    %419 = vector.broadcast %400 : vector<1x32xf32> to vector<16x32xf32>
    %420 = arith.addf %418, %419 : vector<16x32xf32>
    %421 = vector.shape_cast %420 : vector<16x32xf32> to vector<2x8x32xf32>
    %c0_325 = arith.constant 0 : index
    %c0_326 = arith.constant 0 : index
    %c0_327 = arith.constant 0 : index
    %422 = vector.load %arg21[%c0_325, %c0_326, %c0_327] : memref<2x8x32xf32, #tpu.memory_space<vmem>>, vector<2x8x32xf32>
    tpu.vector_store %arg21[%c0_325, %c0_326, %c0_327], %421 {strides = array<i32>} : memref<2x8x32xf32, #tpu.memory_space<vmem>>, vector<2x8x32xf32>,
    return
  }
  func.func @transform_0(%arg0: i32) -> (i32, i32, i32) {
    %c0_i32 = arith.constant 0 : i32
    %c0_i32_0 = arith.constant 0 : i32
    %c0_i32_1 = arith.constant 0 : i32
    %c0_i32_2 = arith.constant 0 : i32
    return %c0_i32, %c0_i32_0, %c0_i32_1 : i32, i32, i32
  }
  func.func @transform_1(%arg0: i32) -> (i32, i32, i32) {
    %c0_i32 = arith.constant 0 : i32
    %c0_i32_0 = arith.constant 0 : i32
    %c0_i32_1 = arith.constant 0 : i32
    %c0_i32_2 = arith.constant 0 : i32
    return %c0_i32, %c0_i32_0, %c0_i32_1 : i32, i32, i32
  }
  func.func @transform_2(%arg0: i32) -> (i32, i32, i32, i32) {
    %c0_i32 = arith.constant 0 : i32
    %c0_i32_0 = arith.constant 0 : i32
    %c0_i32_1 = arith.constant 0 : i32
    %c0_i32_2 = arith.constant 0 : i32
    %c0_i32_3 = arith.constant 0 : i32
    return %c0_i32, %c0_i32_0, %c0_i32_1, %c0_i32_2 : i32, i32, i32, i32
  }
  func.func @transform_3(%arg0: i32) -> (i32, i32, i32, i32) {
    %c0_i32 = arith.constant 0 : i32
    %c0_i32_0 = arith.constant 0 : i32
    %c0_i32_1 = arith.constant 0 : i32
    %c0_i32_2 = arith.constant 0 : i32
    %c0_i32_3 = arith.constant 0 : i32
    return %c0_i32, %c0_i32_0, %c0_i32_1, %c0_i32_2 : i32, i32, i32, i32
  }
  func.func @transform_4(%arg0: i32) -> (i32, i32, i32) {
    %c0_i32 = arith.constant 0 : i32
    %c0_i32_0 = arith.constant 0 : i32
    %c0_i32_1 = arith.constant 0 : i32
    %c0_i32_2 = arith.constant 0 : i32
    return %c0_i32, %c0_i32_0, %c0_i32_1 : i32, i32, i32
  }
  func.func @transform_5(%arg0: i32) -> (i32, i32) {
    %c0_i32 = arith.constant 0 : i32
    %c0_i32_0 = arith.constant 0 : i32
    %c0_i32_1 = arith.constant 0 : i32
    return %c0_i32, %c0_i32_0 : i32, i32
  }
  func.func @transform_6(%arg0: i32) -> (i32, i32) {
    %c0_i32 = arith.constant 0 : i32
    %c0_i32_0 = arith.constant 0 : i32
    %c0_i32_1 = arith.constant 0 : i32
    return %c0_i32, %c0_i32_0 : i32, i32
  }
  func.func @transform_7(%arg0: i32) -> (i32, i32) {
    %c0_i32 = arith.constant 0 : i32
    %c0_i32_0 = arith.constant 0 : i32
    %c0_i32_1 = arith.constant 0 : i32
    return %c0_i32, %c0_i32_0 : i32, i32
  }
  func.func @transform_8(%arg0: i32) -> (i32, i32, i32, i32) {
    %c0_i32 = arith.constant 0 : i32
    %c0_i32_0 = arith.constant 0 : i32
    %c0_i32_1 = arith.constant 0 : i32
    %c0_i32_2 = arith.constant 0 : i32
    %c0_i32_3 = arith.constant 0 : i32
    return %c0_i32, %c0_i32_0, %c0_i32_1, %c0_i32_2 : i32, i32, i32, i32
  }
  func.func @transform_9(%arg0: i32) -> (i32, i32, i32, i32) {
    %c0_i32 = arith.constant 0 : i32
    %c0_i32_0 = arith.constant 0 : i32
    %c0_i32_1 = arith.constant 0 : i32
    %c0_i32_2 = arith.constant 0 : i32
    %c0_i32_3 = arith.constant 0 : i32
    return %c0_i32, %c0_i32_0, %c0_i32_1, %c0_i32_2 : i32, i32, i32, i32
  }
  func.func @transform_10(%arg0: i32) -> (i32, i32, i32) {
    %c0_i32 = arith.constant 0 : i32
    %c0_i32_0 = arith.constant 0 : i32
    %c0_i32_1 = arith.constant 0 : i32
    %c0_i32_2 = arith.constant 0 : i32
    return %c0_i32, %c0_i32_0, %c0_i32_1 : i32, i32, i32
  }
  func.func @transform_11(%arg0: i32) -> (i32, i32) {
    %c0_i32 = arith.constant 0 : i32
    %c0_i32_0 = arith.constant 0 : i32
    %c0_i32_1 = arith.constant 0 : i32
    return %c0_i32, %c0_i32_0 : i32, i32
  }
  func.func @transform_12(%arg0: i32) -> (i32, i32) {
    %c0_i32 = arith.constant 0 : i32
    %c0_i32_0 = arith.constant 0 : i32
    %c0_i32_1 = arith.constant 0 : i32
    return %c0_i32, %c0_i32_0 : i32, i32
  }
  func.func @transform_13(%arg0: i32) -> (i32, i32) {
    %c0_i32 = arith.constant 0 : i32
    %c0_i32_0 = arith.constant 0 : i32
    %c0_i32_1 = arith.constant 0 : i32
    return %c0_i32, %c0_i32_0 : i32, i32
  }
  func.func @transform_14(%arg0: i32) -> (i32, i32) {
    %c0_i32 = arith.constant 0 : i32
    %c0_i32_0 = arith.constant 0 : i32
    %c0_i32_1 = arith.constant 0 : i32
    return %c0_i32, %c0_i32_0 : i32, i32
  }
  func.func @transform_15(%arg0: i32) -> (i32, i32) {
    %c0_i32 = arith.constant 0 : i32
    %c0_i32_0 = arith.constant 0 : i32
    %c0_i32_1 = arith.constant 0 : i32
    return %c0_i32, %c0_i32_0 : i32, i32
  }
  func.func @transform_16(%arg0: i32) -> (i32, i32) {
    %c0_i32 = arith.constant 0 : i32
    %c0_i32_0 = arith.constant 0 : i32
    %c0_i32_1 = arith.constant 0 : i32
    return %c0_i32, %c0_i32_0 : i32, i32
  }
  func.func @transform_17(%arg0: i32) -> (i32, i32) {
    %c0_i32 = arith.constant 0 : i32
    %c0_i32_0 = arith.constant 0 : i32
    %c0_i32_1 = arith.constant 0 : i32
    return %c0_i32, %c0_i32_0 : i32, i32
  }
  func.func @transform_18(%arg0: i32) -> (i32, i32) {
    %c0_i32 = arith.constant 0 : i32
    %c0_i32_0 = arith.constant 0 : i32
    %c0_i32_1 = arith.constant 0 : i32
    return %c0_i32, %c0_i32_0 : i32, i32
  }
  func.func @transform_19(%arg0: i32) -> (i32, i32) {
    %c0_i32 = arith.constant 0 : i32
    %c0_i32_0 = arith.constant 0 : i32
    %c0_i32_1 = arith.constant 0 : i32
    return %c0_i32, %c0_i32_0 : i32, i32
  }
  func.func @transform_20(%arg0: i32) -> (i32, i32, i32) {
    %c0_i32 = arith.constant 0 : i32
    %c0_i32_0 = arith.constant 0 : i32
    %c0_i32_1 = arith.constant 0 : i32
    %c0_i32_2 = arith.constant 0 : i32
    return %c0_i32, %c0_i32_0, %c0_i32_1 : i32, i32, i32
  }
}

</mosaic_0001>

<bundles_post_ra>
// kernel: _lambda_.1
= control target key start
LH: loop header
LB: loop body
LE: loop exit
PB: predicated region body
PF: predicated region fallthrough
CT: control target
= control target key end

     0   :  { %vm80_vm0 = vcmask 261120   ;;  %v7095_v14 = vmov 0.0   ;;  %vm7096_vm1 = vmmov 0   ;;  %vm338_vm2 = vcmask 64512   ;;  %s8018_s2 = inlined_call_operand.vmem [shape: f32[3,4,32,8], index: 2, kind: input, shape index: {}]   ;;  %s8019_s0 = inlined_call_operand.vmem [shape: f32[2,8,32], index: 0, kind: input, shape index: {}]   ;;  %s8020_s3 = inlined_call_operand.vmem [shape: f32[3,4,1,8], index: 3, kind: input, shape index: {}]   ;;  %s8021_s4 = inlined_call_operand.vmem [shape: f32[4,8,32], index: 4, kind: input, shape index: {}]   ;;  %s8022_s8 = inlined_call_operand.vmem [shape: f32[3,4,32,8], index: 8, kind: input, shape index: {}]   ;;  %s8023_s1 = inlined_call_operand.vmem [shape: f32[2,8,32], index: 1, kind: input, shape index: {}]   ;;  %s8024_s5 = inlined_call_operand.vmem [shape: f32[1,32], index: 5, kind: input, shape index: {}]   ;;  %s8025_s9 = inlined_call_operand.vmem [shape: f32[3,4,1,8], index: 9, kind: input, shape index: {}]   ;;  %s8026_s6 = inlined_call_operand.vmem [shape: f32[1,32], index: 6, kind: input, shape index: {}]   ;;  %s8027_s7 = inlined_call_operand.vmem [shape: f32[1,32], index: 7, kind: input, shape index: {}]   ;;  %s8028_s10 = inlined_call_operand.vmem [shape: f32[4,8,32], index: 10, kind: input, shape index: {}]   ;;  %s8029_s11 = inlined_call_operand.vmem [shape: f32[1,32], index: 11, kind: input, shape index: {}]   ;;  %s8030_s14 = inlined_call_operand.vmem [shape: f32[32,64], index: 14, kind: input, shape index: {}]   ;;  %s8031_s16 = inlined_call_operand.vmem [shape: f32[64,32], index: 16, kind: input, shape index: {}]   ;;  %s8032_s12 = inlined_call_operand.vmem [shape: f32[1,32], index: 12, kind: input, shape index: {}]   ;;  %s8033_s13 = inlined_call_operand.vmem [shape: f32[1,32], index: 13, kind: input, shape index: {}]   ;;  %s8034_s15 = inlined_call_operand.vmem [shape: f32[1,64], index: 15, kind: input, shape index: {}]   ;;  %s8035_s17 = inlined_call_operand.vmem [shape: f32[1,32], index: 17, kind: input, shape index: {}]   ;;  %s8036_s18 = inlined_call_operand.vmem [shape: f32[1,32], index: 18, kind: input, shape index: {}]   ;;  %s8037_s19 = inlined_call_operand.vmem [shape: f32[1,32], index: 19, kind: input, shape index: {}]   ;;  %s8038_s20 = inlined_call_operand.vmem [shape: f32[2,8,32], index: 20, kind: output, shape index: {}]  }
   0x1   :  { %8044 = sst [smem:[#allocation2_spill]] %s8018_s2  ;;  %vm5647_vm3 = vcmask 523264  }
   0x2   :  { %8045 = sst [smem:[#allocation3_spill]] %s8019_s0  ;;  %s8049_s23 = sld [smem:[#allocation2_spill]] }
   0x3   :  { %8046 = sst [smem:[#allocation4_spill]] %s8020_s3  ;;  %s8050_s29 = sld [smem:[#allocation3_spill]] }
   0x4   :  { %8047 = sst [smem:[#allocation5_spill]] %s8021_s4  ;;  %s8051_s3 = sld [smem:[#allocation4_spill]] }
   0x5   :  { %8048 = sst [smem:[#allocation6_spill]] %s8022_s8  ;;  %s8052_s0 = sld [smem:[#allocation5_spill]] }
   0x6   :  { %s8053_s28 = sld [smem:[#allocation6_spill]] }
   0x8   :  { %v69_v0 = vld [vmem:[%s8049_s23] sm:$0xff]  ;;  %v70_v1 = vld [vmem:[%s8049_s23 + $0x8] sm:$0xff]  ;;  %v71_v2 = vld [vmem:[%s8049_s23 + $0x10] sm:$0xff] }
   0x9   :  { %v6789_v3 = vpack.c.bf16 %v70_v1, %v69_v0  ;;  %v72_v4 = vld [vmem:[%s8049_s23 + $0x18] sm:$0xff]  ;;  %v7217_v5 = vld [vmem:[%s8050_s29] sm:$0xff]  ;;  %v5785_v8 = vld [vmem:[%s8049_s23 + $0x88] sm:$0xff] }
   0xa   :  { %v6793_v6 = vpack.c.bf16 %v72_v4, %v71_v2  ;;  %6303 = vmatprep.mubr.msk.f32.mxu1 %vm80_vm0, %v7217_v5  ;;  %v5784_v7 = vld [vmem:[%s8049_s23 + $0x80] sm:$0xff]  ;;  %6325 = vmatprep.mubr.msk.f32.mxu0 %vm80_vm0, %v7217_v5  ;;  %v5786_v10 = vld [vmem:[%s8049_s23 + $0x90] sm:$0xff]  ;;  %v5787_v11 = vld [vmem:[%s8049_s23 + $0x98] sm:$0xff] }
   0xb   :  { %6790 = vmatprep.subr.bf16.mxu1 %v6789_v3  ;;  %v6797_v9 = vpack.c.bf16 %v5785_v8, %v5784_v7  ;;  %v7238_v12 = vld [vmem:[%s8050_s29 + $0x8] sm:$0xff]  ;;  %v6801_v13 = vpack.c.bf16 %v5787_v11, %v5786_v10  ;;  %v5792_v15 = vld [vmem:[%s8049_s23 + $0x100] sm:$0xff]  ;;  %v5794_v17 = vld [vmem:[%s8049_s23 + $0x110] sm:$0xff] }
   0xc   :  { %6792 = vmatpush3.bf16.msra.mxu1 %v6789_v3  ;;  %v5793_v16 = vld [vmem:[%s8049_s23 + $0x108] sm:$0xff]  ;;  %v5795_v19 = vld [vmem:[%s8049_s23 + $0x118] sm:$0xff]  ;;  %v5789_v23 = vld [vmem:[%s8051_s3 + $0x4] ss:$0 sm:$0xff] }
   0xd   :  { %6794 = vmatprep.subr.bf16.mxu1 %v6793_v6  ;;  %v6805_v18 = vpack.c.bf16 %v5793_v16, %v5792_v15  ;;  %v6809_v20 = vpack.c.bf16 %v5795_v19, %v5794_v17  ;;  %v5781_v26 = vld [vmem:[%s8051_s3] ss:$0 sm:$0xff]  ;;  %v5797_v38 = vld [vmem:[%s8051_s3 + $0x8] ss:$0 sm:$0xff]  ;;  %v5816_v54 = vld [vmem:[%s8049_s23 + $0xb0] sm:$0xff] }
   0xe   :  { %v5814_v39 = vld [vmem:[%s8049_s23 + $0xa0] sm:$0xff]  ;;  %v5815_v40 = vld [vmem:[%s8049_s23 + $0xa8] sm:$0xff]  ;;  %v5817_v55 = vld [vmem:[%s8049_s23 + $0xb8] sm:$0xff] }
   0xf   :  { %6806 = vmatprep.subr.bf16.mxu0 %v6805_v18  ;;  %v6821_v43 = vpack.c.bf16 %v5815_v40, %v5814_v39  ;;  %v5806_v45 = vld [vmem:[%s8049_s23 + $0x20] sm:$0xff]  ;;  %v5807_v46 = vld [vmem:[%s8049_s23 + $0x28] sm:$0xff]  ;;  %v6825_v56 = vpack.c.bf16 %v5817_v55, %v5816_v54  ;;  %v5808_v58 = vld [vmem:[%s8049_s23 + $0x30] sm:$0xff] }
  0x10   :  { %6796 = vmatpush3.bf16.msra.mxu1 %v6793_v6  ;;  %6808 = vmatpush3.bf16.msra.mxu0 %v6805_v18  ;;  %v6813_v47 = vpack.c.bf16 %v5807_v46, %v5806_v45  ;;  %v5809_v59 = vld [vmem:[%s8049_s23 + $0x38] sm:$0xff]  ;;  %v5822_v62 = vld [vmem:[%s8049_s23 + $0x120] sm:$0xff]  ;;  %v5823_v63 = vld [vmem:[%s8049_s23 + $0x128] sm:$0xff] }
  0x11   :  { %6798 = vmatprep.subr.bf16.mxu1 %v6797_v9  ;;  %6810 = vmatprep.subr.bf16.mxu0 %v6809_v20  ;;  %v6817_v60 = vpack.c.bf16 %v5809_v59, %v5808_v58  ;;  %v5824_v0 = vld [vmem:[%s8049_s23 + $0x130] sm:$0xff]  ;;  %v6829_v1 = vpack.c.bf16 %v5823_v63, %v5822_v62  ;;  %v5825_v2 = vld [vmem:[%s8049_s23 + $0x138] sm:$0xff]  ;;  %v5811_v15 = vld [vmem:[%s8051_s3 + $0x1] ss:$0 sm:$0xff] }
  0x12   :  { %v6833_v3 = vpack.c.bf16 %v5825_v2, %v5824_v0  ;;  %v659_v45 = vld [vmem:[%s8052_s0] sm:$0xff]  ;;  %v5859_v54 = vld [vmem:[%s8049_s23 + $0x150] sm:$0xff] }
  0x13   :  { %6304 = vmatmul.mubr.msk.f32.vlgmr.msra.gmra.mrb[0].mxu1 %vm80_vm0, %v7238_v12  ;;  %v5841_v46 = vld [vmem:[%s8049_s23 + $0x40] sm:$0xff] }
  0x14   :  { %6800 = vmatpush3.bf16.msra.mxu1 %v6797_v9  ;;  %6314 = vmatprep.mubr.msk.f32.mxu1 %vm80_vm0, %v7217_v5  ;;  %v5819_v9 = vld [vmem:[%s8051_s3 + $0x5] ss:$0 sm:$0xff] }
  0x15   :  { %6802 = vmatprep.subr.bf16.mxu1 %v6801_v13  ;;  %6812 = vmatpush3.bf16.msra.mxu0 %v6809_v20  ;;  %v5849_v2 = vld [vmem:[%s8049_s23 + $0xc0] sm:$0xff] }
  0x16   :  { %6338 = vmatprep.subr.mxu0 %v7095_v14 }
  0x18   :  { %6804 = vmatpush3.bf16.msra.mxu1 %v6801_v13  ;;  %6326 = vmatmul.mubr.msk.f32.vlgmr.msra.gmra.mrb[0].mxu0 %vm80_vm0, %v7238_v12 }
  0x19   :  { %6328 = vmatprep.subr.mxu1 %v7095_v14  ;;  %6340 = vmatprep.mubr.msk.f32.mxu0 %vm7096_vm1, %v7095_v14 }
  0x1b   :  { %6315 = vmatmul.mubr.msk.f32.vlgmr.msra.gmra.mrb[2].mxu1 %vm80_vm0, %v7238_v12 }
  0x1c   :  { %6330 = vmatprep.mubr.msk.f32.mxu1 %vm7096_vm1, %v7095_v14 }
  0xe6   :  { %v6305_v21 = vpop.f32.mrb[0].mxu1 }
  0xe7   :  { %v153_v22 = vpop.f32.mrb[1].mxu1  ;;  %v159_v30 = vadd.f32 %v6305_v21, %v5781_v26 }
  0xe8   :  { %v154_v28 = vadd.f32 %v5781_v26, %v153_v22 }
  0xeb   :  { %v6327_v37 = vpop.f32.mrb[0].mxu0 }
  0xec   :  { %v335_v41 = vadd.f32 %v6327_v37, %v5797_v38  ;;  %v329_v42 = vpop.f32.mrb[1].mxu0 }
  0xed   :  { %v330_v44 = vadd.f32 %v5797_v38, %v329_v42 }
  0xee   :  { %v6316_v24 = vpop.f32.mrb[2].mxu1 }
  0xef   :  { %v241_v25 = vpop.f32.mrb[3].mxu1  ;;  %v247_v29 = vadd.f32 %v6316_v24, %v5789_v23  ;;  %6339 = vmatpush3.msra.mxu0 %v330_v44  ;;  %v5836_v44 = vld [vmem:[%s8052_s0 + $0x8] sm:$0xff] }
  0xf0   :  { %v242_v27 = vadd.f32 %v5789_v23, %v241_v25  ;;  %6814 = vmatprep.subr.bf16.mxu0 %v6813_v47 }
  0xf2   :  { %6329 = vmatpush3.xpose.msk.msra.mxu1 %vm338_vm2, %v242_v27 }
  0xf3   :  { %6333 = vmatprep.subr.mxu1 %v7095_v14 }
  0xf5   :  { %6331 = vmatmul.mubr.msk.f32.vlgmr.msra.gmra.mrb[4].mxu1 %vm338_vm2, %v154_v28  ;;  %v5827_v28 = vld [vmem:[%s8051_s3 + $0x9] ss:$0 sm:$0xff] }
  0xf6   :  { %6334 = vmatpush3.xpose.msk.msra.mxu1 %vm338_vm2, %v247_v29  ;;  %6335 = vmatprep.mubr.msk.f32.mxu1 %vm7096_vm1, %v7095_v14 }
  0xf7   :  { %6343 = vmatprep.subr.mxu1 %v7095_v14 }
  0xf9   :  { %6336 = vmatmul.mubr.msk.f32.vlgmr.msra.gmra.mrb[6].mxu1 %vm338_vm2, %v159_v30 }
  0xfa   :  { %6345 = vmatprep.mubr.msk.f32.mxu1 %vm7096_vm1, %v7095_v14  ;;  %6344 = vmatpush3.msra.mxu1 %v335_v41 }
  0xfb   :  { %6822 = vmatprep.subr.bf16.mxu1 %v6821_v43 }
 0x1c8   :  { %v411_v31 = vpop.f32.mrb[4].mxu1 }
 0x1c9   :  { %v6332_v32 = vpop.f32.mrb[5].mxu1  ;;  %v491_v36 = vsel %vm338_vm2, %v411_v31, -inf }
 0x1cc   :  { %v487_v33 = vpop.f32.mrb[6].mxu1 }
 0x1cd   :  { %v6337_v34 = vpop.f32.mrb[7].mxu1  ;;  %v494_v35 = vsel %vm338_vm2, %v487_v33, -inf }
 0x1ce   :  { %495 = vmax.xlane.f32.xlu0 %v494_v35 }
 0x1d2   :  { %492 = vmax.xlane.f32.xlu0 %v491_v36 }
 0x25b   :  { %v496_v48 = vpop.xlane.xlu0 %495 }
 0x25c   :  { %v498_v49 = vsub.f32 %v487_v33, %v496_v48 }
 0x25e   :  { %v501_v50 = vmul.f32 1.442695, %v498_v49  ;;  %v5843_v49 = vld [vmem:[%s8049_s23 + $0x50] sm:$0xff] }
 0x25f   :  { %v493_v51 = vpop.xlane.xlu0 %492 }
 0x260   :  { %7019 = vpow2.f32 %v501_v50  ;;  %v497_v52 = vsub.f32 %v411_v31, %v493_v51  ;;  %v5844_v50 = vld [vmem:[%s8049_s23 + $0x58] sm:$0xff] }
 0x261   :  { %v6841_v51 = vpack.c.bf16 %v5844_v50, %v5843_v49  ;;  %v5871_v50 = vld [vmem:[%s8052_s0 + $0x10] sm:$0xff] }
 0x262   :  { %v499_v53 = vmul.f32 1.442695, %v497_v52  ;;  %v5857_v52 = vld [vmem:[%s8049_s23 + $0x140] sm:$0xff] }
 0x264   :  { %7021 = vpow2.f32 %v499_v53  ;;  %v5858_v53 = vld [vmem:[%s8049_s23 + $0x148] sm:$0xff] }
 0x265   :  { %v6853_v55 = vpack.c.bf16 %v5858_v53, %v5857_v52  ;;  %v5883_v52 = vld [vmem:[%s8049_s23 + $0xe8] sm:$0xff] }
 0x26a   :  { %v7305_v57 = vpop.eup %7019 }
 0x26b   :  { %6346 = vmatmul.mubr.msk.f32.vlgmr.msra.gmra.mrb[8].mxu1 %vm338_vm2, %v7305_v57 }
 0x26c   :  { %6824 = vmatpush3.bf16.msra.mxu1 %v6821_v43  ;;  %6367 = vmatprep.mubr.msk.f32.mxu1 %vm80_vm0, %v7217_v5  ;;  %v506_v43 = vsel %vm338_vm2, %v7305_v57, 0.0 }
 0x26d   :  { %6826 = vmatprep.subr.bf16.mxu1 %v6825_v56 }
 0x26e   :  { %v7317_v61 = vpop.eup %7021 }
 0x26f   :  { %6341 = vmatmul.mubr.msk.f32.vlgmr.msra.gmra.mrb[2].mxu0 %vm338_vm2, %v7317_v61  ;;  %v503_v41 = vsel %vm338_vm2, %v7317_v61, 0.0 }
 0x270   :  { %6816 = vmatpush3.bf16.msra.mxu0 %v6813_v47  ;;  %6828 = vmatpush3.bf16.msra.mxu1 %v6825_v56  ;;  %v5842_v47 = vld [vmem:[%s8049_s23 + $0x48] sm:$0xff]  ;;  %v5860_v56 = vld [vmem:[%s8049_s23 + $0x158] sm:$0xff] }
 0x271   :  { %6818 = vmatprep.subr.bf16.mxu0 %v6817_v60  ;;  %6356 = vmatprep.mubr.msk.f32.mxu0 %vm80_vm0, %v7217_v5  ;;  %v6837_v48 = vpack.c.bf16 %v5842_v47, %v5841_v46  ;;  %v6857_v57 = vpack.c.bf16 %v5860_v56, %v5859_v54  ;;  %v5874_v54 = vld [vmem:[%s8049_s23 + $0x60] sm:$0xff] }
 0x272   :  { %6381 = vmatprep.subr.mxu1 %v7095_v14 }
 0x273   :  { %6368 = vmatmul.mubr.msk.f32.vlgmr.msra.gmra.mrb[10].mxu1 %vm80_vm0, %v7238_v12 }
 0x274   :  { %6820 = vmatpush3.bf16.msra.mxu0 %v6817_v60  ;;  %6383 = vmatprep.mubr.msk.f32.mxu1 %vm7096_vm1, %v7095_v14 }
 0x275   :  { %6830 = vmatprep.subr.bf16.mxu0 %v6829_v1 }
 0x277   :  { %6357 = vmatmul.mubr.msk.f32.vlgmr.msra.gmra.mrb[4].mxu0 %vm80_vm0, %v7238_v12 }
 0x278   :  { %6378 = vmatprep.mubr.msk.f32.mxu0 %vm80_vm0, %v7217_v5  ;;  %6832 = vmatpush3.bf16.msra.mxu0 %v6829_v1 }
 0x279   :  { %6834 = vmatprep.subr.bf16.mxu0 %v6833_v3 }
 0x27c   :  { %6836 = vmatpush3.bf16.msra.mxu0 %v6833_v3  ;;  %v5850_v3 = vld [vmem:[%s8049_s23 + $0xc8] sm:$0xff] }
 0x27d   :  { %6391 = vmatprep.subr.mxu0 %v7095_v14 }
 0x27f   :  { %6379 = vmatmul.mubr.msk.f32.vlgmr.msra.gmra.mrb[6].mxu0 %vm80_vm0, %v7238_v12 }
 0x280   :  { %6393 = vmatprep.mubr.msk.f32.mxu0 %vm7096_vm1, %v7095_v14 }
 0x33e   :  { %v7349_v4 = vpop.f32.mrb[8].mxu1 }
 0x33f   :  { %v6347_v6 = vpop.f32.mrb[9].mxu1 }
 0x342   :  { %v7351_v7 = vpop.f32.mrb[2].mxu0 }
 0x343   :  { %v6342_v8 = vpop.f32.mrb[3].mxu0 }
 0x346   :  { %v6369_v10 = vpop.f32.mrb[10].mxu1 }
 0x347   :  { %v827_v11 = vpop.f32.mrb[11].mxu1  ;;  %v833_v19 = vadd.f32 %v6369_v10, %v5819_v9 }
 0x348   :  { %v828_v13 = vadd.f32 %v5819_v9, %v827_v11 }
 0x34a   :  { %v6358_v16 = vpop.f32.mrb[4].mxu0  ;;  %6382 = vmatpush3.xpose.msk.msra.mxu1 %vm338_vm2, %v828_v13  ;;  %v6845_v13 = vpack.c.bf16 %v5850_v3, %v5849_v2 }
 0x34b   :  { %v739_v17 = vpop.f32.mrb[5].mxu0  ;;  %6386 = vmatprep.subr.mxu1 %v7095_v14  ;;  %v745_v20 = vadd.f32 %v6358_v16, %v5811_v15 }
 0x34c   :  { %v740_v18 = vadd.f32 %v5811_v15, %v739_v17  ;;  %v5851_v17 = vld [vmem:[%s8049_s23 + $0xd0] sm:$0xff] }
 0x34e   :  { %6384 = vmatmul.mubr.msk.f32.vlgmr.msra.gmra.mrb[12].mxu1 %vm338_vm2, %v740_v18  ;;  %v5852_v18 = vld [vmem:[%s8049_s23 + $0xd8] sm:$0xff] }
 0x34f   :  { %6387 = vmatpush3.xpose.msk.msra.mxu1 %vm338_vm2, %v833_v19  ;;  %6388 = vmatprep.mubr.msk.f32.mxu1 %vm7096_vm1, %v7095_v14 }
 0x350   :  { %6396 = vmatprep.subr.mxu1 %v7095_v14 }
 0x352   :  { %6389 = vmatmul.mubr.msk.f32.vlgmr.msra.gmra.mrb[14].mxu1 %vm338_vm2, %v745_v20  ;;  %v6380_v27 = vpop.f32.mrb[6].mxu0  ;;  %v6849_v20 = vpack.c.bf16 %v5852_v18, %v5851_v17  ;;  %v5891_v17 = vld [vmem:[%s8049_s23 + $0x168] sm:$0xff]  ;;  %v5892_v18 = vld [vmem:[%s8049_s23 + $0x170] sm:$0xff] }
 0x353   :  { %6398 = vmatprep.mubr.msk.f32.mxu1 %vm7096_vm1, %v7095_v14  ;;  %v921_v29 = vadd.f32 %v6380_v27, %v5827_v28  ;;  %v915_v30 = vpop.f32.mrb[7].mxu0 }
 0x354   :  { %v916_v31 = vadd.f32 %v5827_v28, %v915_v30 }
 0x355   :  { %6397 = vmatpush3.msra.mxu1 %v921_v29 }
 0x356   :  { %6392 = vmatpush3.msra.mxu0 %v916_v31  ;;  %6838 = vmatprep.subr.bf16.mxu1 %v6837_v48 }
 0x357   :  { %6401 = vmatprep.subr.mxu0 %v5836_v44 }
 0x421   :  { %v996_v21 = vpop.f32.mrb[12].mxu1 }
 0x422   :  { %v6385_v22 = vpop.f32.mrb[13].mxu1  ;;  %v1076_v23 = vsel %vm338_vm2, %v996_v21, -inf }
 0x423   :  { %1077 = vmax.xlane.f32.xlu1 %v1076_v23  ;;  %v5854_v23 = vld [vmem:[%s8051_s3 + $0x6] ss:$0 sm:$0xff] }
 0x425   :  { %v1072_v24 = vpop.f32.mrb[14].mxu1 }
 0x426   :  { %v6390_v25 = vpop.f32.mrb[15].mxu1  ;;  %v1079_v26 = vsel %vm338_vm2, %v1072_v24, -inf }
 0x427   :  { %1080 = vmax.xlane.f32.xlu1 %v1079_v26  ;;  %v5862_v26 = vld [vmem:[%s8051_s3 + $0xa] ss:$0 sm:$0xff] }
 0x4b0   :  { %v1078_v32 = vpop.xlane.xlu1 %1077 }
 0x4b1   :  { %v1082_v33 = vsub.f32 %v996_v21, %v1078_v32 }
 0x4b3   :  { %v1084_v34 = vmul.f32 1.442695, %v1082_v33 }
 0x4b4   :  { %v1081_v35 = vpop.xlane.xlu1 %1080 }
 0x4b5   :  { %7023 = vpow2.f32 %v1084_v34  ;;  %v1083_v36 = vsub.f32 %v1072_v24, %v1081_v35  ;;  %v5846_v24 = vld [vmem:[%s8051_s3 + $0x2] ss:$0 sm:$0xff] }
 0x4b7   :  { %v1086_v37 = vmul.f32 1.442695, %v1083_v36 }
 0x4b9   :  { %7025 = vpow2.f32 %v1086_v37 }
 0x4bf   :  { %v7024_v38 = vpop.eup %7023 }
 0x4c0   :  { %6394 = vmatmul.mubr.msk.f32.vlgmr.msra.gmra.mrb[8].mxu0 %vm338_vm2, %v7024_v38  ;;  %v1088_v39 = vsel %vm338_vm2, %v7024_v38, 0.0 }
 0x4c1   :  { %1089 = vadd.xlane.f32.xlu0 %v1088_v39  ;;  %6402 = vmatpush3.msra.mxu0 %v5836_v44 }
 0x4c2   :  { %6406 = vmatprep.subr.mxu0 %v659_v45 }
 0x4c3   :  { %v7026_v40 = vpop.eup %7025 }
 0x4c4   :  { %6399 = vmatmul.mubr.msk.f32.vlgmr.msra.gmra.mrb[16].mxu1 %vm338_vm2, %v7026_v40  ;;  %v1091_v42 = vsel %vm338_vm2, %v7026_v40, 0.0 }
 0x4c5   :  { %504 = vadd.xlane.f32.xlu0 %v503_v41  ;;  %1092 = vadd.xlane.f32.xlu1 %v1091_v42 }
 0x4c6   :  { %6419 = vmatprep.mubr.msk.f32.mxu1 %vm80_vm0, %v7217_v5  ;;  %6840 = vmatpush3.bf16.msra.mxu1 %v6837_v48 }
 0x4c7   :  { %6842 = vmatprep.subr.bf16.mxu1 %v6841_v51 }
 0x4c9   :  { %507 = vadd.xlane.f32.xlu1 %v506_v43 }
 0x4ca   :  { %6844 = vmatpush3.bf16.msra.mxu1 %v6841_v51  ;;  %v5882_v51 = vld [vmem:[%s8049_s23 + $0xe0] sm:$0xff] }
 0x4cb   :  { %6854 = vmatprep.subr.bf16.mxu1 %v6853_v55  ;;  %v6869_v53 = vpack.c.bf16 %v5883_v52, %v5882_v51  ;;  %v5914_v51 = vld [vmem:[%s8053_s28 + $0x88] sm:$0xff]  ;;  %v2802_v52 = vld [vmem:[%s8053_s28] sm:$0xff] }
 0x4cd   :  { %6420 = vmatmul.mubr.msk.f32.vlgmr.msra.gmra.mrb[18].mxu1 %vm80_vm0, %v7238_v12 }
 0x4ce   :  { %6441 = vmatprep.mubr.msk.f32.mxu1 %vm80_vm0, %v7217_v5  ;;  %6856 = vmatpush3.bf16.msra.mxu1 %v6853_v55  ;;  %v5875_v55 = vld [vmem:[%s8049_s23 + $0x68] sm:$0xff] }
 0x4cf   :  { %6858 = vmatprep.subr.bf16.mxu1 %v6857_v57  ;;  %v6861_v56 = vpack.c.bf16 %v5875_v55, %v5874_v54  ;;  %v2803_v54 = vld [vmem:[%s8053_s28 + $0x8] sm:$0xff] }
 0x4d0   :  { %v6885_v55 = vpack.c.bf16 %v2803_v54, %v2802_v52 }
 0x4d2   :  { %6860 = vmatpush3.bf16.msra.mxu1 %v6857_v57  ;;  %v5876_v57 = vld [vmem:[%s8049_s23 + $0x70] sm:$0xff] }
 0x4d3   :  { %6449 = vmatprep.subr.mxu1 %v7095_v14 }
 0x4d5   :  { %6442 = vmatmul.mubr.msk.f32.vlgmr.msra.gmra.mrb[20].mxu1 %vm80_vm0, %v7238_v12 }
 0x4d6   :  { %6451 = vmatprep.mubr.msk.f32.mxu1 %vm7096_vm1, %v7095_v14 }
 0x54e   :  { %v1090_v58 = vpop.xlane.xlu0 %1089 }
 0x54f   :  { %7027 = vrcp.f32 %v1090_v58  ;;  %v5877_v58 = vld [vmem:[%s8049_s23 + $0x78] sm:$0xff] }
 0x552   :  { %v505_v59 = vpop.xlane.xlu0 %504  ;;  %v1093_v60 = vpop.xlane.xlu1 %1092 }
 0x553   :  { %7029 = vrcp.f32 %v505_v59  ;;  %v6865_v59 = vpack.c.bf16 %v5877_v58, %v5876_v57  ;;  %v2805_v57 = vld [vmem:[%s8053_s28 + $0x18] sm:$0xff] }
 0x554   :  { %7031 = vrcp.f32 %v1093_v60 }
 0x556   :  { %v508_v61 = vpop.xlane.xlu1 %507 }
 0x557   :  { %7033 = vrcp.f32 %v508_v61 }
 0x559   :  { %v7028_v62 = vpop.eup %7027 }
 0x55d   :  { %v7030_v6 = vpop.eup %7029 }
 0x55e   :  { %v7032_v8 = vpop.eup %7031  ;;  %v657_v15 = vmul.f32 %v7030_v6, %v7351_v7 }
 0x561   :  { %v7034_v16 = vpop.eup %7033 }
 0x562   :  { %v658_v19 = vmul.f32 %v7034_v16, %v7349_v4  ;;  %v5890_v16 = vld [vmem:[%s8049_s23 + $0x160] sm:$0xff] }
 0x593   :  { %v1163_v63 = vpop.f32.mrb[8].mxu0 }
 0x594   :  { %v1242_v0 = vmul.f32 %v7028_v62, %v1163_v63  ;;  %v6395_v1 = vpop.f32.mrb[9].mxu0  ;;  %v5884_v63 = vld [vmem:[%s8049_s23 + $0xf0] sm:$0xff] }
 0x596   :  { %6403 = vmatprep.mubr.msk.f32.mxu0 %vm338_vm2, %v1242_v0  ;;  %v5885_v0 = vld [vmem:[%s8049_s23 + $0xf8] sm:$0xff] }
 0x597   :  { %v1236_v9 = vpop.f32.mrb[16].mxu1 }
 0x598   :  { %v1243_v10 = vmul.f32 %v7032_v8, %v1236_v9  ;;  %v6400_v11 = vpop.f32.mrb[17].mxu1 }
 0x599   :  { %v6873_v11 = vpack.c.bf16 %v5885_v0, %v5884_v63 }
 0x59a   :  { %6404 = vmatmul.mubr.msk.f32.vlgmr.msra.gmra.mrb[10].mxu0 %vm338_vm2, %v1243_v10 }
 0x59b   :  { %6407 = vmatpush3.msra.mxu0 %v659_v45  ;;  %6408 = vmatprep.mubr.msk.f32.mxu0 %vm338_vm2, %v657_v15 }
 0x59c   :  { %6846 = vmatprep.subr.bf16.mxu0 %v6845_v13 }
 0x5a0   :  { %v6421_v7 = vpop.f32.mrb[18].mxu1 }
 0x5a1   :  { %v1487_v21 = vpop.f32.mrb[19].mxu1  ;;  %v1493_v30 = vadd.f32 %v6421_v7, %v5846_v24 }
 0x5a2   :  { %6409 = vmatmul.mubr.msk.f32.vlgmr.msra.gmra.mrb[10].mxu0 %vm338_vm2, %v658_v19  ;;  %v1488_v31 = vadd.f32 %v5846_v24, %v1487_v21  ;;  %v6877_v19 = vpack.c.bf16 %v5891_v17, %v5890_v16  ;;  %v5887_v21 = vld [vmem:[%s8051_s3 + $0x7] ss:$0 sm:$0xff] }
 0x5a3   :  { %6848 = vmatpush3.bf16.msra.mxu0 %v6845_v13  ;;  %6430 = vmatprep.mubr.msk.f32.mxu0 %vm80_vm0, %v7217_v5 }
 0x5a4   :  { %6850 = vmatprep.subr.bf16.mxu0 %v6849_v20 }
 0x5a7   :  { %6852 = vmatpush3.bf16.msra.mxu0 %v6849_v20  ;;  %v5893_v20 = vld [vmem:[%s8049_s23 + $0x178] sm:$0xff] }
 0x5a8   :  { %6444 = vmatprep.subr.mxu0 %v7095_v14  ;;  %v6443_v4 = vpop.f32.mrb[20].mxu1  ;;  %v6881_v7 = vpack.c.bf16 %v5893_v20, %v5892_v18 }
 0x5a9   :  { %v1663_v22 = vpop.f32.mrb[21].mxu1  ;;  %v1669_v32 = vadd.f32 %v6443_v4, %v5862_v26 }
 0x5aa   :  { %6431 = vmatmul.mubr.msk.f32.vlgmr.msra.gmra.mrb[12].mxu0 %vm80_vm0, %v7238_v12  ;;  %v1664_v33 = vadd.f32 %v5862_v26, %v1663_v22  ;;  %v5879_v22 = vld [vmem:[%s8051_s3 + $0x3] ss:$0 sm:$0xff] }
 0x5ab   :  { %6446 = vmatprep.mubr.msk.f32.mxu0 %vm7096_vm1, %v7095_v14 }
 0x67d   :  { %v6432_v25 = vpop.f32.mrb[12].mxu0 }
 0x67e   :  { %v1581_v27 = vadd.f32 %v6432_v25, %v5854_v23  ;;  %v1575_v28 = vpop.f32.mrb[13].mxu0 }
 0x67f   :  { %v1576_v29 = vadd.f32 %v5854_v23, %v1575_v28 }
 0x680   :  { %6450 = vmatpush3.xpose.msk.msra.mxu1 %vm338_vm2, %v1581_v27 }
 0x681   :  { %6445 = vmatpush3.xpose.msk.msra.mxu0 %vm338_vm2, %v1576_v29  ;;  %6459 = vmatprep.subr.mxu1 %v7095_v14 }
 0x682   :  { %6454 = vmatprep.subr.mxu0 %v7095_v14 }
 0x683   :  { %6452 = vmatmul.mubr.msk.f32.vlgmr.msra.gmra.mrb[22].mxu1 %vm338_vm2, %v1493_v30 }
 0x684   :  { %6447 = vmatmul.mubr.msk.f32.vlgmr.msra.gmra.mrb[14].mxu0 %vm338_vm2, %v1488_v31  ;;  %6460 = vmatpush3.msra.mxu1 %v1669_v32 }
 0x685   :  { %6455 = vmatpush3.msra.mxu0 %v1664_v33  ;;  %6461 = vmatprep.mubr.msk.f32.mxu1 %vm7096_vm1, %v7095_v14 }
 0x686   :  { %6456 = vmatprep.mubr.msk.f32.mxu0 %vm7096_vm1, %v7095_v14  ;;  %6464 = vmatprep.subr.mxu0 %v5871_v50 }
 0x687   :  { %6862 = vmatprep.subr.bf16.mxu1 %v6861_v56 }
 0x756   :  { %v1820_v34 = vpop.f32.mrb[22].mxu1 }
 0x757   :  { %v1744_v35 = vpop.f32.mrb[14].mxu0  ;;  %v6453_v36 = vpop.f32.mrb[23].mxu1  ;;  %v1827_v37 = vsel %vm338_vm2, %v1820_v34, -inf }
 0x758   :  { %1828 = vmax.xlane.f32.xlu1 %v1827_v37  ;;  %v6448_v38 = vpop.f32.mrb[15].mxu0  ;;  %v1824_v39 = vsel %vm338_vm2, %v1744_v35, -inf }
 0x759   :  { %1825 = vmax.xlane.f32.xlu0 %v1824_v39 }
 0x7e5   :  { %v1829_v40 = vpop.xlane.xlu1 %1828 }
 0x7e6   :  { %v1831_v41 = vsub.f32 %v1820_v34, %v1829_v40  ;;  %v1826_v42 = vpop.xlane.xlu0 %1825 }
 0x7e7   :  { %v1830_v43 = vsub.f32 %v1744_v35, %v1826_v42  ;;  %v5895_v35 = vld [vmem:[%s8051_s3 + $0xb] ss:$0 sm:$0xff] }
 0x7e8   :  { %v1834_v44 = vmul.f32 1.442695, %v1831_v41 }
 0x7e9   :  { %v1832_v45 = vmul.f32 1.442695, %v1830_v43 }
 0x7ea   :  { %7035 = vpow2.f32 %v1834_v44 }
 0x7eb   :  { %7037 = vpow2.f32 %v1832_v45 }
 0x7f4   :  { %v7036_v46 = vpop.eup %7035 }
 0x7f5   :  { %v7038_v47 = vpop.eup %7037  ;;  %6462 = vmatmul.mubr.msk.f32.vlgmr.msra.gmra.mrb[24].mxu1 %vm338_vm2, %v7036_v46  ;;  %v1839_v48 = vsel %vm338_vm2, %v7036_v46, 0.0 }
 0x7f6   :  { %1840 = vadd.xlane.f32.xlu1 %v1839_v48  ;;  %6457 = vmatmul.mubr.msk.f32.vlgmr.msra.gmra.mrb[16].mxu0 %vm338_vm2, %v7038_v47  ;;  %v1836_v49 = vsel %vm338_vm2, %v7038_v47, 0.0 }
 0x7f7   :  { %1837 = vadd.xlane.f32.xlu0 %v1836_v49  ;;  %6477 = vmatprep.mubr.msk.f32.mxu1 %vm80_vm0, %v7217_v5  ;;  %v5904_v49 = vld [vmem:[%s8052_s0 + $0x18] sm:$0xff] }
 0x7f8   :  { %6465 = vmatpush3.msra.mxu0 %v5871_v50  ;;  %6864 = vmatpush3.bf16.msra.mxu1 %v6861_v56  ;;  %v5913_v50 = vld [vmem:[%s8053_s28 + $0x80] sm:$0xff]  ;;  %v2804_v56 = vld [vmem:[%s8053_s28 + $0x10] sm:$0xff] }
 0x7f9   :  { %6870 = vmatprep.subr.bf16.mxu0 %v6869_v53  ;;  %6866 = vmatprep.subr.bf16.mxu1 %v6865_v59  ;;  %v6889_v58 = vpack.c.bf16 %v2805_v57, %v2804_v56  ;;  %v5908_v56 = vld [vmem:[%s8026_s6] ss:$0 sm:$0xff] }
 0x7fc   :  { %6868 = vmatpush3.bf16.msra.mxu1 %v6865_v59  ;;  %v7581_v59 = vld [vmem:[%s8023_s1] sm:$0xff] }
 0x7fd   :  { %6878 = vmatprep.subr.bf16.mxu1 %v6877_v19 }
 0x7ff   :  { %6478 = vmatmul.mubr.msk.f32.vlgmr.msra.gmra.mrb[26].mxu1 %vm80_vm0, %v7238_v12 }
 0x800   :  { %6499 = vmatprep.mubr.msk.f32.mxu1 %vm80_vm0, %v7217_v5  ;;  %6880 = vmatpush3.bf16.msra.mxu1 %v6877_v19 }
 0x801   :  { %6882 = vmatprep.subr.bf16.mxu1 %v6881_v7 }
 0x804   :  { %6884 = vmatpush3.bf16.msra.mxu1 %v6881_v7 }
 0x805   :  { %6512 = vmatprep.subr.mxu1 %v7095_v14 }
 0x807   :  { %6500 = vmatmul.mubr.msk.f32.vlgmr.msra.gmra.mrb[28].mxu1 %vm80_vm0, %v7238_v12 }
 0x808   :  { %6514 = vmatprep.mubr.msk.f32.mxu1 %vm7096_vm1, %v7095_v14 }
 0x883   :  { %v1841_v61 = vpop.xlane.xlu1 %1840 }
 0x884   :  { %v1838_v60 = vpop.xlane.xlu0 %1837 }
 0x885   :  { %7039 = vrcp.f32 %v1838_v60  ;;  %v7588_v60 = vld [vmem:[%s8023_s1 + $0x8] sm:$0xff] }
 0x886   :  { %7041 = vrcp.f32 %v1841_v61 }
 0x88f   :  { %v7040_v1 = vpop.eup %7039 }
 0x890   :  { %v7042_v6 = vpop.eup %7041 }
 0x8c8   :  { %v1984_v62 = vpop.f32.mrb[24].mxu1 }
 0x8c9   :  { %v1911_v2 = vpop.f32.mrb[16].mxu0  ;;  %v6463_v3 = vpop.f32.mrb[25].mxu1  ;;  %v1991_v10 = vmul.f32 %v7042_v6, %v1984_v62  ;;  %v5916_v6 = vld [vmem:[%s8053_s28 + $0x98] sm:$0xff] }
 0x8ca   :  { %v1990_v8 = vmul.f32 %v7040_v1, %v1911_v2  ;;  %v6458_v9 = vpop.f32.mrb[17].mxu0  ;;  %v5915_v3 = vld [vmem:[%s8053_s28 + $0x90] sm:$0xff] }
 0x8cc   :  { %6466 = vmatprep.mubr.msk.f32.mxu0 %vm338_vm2, %v1990_v8 }
 0x8cd   :  { %6467 = vmatmul.mubr.msk.f32.vlgmr.msra.gmra.mrb[10].mxu0 %vm338_vm2, %v1991_v10 }
 0x8ce   :  { %6872 = vmatpush3.bf16.msra.mxu0 %v6869_v53  ;;  %6488 = vmatprep.mubr.msk.f32.mxu0 %vm80_vm0, %v7217_v5  ;;  %v6893_v53 = vpack.c.bf16 %v5914_v51, %v5913_v50 }
 0x8cf   :  { %6874 = vmatprep.subr.bf16.mxu0 %v6873_v11 }
 0x8d2   :  { %6876 = vmatpush3.bf16.msra.mxu0 %v6873_v11  ;;  %v6479_v13 = vpop.f32.mrb[26].mxu1 }
 0x8d3   :  { %6502 = vmatprep.subr.mxu0 %v7095_v14  ;;  %v2156_v15 = vpop.f32.mrb[27].mxu1  ;;  %v2162_v27 = vadd.f32 %v6479_v13, %v5879_v22  ;;  %v6897_v13 = vpack.c.bf16 %v5916_v6, %v5915_v3 }
 0x8d4   :  { %v2157_v25 = vadd.f32 %v5879_v22, %v2156_v15  ;;  %v5907_v15 = vld [vmem:[%s8024_s5] ss:$0 sm:$0xff] }
 0x8d5   :  { %6489 = vmatmul.mubr.msk.f32.vlgmr.msra.gmra.mrb[18].mxu0 %vm80_vm0, %v7238_v12 }
 0x8d6   :  { %6504 = vmatprep.mubr.msk.f32.mxu0 %vm7096_vm1, %v7095_v14 }
 0x8da   :  { %v6501_v34 = vpop.f32.mrb[28].mxu1 }
 0x8db   :  { %v2338_v36 = vadd.f32 %v6501_v34, %v5895_v35  ;;  %v2332_v37 = vpop.f32.mrb[29].mxu1 }
 0x8dc   :  { %v2333_v38 = vadd.f32 %v5895_v35, %v2332_v37 }
 0x8de   :  { %6513 = vmatpush3.msra.mxu1 %v2333_v38 }
 0x8df   :  { %6886 = vmatprep.subr.bf16.mxu1 %v6885_v55 }
 0x9a8   :  { %v6490_v4 = vpop.f32.mrb[18].mxu0 }
 0x9a9   :  { %v2244_v23 = vpop.f32.mrb[19].mxu0  ;;  %v2250_v26 = vadd.f32 %v6490_v4, %v5887_v21 }
 0x9aa   :  { %v2245_v24 = vadd.f32 %v5887_v21, %v2244_v23 }
 0x9ac   :  { %6503 = vmatpush3.xpose.msk.msra.mxu0 %vm338_vm2, %v2245_v24  ;;  %v5918_v24 = vld [vmem:[%s8025_s9 + $0x4] ss:$0 sm:$0xff] }
 0x9ad   :  { %6507 = vmatprep.subr.mxu0 %v7095_v14 }
 0x9af   :  { %6505 = vmatmul.mubr.msk.f32.vlgmr.msra.gmra.mrb[20].mxu0 %vm338_vm2, %v2157_v25 }
 0x9b0   :  { %6508 = vmatpush3.xpose.msk.msra.mxu0 %vm338_vm2, %v2250_v26  ;;  %6509 = vmatprep.mubr.msk.f32.mxu0 %vm7096_vm1, %v7095_v14  ;;  %v5910_v26 = vld [vmem:[%s8025_s9] ss:$0 sm:$0xff] }
 0x9b1   :  { %6517 = vmatprep.subr.mxu0 %v7095_v14 }
 0x9b3   :  { %6510 = vmatmul.mubr.msk.f32.vlgmr.msra.gmra.mrb[22].mxu0 %vm338_vm2, %v2162_v27 }
 0x9b4   :  { %6519 = vmatprep.mubr.msk.f32.mxu0 %vm7096_vm1, %v7095_v14  ;;  %6518 = vmatpush3.msra.mxu0 %v2338_v36 }
 0x9b5   :  { %6522 = vmatprep.subr.mxu0 %v5904_v49 }
 0xa82   :  { %v2413_v28 = vpop.f32.mrb[20].mxu0 }
 0xa83   :  { %v6506_v29 = vpop.f32.mrb[21].mxu0  ;;  %v2493_v30 = vsel %vm338_vm2, %v2413_v28, -inf }
 0xa84   :  { %2494 = vmax.xlane.f32.xlu0 %v2493_v30 }
 0xa86   :  { %v2489_v31 = vpop.f32.mrb[22].mxu0 }
 0xa87   :  { %v6511_v32 = vpop.f32.mrb[23].mxu0  ;;  %v2496_v33 = vsel %vm338_vm2, %v2489_v31, -inf }
 0xa88   :  { %2497 = vmax.xlane.f32.xlu1 %v2496_v33 }
 0xb11   :  { %v2495_v39 = vpop.xlane.xlu0 %2494 }
 0xb12   :  { %v2499_v40 = vsub.f32 %v2413_v28, %v2495_v39 }
 0xb14   :  { %v2501_v41 = vmul.f32 1.442695, %v2499_v40  ;;  %v5921_v40 = vld [vmem:[%s8053_s28 + $0x100] sm:$0xff] }
 0xb15   :  { %v2498_v42 = vpop.xlane.xlu1 %2497 }
 0xb16   :  { %7043 = vpow2.f32 %v2501_v41  ;;  %v2500_v43 = vsub.f32 %v2489_v31, %v2498_v42  ;;  %v5922_v41 = vld [vmem:[%s8053_s28 + $0x108] sm:$0xff] }
 0xb17   :  { %v6901_v42 = vpack.c.bf16 %v5922_v41, %v5921_v40 }
 0xb18   :  { %v2503_v44 = vmul.f32 1.442695, %v2500_v43  ;;  %v5923_v43 = vld [vmem:[%s8053_s28 + $0x110] sm:$0xff] }
 0xb1a   :  { %7045 = vpow2.f32 %v2503_v44  ;;  %v5924_v44 = vld [vmem:[%s8053_s28 + $0x118] sm:$0xff] }
 0xb20   :  { %v7044_v45 = vpop.eup %7043 }
 0xb21   :  { %6515 = vmatmul.mubr.msk.f32.vlgmr.msra.gmra.mrb[30].mxu1 %vm338_vm2, %v7044_v45  ;;  %v2505_v46 = vsel %vm338_vm2, %v7044_v45, 0.0  ;;  %v6905_v45 = vpack.c.bf16 %v5924_v44, %v5923_v43 }
 0xb22   :  { %2506 = vadd.xlane.f32.xlu0 %v2505_v46  ;;  %6888 = vmatpush3.bf16.msra.mxu1 %v6885_v55 }
 0xb23   :  { %6535 = vmatprep.mubr.msk.f32.mxu1 %vm80_vm0, %v7581_v59  ;;  %6890 = vmatprep.subr.bf16.mxu1 %v6889_v58 }
 0xb24   :  { %v7046_v47 = vpop.eup %7045 }
 0xb25   :  { %6520 = vmatmul.mubr.msk.f32.vlgmr.msra.gmra.mrb[24].mxu0 %vm338_vm2, %v7046_v47  ;;  %v2508_v48 = vsel %vm338_vm2, %v7046_v47, 0.0 }
 0xb26   :  { %2509 = vadd.xlane.f32.xlu1 %v2508_v48  ;;  %6523 = vmatpush3.msra.mxu0 %v5904_v49 }
 0xb27   :  { %6894 = vmatprep.subr.bf16.mxu0 %v6893_v53  ;;  %6892 = vmatpush3.bf16.msra.mxu1 %v6889_v58 }
 0xb28   :  { %6902 = vmatprep.subr.bf16.mxu1 %v6901_v42 }
 0xb2a   :  { %6536 = vmatmul.mubr.msk.f32.vlgmr.msra.gmra.mrb[32].mxu1 %vm80_vm0, %v7588_v60 }
 0xb2b   :  { %6904 = vmatpush3.bf16.msra.mxu1 %v6901_v42  ;;  %v5956_v42 = vld [vmem:[%s8025_s9 + $0x9] ss:$0 sm:$0xff] }
 0xb2c   :  { %6906 = vmatprep.subr.bf16.mxu1 %v6905_v45 }
 0xb2f   :  { %6908 = vmatpush3.bf16.msra.mxu1 %v6905_v45 }
 0xb30   :  { %6565 = vmatprep.subr.mxu1 %v7095_v14 }
 0xbaf   :  { %v2507_v61 = vpop.xlane.xlu0 %2506 }
 0xbb0   :  { %7047 = vrcp.f32 %v2507_v61 }
 0xbb3   :  { %v2510_v62 = vpop.xlane.xlu1 %2509 }
 0xbb4   :  { %7049 = vrcp.f32 %v2510_v62  ;;  %v5909_v62 = vld [vmem:[%s8027_s7] ss:$0 sm:$0xff] }
 0xbba   :  { %v7048_v63 = vpop.eup %7047 }
 0xbbe   :  { %v7050_v8 = vpop.eup %7049 }
 0xbf4   :  { %v2580_v0 = vpop.f32.mrb[30].mxu1 }
 0xbf5   :  { %v2659_v1 = vmul.f32 %v7048_v63, %v2580_v0  ;;  %v6516_v2 = vpop.f32.mrb[31].mxu1 }
 0xbf7   :  { %6524 = vmatprep.mubr.msk.f32.mxu0 %vm338_vm2, %v2659_v1 }
 0xbf8   :  { %v2653_v9 = vpop.f32.mrb[24].mxu0 }
 0xbf9   :  { %v2660_v10 = vmul.f32 %v7050_v8, %v2653_v9  ;;  %v6521_v11 = vpop.f32.mrb[25].mxu0  ;;  %v5926_v9 = vld [vmem:[%s8025_s9 + $0x8] ss:$0 sm:$0xff] }
 0xbfa   :  { %v5936_v11 = vld [vmem:[%s8053_s28 + $0x28] sm:$0xff] }
 0xbfb   :  { %6525 = vmatmul.mubr.msk.f32.vlgmr.msra.gmra.mrb[10].mxu0 %vm338_vm2, %v2660_v10  ;;  %v5935_v10 = vld [vmem:[%s8053_s28 + $0x20] sm:$0xff] }
 0xbfc   :  { %6896 = vmatpush3.bf16.msra.mxu0 %v6893_v53  ;;  %6546 = vmatprep.mubr.msk.f32.mxu0 %vm80_vm0, %v7581_v59 }
 0xbfd   :  { %6898 = vmatprep.subr.bf16.mxu0 %v6897_v13  ;;  %v6537_v23 = vpop.f32.mrb[32].mxu1 }
 0xbfe   :  { %v2891_v28 = vadd.f32 %v6537_v23, %v5910_v26  ;;  %v5952_v23 = vld [vmem:[%s8053_s28 + $0x128] sm:$0xff] }
 0xc00   :  { %6900 = vmatpush3.bf16.msra.mxu0 %v6897_v13 }
 0xc01   :  { %6560 = vmatprep.subr.mxu0 %v7095_v14 }
 0xc03   :  { %6547 = vmatmul.mubr.msk.f32.vlgmr.msra.gmra.mrb[26].mxu0 %vm80_vm0, %v7588_v60 }
 0xc04   :  { %6562 = vmatprep.mubr.msk.f32.mxu0 %vm7096_vm1, %v7095_v14 }
 0xcce   :  { %v6526_v16 = vpop.f32.mrb[10].mxu0 }
 0xccf   :  { %v2754_v17 = vadd.f32 %v6526_v16, %v5907_v15  ;;  %v2735_v18 = vpop.f32.mrb[11].mxu0  ;;  %v5938_v16 = vld [vmem:[%s8053_s28 + $0x38] sm:$0xff] }
 0xcd0   :  { %v2753_v19 = vadd.f32 %v5907_v15, %v2735_v18  ;;  %v5937_v15 = vld [vmem:[%s8053_s28 + $0x30] sm:$0xff] }
 0xcd1   :  { %v2756_v20 = vadd.f32 %v2754_v17, %v7238_v12  ;;  %v2885_v12 = vpop.f32.mrb[33].mxu1 }
 0xcd2   :  { %v2755_v7 = vadd.f32 %v2753_v19, %v7217_v5  ;;  %v2886_v29 = vadd.f32 %v5910_v26, %v2885_v12  ;;  %v6909_v19 = vpack.c.bf16 %v5936_v11, %v5935_v10  ;;  %v5953_v12 = vld [vmem:[%s8053_s28 + $0x130] sm:$0xff] }
 0xcd3   :  { %v2762_v21 = vsel %vm80_vm0, %v2756_v20, 0.0 }
 0xcd4   :  { %2763 = vadd.xlane.f32.xlu1 %v2762_v21  ;;  %v2759_v4 = vsel %vm80_vm0, %v2755_v7, 0.0  ;;  %v6913_v21 = vpack.c.bf16 %v5938_v16, %v5937_v15 }
 0xcd5   :  { %2760 = vadd.xlane.f32.xlu0 %v2759_v4 }
 0xcd6   :  { %v6548_v22 = vpop.f32.mrb[26].mxu0 }
 0xcd7   :  { %v2973_v25 = vpop.f32.mrb[27].mxu0  ;;  %v2979_v27 = vadd.f32 %v6548_v22, %v5918_v24  ;;  %v5951_v22 = vld [vmem:[%s8053_s28 + $0x120] sm:$0xff] }
 0xcd8   :  { %v2974_v5 = vadd.f32 %v5918_v24, %v2973_v25  ;;  %v6925_v26 = vpack.c.bf16 %v5952_v23, %v5951_v22  ;;  %v5986_v22 = vld [vmem:[%s8053_s28 + $0x140] sm:$0xff]  ;;  %v5987_v23 = vld [vmem:[%s8053_s28 + $0x148] sm:$0xff] }
 0xcda   :  { %6561 = vmatpush3.xpose.msk.msra.mxu0 %vm338_vm2, %v2974_v5 }
 0xcdb   :  { %6570 = vmatprep.subr.mxu0 %v7095_v14 }
 0xcdd   :  { %6563 = vmatmul.mubr.msk.f32.vlgmr.msra.gmra.mrb[28].mxu0 %vm338_vm2, %v2886_v29  ;;  %v5944_v29 = vld [vmem:[%s8053_s28 + $0xa8] sm:$0xff] }
 0xcde   :  { %6572 = vmatprep.mubr.msk.f32.mxu0 %vm7096_vm1, %v7095_v14 }
 0xd61   :  { %v2764_v30 = vpop.xlane.xlu1 %2763 }
 0xd62   :  { %v2767_v31 = vmul.f32 0.03125, %v2764_v30  ;;  %v2761_v32 = vpop.xlane.xlu0 %2760 }
 0xd63   :  { %v2766_v33 = vmul.f32 0.03125, %v2761_v32 }
 0xd64   :  { %v2769_v34 = vsub.f32 %v2756_v20, %v2767_v31 }
 0xd65   :  { %v2768_v35 = vsub.f32 %v2755_v7, %v2766_v33 }
 0xd66   :  { %v2771_v36 = vmul.f32 %v2769_v34, %v2769_v34 }
 0xd67   :  { %v2770_v37 = vmul.f32 %v2768_v35, %v2768_v35 }
 0xd68   :  { %v2775_v38 = vsel %vm80_vm0, %v2771_v36, 0.0 }
 0xd69   :  { %2776 = vadd.xlane.f32.xlu1 %v2775_v38  ;;  %v2772_v39 = vsel %vm80_vm0, %v2770_v37, 0.0 }
 0xd6a   :  { %2773 = vadd.xlane.f32.xlu0 %v2772_v39 }
 0xdb0   :  { %v3148_v46 = vpop.f32.mrb[28].mxu0 }
 0xdb1   :  { %v3228_v47 = vsel %vm338_vm2, %v3148_v46, -inf  ;;  %v6564_v48 = vpop.f32.mrb[29].mxu0 }
 0xdb2   :  { %3229 = vmax.xlane.f32.xlu1 %v3228_v47 }
 0xdf6   :  { %v2777_v49 = vpop.xlane.xlu1 %2776 }
 0xdf7   :  { %v2779_v50 = vmul.f32 0.03125, %v2777_v49  ;;  %v2774_v51 = vpop.xlane.xlu0 %2773  ;;  %v5948_v49 = vld [vmem:[%s8025_s9 + $0x5] ss:$0 sm:$0xff] }
 0xdf8   :  { %v2778_v52 = vmul.f32 0.03125, %v2774_v51 }
 0xdf9   :  { %v2781_v53 = vadd.f32 1e-05, %v2779_v50  ;;  %v5940_v50 = vld [vmem:[%s8025_s9 + $0x1] ss:$0 sm:$0xff] }
 0xdfa   :  { %v2780_v54 = vadd.f32 1e-05, %v2778_v52 }
 0xdfb   :  { %7051 = vrsqrt.f32 %v2781_v53 }
 0xdfc   :  { %7053 = vrsqrt.f32 %v2780_v54 }
 0xe05   :  { %v7052_v55 = vpop.eup %7051 }
 0xe06   :  { %v7054_v57 = vpop.eup %7053  ;;  %v2785_v58 = vmul.f32 %v7052_v55, %v2769_v34  ;;  %v5945_v34 = vld [vmem:[%s8053_s28 + $0xb0] sm:$0xff] }
 0xe07   :  { %v2784_v61 = vmul.f32 %v7054_v57, %v2768_v35  ;;  %v5946_v35 = vld [vmem:[%s8053_s28 + $0xb8] sm:$0xff] }
 0xe08   :  { %v2793_v63 = vmul.f32 %v5908_v56, %v2785_v58  ;;  %v6921_v36 = vpack.c.bf16 %v5946_v35, %v5945_v34 }
 0xe09   :  { %v2792_v0 = vmul.f32 %v5908_v56, %v2784_v61 }
 0xe0a   :  { %v7649_v2 = vadd.f32 %v5909_v62, %v2793_v63 }
 0xe0b   :  { %v7647_v1 = vadd.f32 %v5909_v62, %v2792_v0 }
 0xe0d   :  { %6557 = vmatprep.mubr.msk.f32.mxu1 %vm80_vm0, %v7647_v1 }
 0xe0e   :  { %6558 = vmatmul.mubr.msk.f32.vlgmr.msra.gmra.mrb[34].mxu1 %vm80_vm0, %v7649_v2 }
 0xe0f   :  { %6566 = vmatpush3.xpose.msk.msra.mxu1 %vm338_vm2, %v2979_v27  ;;  %6567 = vmatprep.mubr.msk.f32.mxu1 %vm7096_vm1, %v7095_v14  ;;  %v5954_v27 = vld [vmem:[%s8053_s28 + $0x138] sm:$0xff] }
 0xe10   :  { %6575 = vmatprep.subr.mxu1 %v7095_v14  ;;  %v6929_v5 = vpack.c.bf16 %v5954_v27, %v5953_v12  ;;  %v5988_v12 = vld [vmem:[%s8053_s28 + $0x150] sm:$0xff]  ;;  %v5989_v27 = vld [vmem:[%s8053_s28 + $0x158] sm:$0xff] }
 0xe12   :  { %6568 = vmatmul.mubr.msk.f32.vlgmr.msra.gmra.mrb[36].mxu1 %vm338_vm2, %v2891_v28  ;;  %v5943_v28 = vld [vmem:[%s8053_s28 + $0xa0] sm:$0xff] }
 0xe13   :  { %6577 = vmatprep.mubr.msk.f32.mxu1 %vm7096_vm1, %v7095_v14  ;;  %v6917_v30 = vpack.c.bf16 %v5944_v29, %v5943_v28  ;;  %v5965_v28 = vld [vmem:[%s8028_s10 + $0x8] sm:$0xff]  ;;  %v3396_v29 = vld [vmem:[%s8028_s10] sm:$0xff] }
 0xe3f   :  { %v3230_v3 = vpop.xlane.xlu1 %3229 }
 0xe40   :  { %v3234_v6 = vsub.f32 %v3148_v46, %v3230_v3  ;;  %v5970_v3 = vld [vmem:[%s8053_s28 + $0x40] sm:$0xff] }
 0xe42   :  { %v3236_v8 = vmul.f32 1.442695, %v3234_v6  ;;  %v5971_v6 = vld [vmem:[%s8053_s28 + $0x48] sm:$0xff] }
 0xe44   :  { %7055 = vpow2.f32 %v3236_v8  ;;  %v6933_v8 = vpack.c.bf16 %v5971_v6, %v5970_v3 }
 0xe4e   :  { %v7677_v20 = vpop.eup %7055 }
 0xee1   :  { %v6559_v13 = vpop.f32.mrb[34].mxu1 }
 0xee2   :  { %v3073_v17 = vadd.f32 %v6559_v13, %v5926_v9  ;;  %v3067_v18 = vpop.f32.mrb[35].mxu1 }
 0xee3   :  { %v3068_v7 = vadd.f32 %v5926_v9, %v3067_v18  ;;  %v5972_v18 = vld [vmem:[%s8053_s28 + $0x50] sm:$0xff] }
 0xee4   :  { %6576 = vmatpush3.msra.mxu1 %v3073_v17 }
 0xee5   :  { %v3224_v4 = vpop.f32.mrb[36].mxu1  ;;  %6571 = vmatpush3.msra.mxu0 %v3068_v7  ;;  %6918 = vmatprep.subr.bf16.mxu1 %v6917_v30 }
 0xee6   :  { %v6569_v24 = vpop.f32.mrb[37].mxu1  ;;  %6910 = vmatprep.subr.bf16.mxu0 %v6909_v19  ;;  %v3231_v25 = vsel %vm338_vm2, %v3224_v4, -inf  ;;  %6573 = vmatmul.mubr.msk.f32.vlgmr.msra.gmra.mrb[30].mxu0 %vm338_vm2, %v7677_v20 }
 0xee7   :  { %3232 = vmax.xlane.f32.xlu0 %v3231_v25  ;;  %6912 = vmatpush3.bf16.msra.mxu0 %v6909_v19  ;;  %v5973_v19 = vld [vmem:[%s8053_s28 + $0x58] sm:$0xff]  ;;  %v3240_v24 = vsel %vm338_vm2, %v7677_v20, 0.0 }
 0xee8   :  { %6914 = vmatprep.subr.bf16.mxu0 %v6913_v21  ;;  %6588 = vmatprep.mubr.msk.f32.mxu0 %vm80_vm0, %v7581_v59 }
 0xeeb   :  { %6916 = vmatpush3.bf16.msra.mxu0 %v6913_v21  ;;  %v6937_v21 = vpack.c.bf16 %v5973_v19, %v5972_v18  ;;  %v6003_v18 = vld [vmem:[%s8053_s28 + $0x60] sm:$0xff]  ;;  %v6004_v19 = vld [vmem:[%s8053_s28 + $0x68] sm:$0xff] }
 0xeec   :  { %6926 = vmatprep.subr.bf16.mxu0 %v6925_v26 }
 0xeee   :  { %6589 = vmatmul.mubr.msk.f32.vlgmr.msra.gmra.mrb[32].mxu0 %vm80_vm0, %v7588_v60 }
 0xeef   :  { %6928 = vmatpush3.bf16.msra.mxu0 %v6925_v26  ;;  %6610 = vmatprep.mubr.msk.f32.mxu0 %vm80_vm0, %v7647_v1  ;;  %v6949_v26 = vpack.c.bf16 %v5987_v23, %v5986_v22 }
 0xef0   :  { %6930 = vmatprep.subr.bf16.mxu0 %v6929_v5 }
 0xef3   :  { %6932 = vmatpush3.bf16.msra.mxu0 %v6929_v5  ;;  %v6953_v5 = vpack.c.bf16 %v5989_v27, %v5988_v12  ;;  %v6006_v12 = vld [vmem:[%s8053_s28 + $0x78] sm:$0xff] }
 0xef4   :  { %6623 = vmatprep.subr.mxu0 %v7095_v14 }
 0xef6   :  { %6611 = vmatmul.mubr.msk.f32.vlgmr.msra.gmra.mrb[34].mxu0 %vm80_vm0, %v7649_v2 }
 0xef7   :  { %6625 = vmatprep.mubr.msk.f32.mxu0 %vm7096_vm1, %v7095_v14 }
 0xf74   :  { %v3233_v31 = vpop.xlane.xlu0 %3232 }
 0xf75   :  { %v3235_v32 = vsub.f32 %v3224_v4, %v3233_v31 }
 0xf77   :  { %v3238_v33 = vmul.f32 1.442695, %v3235_v32 }
 0xf79   :  { %7057 = vpow2.f32 %v3238_v33 }
 0xf83   :  { %v7717_v37 = vpop.eup %7057 }
 0xf84   :  { %6578 = vmatmul.mubr.msk.f32.vlgmr.msra.gmra.mrb[38].mxu1 %vm338_vm2, %v7717_v37  ;;  %v3243_v20 = vsel %vm338_vm2, %v7717_v37, 0.0 }
 0xf85   :  { %6920 = vmatpush3.bf16.msra.mxu1 %v6917_v30  ;;  %6599 = vmatprep.mubr.msk.f32.mxu1 %vm80_vm0, %v7581_v59 }
 0xf86   :  { %6922 = vmatprep.subr.bf16.mxu1 %v6921_v36 }
 0xf89   :  { %6924 = vmatpush3.bf16.msra.mxu1 %v6921_v36 }
 0xf8a   :  { %6613 = vmatprep.subr.mxu1 %v7095_v14 }
 0xf8c   :  { %6600 = vmatmul.mubr.msk.f32.vlgmr.msra.gmra.mrb[40].mxu1 %vm80_vm0, %v7588_v60 }
 0xf8d   :  { %6615 = vmatprep.mubr.msk.f32.mxu1 %vm7096_vm1, %v7095_v14 }
 0xfb9   :  { %v7728_v38 = vpop.f32.mrb[30].mxu0 }
 0xfba   :  { %v6574_v39 = vpop.f32.mrb[31].mxu0 }
 0xfbb   :  { %v5978_v39 = vld [vmem:[%s8053_s28 + $0xc0] sm:$0xff] }
 0xfc1   :  { %v6590_v40 = vpop.f32.mrb[32].mxu0 }
 0xfc2   :  { %v3476_v41 = vpop.f32.mrb[33].mxu0  ;;  %v3482_v56 = vadd.f32 %v6590_v40, %v5940_v50  ;;  %v5979_v40 = vld [vmem:[%s8053_s28 + $0xc8] sm:$0xff] }
 0xfc3   :  { %v3477_v54 = vadd.f32 %v5940_v50, %v3476_v41  ;;  %v5980_v50 = vld [vmem:[%s8053_s28 + $0xd0] sm:$0xff] }
 0xfc9   :  { %v6612_v43 = vpop.f32.mrb[34].mxu0 }
 0xfca   :  { %v3658_v44 = vadd.f32 %v6612_v43, %v5956_v42  ;;  %v3652_v45 = vpop.f32.mrb[35].mxu0 }
 0xfcb   :  { %v3653_v46 = vadd.f32 %v5956_v42, %v3652_v45 }
 0xfcd   :  { %6624 = vmatpush3.msra.mxu0 %v3653_v46  ;;  %v6941_v46 = vpack.c.bf16 %v5979_v40, %v5978_v39  ;;  %v6012_v39 = vld [vmem:[%s8053_s28 + $0xe8] sm:$0xff] }
 0xfce   :  { %6633 = vmatprep.subr.mxu0 %v5965_v28 }
0x1057   :  { %v7733_v47 = vpop.f32.mrb[38].mxu1 }
0x1058   :  { %v6579_v48 = vpop.f32.mrb[39].mxu1 }
0x105f   :  { %v6601_v51 = vpop.f32.mrb[40].mxu1 }
0x1060   :  { %v3564_v52 = vpop.f32.mrb[41].mxu1  ;;  %v3570_v55 = vadd.f32 %v6601_v51, %v5948_v49  ;;  %v5981_v51 = vld [vmem:[%s8053_s28 + $0xd8] sm:$0xff] }
0x1061   :  { %v3565_v53 = vadd.f32 %v5948_v49, %v3564_v52 }
0x1063   :  { %6614 = vmatpush3.xpose.msk.msra.mxu1 %vm338_vm2, %v3565_v53 }
0x1064   :  { %6618 = vmatprep.subr.mxu1 %v7095_v14 }
0x1066   :  { %6616 = vmatmul.mubr.msk.f32.vlgmr.msra.gmra.mrb[42].mxu1 %vm338_vm2, %v3477_v54 }
0x1067   :  { %6619 = vmatpush3.xpose.msk.msra.mxu1 %vm338_vm2, %v3570_v55  ;;  %6620 = vmatprep.mubr.msk.f32.mxu1 %vm7096_vm1, %v7095_v14 }
0x1068   :  { %6628 = vmatprep.subr.mxu1 %v7095_v14 }
0x106a   :  { %6621 = vmatmul.mubr.msk.f32.vlgmr.msra.gmra.mrb[44].mxu1 %vm338_vm2, %v3482_v56 }
0x106b   :  { %6629 = vmatpush3.msra.mxu1 %v3658_v44  ;;  %6630 = vmatprep.mubr.msk.f32.mxu1 %vm7096_vm1, %v7095_v14 }
0x106c   :  { %6934 = vmatprep.subr.bf16.mxu1 %v6933_v8 }
0x1139   :  { %v3733_v57 = vpop.f32.mrb[42].mxu1 }
0x113a   :  { %v6617_v58 = vpop.f32.mrb[43].mxu1  ;;  %v3813_v61 = vsel %vm338_vm2, %v3733_v57, -inf }
0x113b   :  { %3814 = vmax.xlane.f32.xlu0 %v3813_v61 }
0x113d   :  { %v3809_v62 = vpop.f32.mrb[44].mxu1 }
0x113e   :  { %v6622_v63 = vpop.f32.mrb[45].mxu1  ;;  %v3816_v0 = vsel %vm338_vm2, %v3809_v62, -inf }
0x113f   :  { %3817 = vmax.xlane.f32.xlu1 %v3816_v0  ;;  %v5991_v0 = vld [vmem:[%s8025_s9 + $0xa] ss:$0 sm:$0xff] }
0x11c8   :  { %v3815_v9 = vpop.xlane.xlu0 %3814 }
0x11c9   :  { %v3819_v10 = vsub.f32 %v3733_v57, %v3815_v9  ;;  %v5975_v57 = vld [vmem:[%s8025_s9 + $0x2] ss:$0 sm:$0xff] }
0x11cb   :  { %v3821_v11 = vmul.f32 1.442695, %v3819_v10 }
0x11cc   :  { %v3818_v13 = vpop.xlane.xlu1 %3817 }
0x11cd   :  { %7059 = vpow2.f32 %v3821_v11  ;;  %v3820_v15 = vsub.f32 %v3809_v62, %v3818_v13 }
0x11cf   :  { %v3823_v16 = vmul.f32 1.442695, %v3820_v15 }
0x11d1   :  { %7061 = vpow2.f32 %v3823_v16 }
0x11d7   :  { %v7060_v17 = vpop.eup %7059 }
0x11d8   :  { %6626 = vmatmul.mubr.msk.f32.vlgmr.msra.gmra.mrb[36].mxu0 %vm338_vm2, %v7060_v17  ;;  %v3825_v7 = vsel %vm338_vm2, %v7060_v17, 0.0 }
0x11d9   :  { %3826 = vadd.xlane.f32.xlu0 %v3825_v7  ;;  %6634 = vmatpush3.msra.mxu0 %v5965_v28  ;;  %v6957_v7 = vpack.c.bf16 %v6004_v19, %v6003_v18  ;;  %v6020_v28 = vld [vmem:[%s8053_s28 + $0x168] sm:$0xff] }
0x11da   :  { %6638 = vmatprep.subr.mxu0 %v3396_v29 }
0x11db   :  { %v7062_v4 = vpop.eup %7061 }
0x11dc   :  { %6631 = vmatmul.mubr.msk.f32.vlgmr.msra.gmra.mrb[46].mxu1 %vm338_vm2, %v7062_v4  ;;  %v3828_v25 = vsel %vm338_vm2, %v7062_v4, 0.0 }
0x11dd   :  { %6936 = vmatpush3.bf16.msra.mxu1 %v6933_v8  ;;  %3241 = vadd.xlane.f32.xlu0 %v3240_v24 }
0x11de   :  { %3829 = vadd.xlane.f32.xlu1 %v3828_v25  ;;  %6938 = vmatprep.subr.bf16.mxu1 %v6937_v21 }
0x11df   :  { %6651 = vmatprep.mubr.msk.f32.mxu1 %vm80_vm0, %v7581_v59 }
0x11e1   :  { %6940 = vmatpush3.bf16.msra.mxu1 %v6937_v21 }
0x11e2   :  { %3244 = vadd.xlane.f32.xlu1 %v3243_v20  ;;  %6950 = vmatprep.subr.bf16.mxu1 %v6949_v26 }
0x11e4   :  { %6652 = vmatmul.mubr.msk.f32.vlgmr.msra.gmra.mrb[48].mxu1 %vm80_vm0, %v7588_v60 }
0x11e5   :  { %6952 = vmatpush3.bf16.msra.mxu1 %v6949_v26  ;;  %6673 = vmatprep.mubr.msk.f32.mxu1 %vm80_vm0, %v7647_v1  ;;  %v6005_v26 = vld [vmem:[%s8053_s28 + $0x70] sm:$0xff] }
0x11e6   :  { %6954 = vmatprep.subr.bf16.mxu1 %v6953_v5  ;;  %v6961_v20 = vpack.c.bf16 %v6006_v12, %v6005_v26 }
0x11e9   :  { %6956 = vmatpush3.bf16.msra.mxu1 %v6953_v5  ;;  %v6019_v5 = vld [vmem:[%s8053_s28 + $0x160] sm:$0xff] }
0x11ea   :  { %6681 = vmatprep.subr.mxu1 %v7095_v14 }
0x11ec   :  { %6674 = vmatmul.mubr.msk.f32.vlgmr.msra.gmra.mrb[50].mxu1 %vm80_vm0, %v7649_v2 }
0x11ed   :  { %6683 = vmatprep.mubr.msk.f32.mxu1 %vm7096_vm1, %v7095_v14 }
0x1266   :  { %v3827_v30 = vpop.xlane.xlu0 %3826 }
0x1267   :  { %7063 = vrcp.f32 %v3827_v30 }
0x126a   :  { %v3242_v31 = vpop.xlane.xlu0 %3241 }
0x126b   :  { %v3830_v32 = vpop.xlane.xlu1 %3829  ;;  %7065 = vrcp.f32 %v3242_v31 }
0x126c   :  { %7067 = vrcp.f32 %v3830_v32  ;;  %v6973_v32 = vpack.c.bf16 %v6020_v28, %v6019_v5 }
0x126f   :  { %v3245_v33 = vpop.xlane.xlu1 %3244 }
0x1270   :  { %7069 = vrcp.f32 %v3245_v33  ;;  %v6021_v33 = vld [vmem:[%s8053_s28 + $0x170] sm:$0xff] }
0x1271   :  { %v7064_v34 = vpop.eup %7063 }
0x1275   :  { %v7066_v41 = vpop.eup %7065 }
0x1276   :  { %v7068_v42 = vpop.eup %7067  ;;  %v3394_v48 = vmul.f32 %v7066_v41, %v7728_v38  ;;  %v6945_v38 = vpack.c.bf16 %v5981_v51, %v5980_v50 }
0x127a   :  { %v7070_v49 = vpop.eup %7069 }
0x127b   :  { %v3395_v53 = vmul.f32 %v7070_v49, %v7733_v47  ;;  %v5983_v47 = vld [vmem:[%s8025_s9 + $0x6] ss:$0 sm:$0xff] }
0x12ab   :  { %v3900_v35 = vpop.f32.mrb[36].mxu0 }
0x12ac   :  { %v3979_v36 = vmul.f32 %v7064_v34, %v3900_v35  ;;  %v6627_v37 = vpop.f32.mrb[37].mxu0  ;;  %v6022_v34 = vld [vmem:[%s8053_s28 + $0x178] sm:$0xff] }
0x12ad   :  { %v6977_v35 = vpack.c.bf16 %v6022_v34, %v6021_v33  ;;  %v6011_v37 = vld [vmem:[%s8053_s28 + $0xe0] sm:$0xff] }
0x12ae   :  { %6635 = vmatprep.mubr.msk.f32.mxu0 %vm338_vm2, %v3979_v36  ;;  %v6000_v36 = vld [vmem:[%s8028_s10 + $0x10] sm:$0xff]  ;;  %v6965_v40 = vpack.c.bf16 %v6012_v39, %v6011_v37  ;;  %v6036_v33 = vld [vmem:[%s8029_s11] ss:$0 sm:$0xff] }
0x12af   :  { %v3973_v43 = vpop.f32.mrb[46].mxu1 }
0x12b0   :  { %v3980_v44 = vmul.f32 %v7068_v42, %v3973_v43  ;;  %v6632_v45 = vpop.f32.mrb[47].mxu1 }
0x12b1   :  { %v6013_v45 = vld [vmem:[%s8053_s28 + $0xf0] sm:$0xff] }
0x12b2   :  { %6636 = vmatmul.mubr.msk.f32.vlgmr.msra.gmra.mrb[38].mxu0 %vm338_vm2, %v3980_v44 }
0x12b3   :  { %6639 = vmatpush3.msra.mxu0 %v3396_v29  ;;  %6640 = vmatprep.mubr.msk.f32.mxu0 %vm338_vm2, %v3394_v48 }
0x12b4   :  { %6942 = vmatprep.subr.bf16.mxu0 %v6941_v46 }
0x12b7   :  { %v6653_v52 = vpop.f32.mrb[48].mxu1 }
0x12b8   :  { %v4224_v54 = vpop.f32.mrb[49].mxu1  ;;  %v4230_v63 = vadd.f32 %v6653_v52, %v5975_v57 }
0x12b9   :  { %v4225_v6 = vadd.f32 %v5975_v57, %v4224_v54 }
0x12ba   :  { %6641 = vmatmul.mubr.msk.f32.vlgmr.msra.gmra.mrb[38].mxu0 %vm338_vm2, %v3395_v53 }
0x12bb   :  { %6944 = vmatpush3.bf16.msra.mxu0 %v6941_v46  ;;  %6662 = vmatprep.mubr.msk.f32.mxu0 %vm80_vm0, %v7581_v59  ;;  %v6014_v46 = vld [vmem:[%s8053_s28 + $0xf8] sm:$0xff] }
0x12bc   :  { %6946 = vmatprep.subr.bf16.mxu0 %v6945_v38  ;;  %v6969_v54 = vpack.c.bf16 %v6014_v46, %v6013_v45 }
0x12bf   :  { %6948 = vmatpush3.bf16.msra.mxu0 %v6945_v38  ;;  %v6675_v55 = vpop.f32.mrb[50].mxu1 }
0x12c0   :  { %v4400_v56 = vpop.f32.mrb[51].mxu1  ;;  %6676 = vmatprep.subr.mxu0 %v7095_v14  ;;  %v4406_v8 = vadd.f32 %v6675_v55, %v5991_v0 }
0x12c1   :  { %v4401_v9 = vadd.f32 %v5991_v0, %v4400_v56  ;;  %v6024_v56 = vld [vmem:[%s8025_s9 + $0xb] ss:$0 sm:$0xff] }
0x12c2   :  { %6663 = vmatmul.mubr.msk.f32.vlgmr.msra.gmra.mrb[40].mxu0 %vm80_vm0, %v7588_v60 }
0x12c3   :  { %6678 = vmatprep.mubr.msk.f32.mxu0 %vm7096_vm1, %v7095_v14 }
0x1395   :  { %v6664_v58 = vpop.f32.mrb[40].mxu0 }
0x1396   :  { %v4318_v61 = vadd.f32 %v6664_v58, %v5983_v47  ;;  %v4312_v62 = vpop.f32.mrb[41].mxu0 }
0x1397   :  { %v4313_v3 = vadd.f32 %v5983_v47, %v4312_v62 }
0x1398   :  { %6682 = vmatpush3.xpose.msk.msra.mxu1 %vm338_vm2, %v4318_v61  ;;  %v6016_v61 = vld [vmem:[%s8025_s9 + $0x7] ss:$0 sm:$0xff] }
0x1399   :  { %6677 = vmatpush3.xpose.msk.msra.mxu0 %vm338_vm2, %v4313_v3  ;;  %6691 = vmatprep.subr.mxu1 %v7095_v14 }
0x139a   :  { %6686 = vmatprep.subr.mxu0 %v7095_v14 }
0x139b   :  { %6684 = vmatmul.mubr.msk.f32.vlgmr.msra.gmra.mrb[52].mxu1 %vm338_vm2, %v4230_v63 }
0x139c   :  { %6679 = vmatmul.mubr.msk.f32.vlgmr.msra.gmra.mrb[42].mxu0 %vm338_vm2, %v4225_v6  ;;  %6692 = vmatpush3.msra.mxu1 %v4406_v8 }
0x139d   :  { %6687 = vmatpush3.msra.mxu0 %v4401_v9  ;;  %6693 = vmatprep.mubr.msk.f32.mxu1 %vm7096_vm1, %v7095_v14 }
0x139e   :  { %6688 = vmatprep.mubr.msk.f32.mxu0 %vm7096_vm1, %v7095_v14  ;;  %6958 = vmatprep.subr.bf16.mxu1 %v6957_v7 }
0x139f   :  { %6696 = vmatprep.subr.mxu0 %v6000_v36 }
0x146e   :  { %v4557_v10 = vpop.f32.mrb[52].mxu1 }
0x146f   :  { %v4481_v11 = vpop.f32.mrb[42].mxu0  ;;  %v6685_v13 = vpop.f32.mrb[53].mxu1  ;;  %v4564_v15 = vsel %vm338_vm2, %v4557_v10, -inf }
0x1470   :  { %4565 = vmax.xlane.f32.xlu1 %v4564_v15  ;;  %v6680_v16 = vpop.f32.mrb[43].mxu0  ;;  %v4561_v17 = vsel %vm338_vm2, %v4481_v11, -inf }
0x1471   :  { %4562 = vmax.xlane.f32.xlu0 %v4561_v17 }
0x14fd   :  { %v4566_v21 = vpop.xlane.xlu1 %4565 }
0x14fe   :  { %v4568_v4 = vsub.f32 %v4557_v10, %v4566_v21  ;;  %v4563_v22 = vpop.xlane.xlu0 %4562 }
0x14ff   :  { %v4567_v23 = vsub.f32 %v4481_v11, %v4563_v22 }
0x1500   :  { %v4571_v24 = vmul.f32 1.442695, %v4568_v4 }
0x1501   :  { %v4569_v25 = vmul.f32 1.442695, %v4567_v23 }
0x1502   :  { %7071 = vpow2.f32 %v4571_v24 }
0x1503   :  { %7073 = vpow2.f32 %v4569_v25  ;;  %v6033_v25 = vld [vmem:[%s8028_s10 + $0x18] sm:$0xff] }
0x150c   :  { %v7072_v27 = vpop.eup %7071 }
0x150d   :  { %v7074_v29 = vpop.eup %7073  ;;  %6694 = vmatmul.mubr.msk.f32.vlgmr.msra.gmra.mrb[54].mxu1 %vm338_vm2, %v7072_v27  ;;  %v4576_v30 = vsel %vm338_vm2, %v7072_v27, 0.0 }
0x150e   :  { %6960 = vmatpush3.bf16.msra.mxu1 %v6957_v7  ;;  %4577 = vadd.xlane.f32.xlu1 %v4576_v30  ;;  %v4573_v31 = vsel %vm338_vm2, %v7074_v29, 0.0 }
0x150f   :  { %6689 = vmatmul.mubr.msk.f32.vlgmr.msra.gmra.mrb[44].mxu0 %vm338_vm2, %v7074_v29  ;;  %4574 = vadd.xlane.f32.xlu0 %v4573_v31 }
0x1510   :  { %6962 = vmatprep.subr.bf16.mxu1 %v6961_v20  ;;  %6709 = vmatprep.mubr.msk.f32.mxu1 %vm80_vm0, %v7581_v59 }
0x1511   :  { %6697 = vmatpush3.msra.mxu0 %v6000_v36 }
0x1512   :  { %6964 = vmatpush3.bf16.msra.mxu1 %v6961_v20  ;;  %6966 = vmatprep.subr.bf16.mxu0 %v6965_v40 }
0x1513   :  { %6974 = vmatprep.subr.bf16.mxu1 %v6973_v32 }
0x1515   :  { %6710 = vmatmul.mubr.msk.f32.vlgmr.msra.gmra.mrb[56].mxu1 %vm80_vm0, %v7588_v60 }
0x1516   :  { %6976 = vmatpush3.bf16.msra.mxu1 %v6973_v32  ;;  %6731 = vmatprep.mubr.msk.f32.mxu1 %vm80_vm0, %v7647_v1 }
0x1517   :  { %6978 = vmatprep.subr.bf16.mxu1 %v6977_v35 }
0x151a   :  { %6980 = vmatpush3.bf16.msra.mxu1 %v6977_v35 }
0x151b   :  { %6744 = vmatprep.subr.mxu1 %v7095_v14 }
0x151d   :  { %6732 = vmatmul.mubr.msk.f32.vlgmr.msra.gmra.mrb[58].mxu1 %vm80_vm0, %v7649_v2 }
0x151e   :  { %6746 = vmatprep.mubr.msk.f32.mxu1 %vm7096_vm1, %v7095_v14 }
0x159b   :  { %v4578_v42 = vpop.xlane.xlu1 %4577 }
0x159c   :  { %v4575_v41 = vpop.xlane.xlu0 %4574 }
0x159d   :  { %7075 = vrcp.f32 %v4575_v41 }
0x159e   :  { %7077 = vrcp.f32 %v4578_v42 }
0x15a7   :  { %v7076_v48 = vpop.eup %7075 }
0x15a8   :  { %v7078_v50 = vpop.eup %7077 }
0x15e0   :  { %v4721_v43 = vpop.f32.mrb[54].mxu1 }
0x15e1   :  { %v6695_v44 = vpop.f32.mrb[55].mxu1  ;;  %v4728_v53 = vmul.f32 %v7078_v50, %v4721_v43 }
0x15e2   :  { %v4648_v49 = vpop.f32.mrb[44].mxu0 }
0x15e3   :  { %v4727_v51 = vmul.f32 %v7076_v48, %v4648_v49  ;;  %v6690_v52 = vpop.f32.mrb[45].mxu0 }
0x15e5   :  { %6698 = vmatprep.mubr.msk.f32.mxu0 %vm338_vm2, %v4727_v51 }
0x15e6   :  { %6699 = vmatmul.mubr.msk.f32.vlgmr.msra.gmra.mrb[38].mxu0 %vm338_vm2, %v4728_v53  ;;  %v5539_v53 = vld [vmem:[%s8030_s14 + $0x8] sm:$0xff] }
0x15e7   :  { %6968 = vmatpush3.bf16.msra.mxu0 %v6965_v40  ;;  %6720 = vmatprep.mubr.msk.f32.mxu0 %vm80_vm0, %v7581_v59 }
0x15e8   :  { %6970 = vmatprep.subr.bf16.mxu0 %v6969_v54  ;;  %v6711_v38 = vpop.f32.mrb[56].mxu1 }
0x15e9   :  { %v4893_v55 = vpop.f32.mrb[57].mxu1 }
0x15eb   :  { %6972 = vmatpush3.bf16.msra.mxu0 %v6969_v54 }
0x15ec   :  { %6734 = vmatprep.subr.mxu0 %v7095_v14 }
0x15ee   :  { %6721 = vmatmul.mubr.msk.f32.vlgmr.msra.gmra.mrb[46].mxu0 %vm80_vm0, %v7588_v60  ;;  %v6008_v60 = vld [vmem:[%s8025_s9 + $0x3] ss:$0 sm:$0xff] }
0x15ef   :  { %6736 = vmatprep.mubr.msk.f32.mxu0 %vm7096_vm1, %v7095_v14  ;;  %v4894_v3 = vadd.f32 %v6008_v60, %v4893_v55  ;;  %v4899_v8 = vadd.f32 %v6711_v38, %v6008_v60  ;;  %v5540_v38 = vld [vmem:[%s8030_s14 + $0x10] sm:$0xff]  ;;  %v5541_v55 = vld [vmem:[%s8030_s14 + $0x18] sm:$0xff] }
0x15f0   :  { %v6733_v47 = vpop.f32.mrb[58].mxu1 }
0x15f1   :  { %v5075_v57 = vadd.f32 %v6733_v47, %v6024_v56  ;;  %v5069_v58 = vpop.f32.mrb[59].mxu1  ;;  %v5632_v47 = vld [vmem:[%s8031_s16] sm:$0xff] }
0x15f2   :  { %v5070_v59 = vadd.f32 %v6024_v56, %v5069_v58  ;;  %v6985_v56 = vpack.c.bf16 %v5541_v55, %v5540_v38  ;;  %v5634_v58 = vld [vmem:[%s8031_s16 + $0x10] sm:$0xff]  ;;  %v6045_v38 = vld [vmem:[%s8036_s18] ss:$0 sm:$0xff] }
0x15f4   :  { %6745 = vmatpush3.msra.mxu1 %v5070_v59 }
0x16c1   :  { %v6722_v62 = vpop.f32.mrb[46].mxu0 }
0x16c2   :  { %v4981_v63 = vpop.f32.mrb[47].mxu0  ;;  %v4987_v6 = vadd.f32 %v6722_v62, %v6016_v61  ;;  %v5636_v62 = vld [vmem:[%s8031_s16 + $0x20] sm:$0xff] }
0x16c3   :  { %v4982_v0 = vadd.f32 %v6016_v61, %v4981_v63  ;;  %v5635_v61 = vld [vmem:[%s8031_s16 + $0x18] sm:$0xff]  ;;  %v5637_v63 = vld [vmem:[%s8031_s16 + $0x28] sm:$0xff] }
0x16c4   :  { %v6993_v60 = vpack.c.bf16 %v5635_v61, %v5634_v58 }
0x16c5   :  { %6735 = vmatpush3.xpose.msk.msra.mxu0 %vm338_vm2, %v4982_v0  ;;  %v6997_v0 = vpack.c.bf16 %v5637_v63, %v5636_v62 }
0x16c6   :  { %6739 = vmatprep.subr.mxu0 %v7095_v14 }
0x16c8   :  { %6737 = vmatmul.mubr.msk.f32.vlgmr.msra.gmra.mrb[48].mxu0 %vm338_vm2, %v4894_v3 }
0x16c9   :  { %6740 = vmatpush3.xpose.msk.msra.mxu0 %vm338_vm2, %v4987_v6  ;;  %6741 = vmatprep.mubr.msk.f32.mxu0 %vm7096_vm1, %v7095_v14 }
0x16ca   :  { %6749 = vmatprep.subr.mxu0 %v7095_v14 }
0x16cc   :  { %6742 = vmatmul.mubr.msk.f32.vlgmr.msra.gmra.mrb[50].mxu0 %vm338_vm2, %v4899_v8 }
0x16cd   :  { %6750 = vmatpush3.msra.mxu0 %v5075_v57  ;;  %6751 = vmatprep.mubr.msk.f32.mxu0 %vm7096_vm1, %v7095_v14  ;;  %v5633_v57 = vld [vmem:[%s8031_s16 + $0x8] sm:$0xff] }
0x16ce   :  { %6754 = vmatprep.subr.mxu0 %v6033_v25  ;;  %v6989_v59 = vpack.c.bf16 %v5633_v57, %v5632_v47  ;;  %v6046_v47 = vld [vmem:[%s8037_s19] ss:$0 sm:$0xff] }
0x179b   :  { %v5150_v9 = vpop.f32.mrb[48].mxu0 }
0x179c   :  { %v6738_v10 = vpop.f32.mrb[49].mxu0  ;;  %v5230_v11 = vsel %vm338_vm2, %v5150_v9, -inf }
0x179d   :  { %5231 = vmax.xlane.f32.xlu0 %v5230_v11 }
0x179f   :  { %v5226_v13 = vpop.f32.mrb[50].mxu0 }
0x17a0   :  { %v6743_v15 = vpop.f32.mrb[51].mxu0  ;;  %v5233_v16 = vsel %vm338_vm2, %v5226_v13, -inf }
0x17a1   :  { %5234 = vmax.xlane.f32.xlu1 %v5233_v16  ;;  %v6037_v15 = vld [vmem:[%s8032_s12] ss:$0 sm:$0xff] }
0x182a   :  { %v5232_v17 = vpop.xlane.xlu0 %5231 }
0x182b   :  { %v5236_v18 = vsub.f32 %v5150_v9, %v5232_v17 }
0x182d   :  { %v5238_v19 = vmul.f32 1.442695, %v5236_v18 }
0x182e   :  { %v5235_v7 = vpop.xlane.xlu1 %5234 }
0x182f   :  { %7079 = vpow2.f32 %v5238_v19  ;;  %v5237_v21 = vsub.f32 %v5226_v13, %v5235_v7  ;;  %v6038_v19 = vld [vmem:[%s8033_s13] ss:$0 sm:$0xff] }
0x1831   :  { %v5240_v4 = vmul.f32 1.442695, %v5237_v21 }
0x1833   :  { %7081 = vpow2.f32 %v5240_v4 }
0x1839   :  { %v7080_v22 = vpop.eup %7079 }
0x183a   :  { %6747 = vmatmul.mubr.msk.f32.vlgmr.msra.gmra.mrb[60].mxu1 %vm338_vm2, %v7080_v22  ;;  %v5242_v14 = vsel %vm338_vm2, %v7080_v22, 0.0 }
0x183b   :  { %5243 = vadd.xlane.f32.xlu0 %v5242_v14  ;;  %v5638_v14 = vld [vmem:[%s8031_s16 + $0x30] sm:$0xff] }
0x183d   :  { %v7082_v23 = vpop.eup %7081 }
0x183e   :  { %6752 = vmatmul.mubr.msk.f32.vlgmr.msra.gmra.mrb[52].mxu0 %vm338_vm2, %v7082_v23  ;;  %v5245_v24 = vsel %vm338_vm2, %v7082_v23, 0.0  ;;  %v5639_v23 = vld [vmem:[%s8031_s16 + $0x38] sm:$0xff] }
0x183f   :  { %5246 = vadd.xlane.f32.xlu1 %v5245_v24  ;;  %6755 = vmatpush3.msra.mxu0 %v6033_v25  ;;  %v7001_v24 = vpack.c.bf16 %v5639_v23, %v5638_v14  ;;  %v6039_v25 = vld [vmem:[%s8034_s15] ss:$0 sm:$0xff] }
0x1840   :  { %6990 = vmatprep.subr.bf16.mxu0 %v6989_v59 }
0x18c8   :  { %v5244_v26 = vpop.xlane.xlu0 %5243 }
0x18c9   :  { %7083 = vrcp.f32 %v5244_v26 }
0x18cc   :  { %v5247_v12 = vpop.xlane.xlu1 %5246 }
0x18cd   :  { %7085 = vrcp.f32 %v5247_v12 }
0x18d3   :  { %v7084_v27 = vpop.eup %7083 }
0x18d7   :  { %v7086_v29 = vpop.eup %7085 }
0x190d   :  { %v5317_v20 = vpop.f32.mrb[60].mxu1 }
0x190e   :  { %v5396_v5 = vmul.f32 %v7084_v27, %v5317_v20  ;;  %v6748_v28 = vpop.f32.mrb[61].mxu1 }
0x1910   :  { %6756 = vmatprep.mubr.msk.f32.mxu0 %vm338_vm2, %v5396_v5 }
0x1911   :  { %v5390_v30 = vpop.f32.mrb[52].mxu0 }
0x1912   :  { %v5397_v31 = vmul.f32 %v7086_v29, %v5390_v30  ;;  %v6753_v32 = vpop.f32.mrb[53].mxu0  ;;  %v6042_v29 = vld [vmem:[%s8035_s17] ss:$0 sm:$0xff] }
0x1914   :  { %6757 = vmatmul.mubr.msk.f32.vlgmr.msra.gmra.mrb[38].mxu0 %vm338_vm2, %v5397_v31 }
0x1915   :  { %6992 = vmatpush3.bf16.msra.mxu0 %v6989_v59 }
0x1916   :  { %6994 = vmatprep.subr.bf16.mxu0 %v6993_v60 }
0x1919   :  { %6996 = vmatpush3.bf16.msra.mxu0 %v6993_v60 }
0x191a   :  { %6998 = vmatprep.subr.bf16.mxu0 %v6997_v0 }
0x191d   :  { %7000 = vmatpush3.bf16.msra.mxu0 %v6997_v0 }
0x191e   :  { %7002 = vmatprep.subr.bf16.mxu0 %v7001_v24 }
0x1921   :  { %7004 = vmatpush3.bf16.msra.mxu0 %v7001_v24 }
0x19e7   :  { %v6758_v34 = vpop.f32.mrb[38].mxu0 }
0x19e8   :  { %v5491_v35 = vadd.f32 %v6758_v34, %v6036_v33  ;;  %v5472_v36 = vpop.f32.mrb[39].mxu0 }
0x19e9   :  { %v5490_v37 = vadd.f32 %v6036_v33, %v5472_v36 }
0x19ea   :  { %v5493_v39 = vadd.f32 %v5491_v35, %v7649_v2 }
0x19eb   :  { %v5492_v40 = vadd.f32 %v5490_v37, %v7647_v1  ;;  %v5538_v1 = vld [vmem:[%s8030_s14] sm:$0xff] }
0x19ec   :  { %v5499_v41 = vsel %vm80_vm0, %v5493_v39, 0.0  ;;  %v6981_v54 = vpack.c.bf16 %v5539_v53, %v5538_v1 }
0x19ed   :  { %5500 = vadd.xlane.f32.xlu1 %v5499_v41  ;;  %v5496_v42 = vsel %vm80_vm0, %v5492_v40, 0.0 }
0x19ee   :  { %5497 = vadd.xlane.f32.xlu0 %v5496_v42  ;;  %6982 = vmatprep.subr.bf16.mxu1 %v6981_v54 }
0x19ef   :  { %6984 = vmatpush3.bf16.msra.mxu1 %v6981_v54 }
0x19f0   :  { %6986 = vmatprep.subr.bf16.mxu1 %v6985_v56 }
0x19f3   :  { %6988 = vmatpush3.bf16.msra.mxu1 %v6985_v56 }
0x1a7a   :  { %v5501_v43 = vpop.xlane.xlu1 %5500 }
0x1a7b   :  { %v5503_v44 = vmul.f32 0.03125, %v5501_v43  ;;  %v5498_v45 = vpop.xlane.xlu0 %5497 }
0x1a7c   :  { %v5502_v46 = vmul.f32 0.03125, %v5498_v45 }
0x1a7d   :  { %v5505_v48 = vsub.f32 %v5493_v39, %v5503_v44 }
0x1a7e   :  { %v5504_v49 = vsub.f32 %v5492_v40, %v5502_v46 }
0x1a7f   :  { %v5507_v50 = vmul.f32 %v5505_v48, %v5505_v48 }
0x1a80   :  { %v5506_v51 = vmul.f32 %v5504_v49, %v5504_v49 }
0x1a81   :  { %v5511_v52 = vsel %vm80_vm0, %v5507_v50, 0.0 }
0x1a82   :  { %5512 = vadd.xlane.f32.xlu1 %v5511_v52  ;;  %v5508_v2 = vsel %vm80_vm0, %v5506_v51, 0.0 }
0x1a83   :  { %5509 = vadd.xlane.f32.xlu0 %v5508_v2 }
0x1b0f   :  { %v5513_v3 = vpop.xlane.xlu1 %5512 }
0x1b10   :  { %v5515_v6 = vmul.f32 0.03125, %v5513_v3  ;;  %v5510_v8 = vpop.xlane.xlu0 %5509 }
0x1b11   :  { %v5514_v9 = vmul.f32 0.03125, %v5510_v8 }
0x1b12   :  { %v5517_v10 = vadd.f32 1e-05, %v5515_v6 }
0x1b13   :  { %v5516_v11 = vadd.f32 1e-05, %v5514_v9 }
0x1b14   :  { %7087 = vrsqrt.f32 %v5517_v10 }
0x1b15   :  { %7089 = vrsqrt.f32 %v5516_v11 }
0x1b1e   :  { %v7088_v13 = vpop.eup %7087 }
0x1b1f   :  { %v7090_v16 = vpop.eup %7089  ;;  %v5521_v17 = vmul.f32 %v7088_v13, %v5505_v48 }
0x1b20   :  { %v5520_v18 = vmul.f32 %v7090_v16, %v5504_v49 }
0x1b21   :  { %v5529_v7 = vmul.f32 %v6037_v15, %v5521_v17 }
0x1b22   :  { %v5528_v21 = vmul.f32 %v6037_v15, %v5520_v18 }
0x1b23   :  { %v5537_v22 = vadd.f32 %v6038_v19, %v5529_v7 }
0x1b24   :  { %v5536_v4 = vadd.f32 %v6038_v19, %v5528_v21 }
0x1b26   :  { %6767 = vmatprep.mubr.msk.f32.mxu1 %vm80_vm0, %v5536_v4 }
0x1b27   :  { %6768 = vmatmul.mubr.msk.f32.vlgmr.msra.gmra.mrb[62].mxu1 %vm80_vm0, %v5537_v22 }
0x1bfa   :  { %v6769_v26 = vpop.f32.mrb[62].mxu1 }
0x1bfb   :  { %v5627_v12 = vadd.f32 %v6769_v26, %v6039_v25  ;;  %v5621_v27 = vpop.f32.mrb[63].mxu1 }
0x1bfc   :  { %v5622_v20 = vadd.f32 %v6039_v25, %v5621_v27 }
0x1bfd   :  { %v5631_v28 = vmax.f32 %v5627_v12, 0.0 }
0x1bfe   :  { %v5630_v5 = vmax.f32 %v5622_v20, 0.0 }
0x1c00   :  { %6786 = vmatprep.mubr.msk.f32.mxu0 %vm5647_vm3, %v5630_v5 }
0x1c01   :  { %6787 = vmatmul.mubr.msk.f32.vlgmr.msra.gmra.mrb[54].mxu0 %vm5647_vm3, %v5631_v28 }
0x1cd4   :  { %v6788_v30 = vpop.f32.mrb[54].mxu0 }
0x1cd5   :  { %v5726_v31 = vadd.f32 %v6788_v30, %v6042_v29  ;;  %v5720_v32 = vpop.f32.mrb[55].mxu0 }
0x1cd6   :  { %v5721_v33 = vadd.f32 %v6042_v29, %v5720_v32 }
0x1cd7   :  { %v5730_v34 = vadd.f32 %v5726_v31, %v5537_v22 }
0x1cd8   :  { %v5729_v35 = vadd.f32 %v5721_v33, %v5536_v4 }
0x1cd9   :  { %v5736_v36 = vsel %vm80_vm0, %v5730_v34, 0.0 }
0x1cda   :  { %5737 = vadd.xlane.f32.xlu1 %v5736_v36  ;;  %v5733_v37 = vsel %vm80_vm0, %v5729_v35, 0.0 }
0x1cdb   :  { %5734 = vadd.xlane.f32.xlu0 %v5733_v37 }
0x1d67   :  { %v5738_v39 = vpop.xlane.xlu1 %5737 }
0x1d68   :  { %v5740_v40 = vmul.f32 0.03125, %v5738_v39  ;;  %v5735_v41 = vpop.xlane.xlu0 %5734 }
0x1d69   :  { %v5739_v42 = vmul.f32 0.03125, %v5735_v41 }
0x1d6a   :  { %v5742_v43 = vsub.f32 %v5730_v34, %v5740_v40 }
0x1d6b   :  { %v5741_v44 = vsub.f32 %v5729_v35, %v5739_v42 }
0x1d6c   :  { %v5744_v45 = vmul.f32 %v5742_v43, %v5742_v43 }
0x1d6d   :  { %v5743_v46 = vmul.f32 %v5741_v44, %v5741_v44 }
0x1d6e   :  { %v5748_v48 = vsel %vm80_vm0, %v5744_v45, 0.0 }
0x1d6f   :  { %5749 = vadd.xlane.f32.xlu1 %v5748_v48  ;;  %v5745_v49 = vsel %vm80_vm0, %v5743_v46, 0.0 }
0x1d70   :  { %5746 = vadd.xlane.f32.xlu0 %v5745_v49 }
0x1dfc   :  { %v5750_v50 = vpop.xlane.xlu1 %5749 }
0x1dfd   :  { %v5752_v51 = vmul.f32 0.03125, %v5750_v50  ;;  %v5747_v52 = vpop.xlane.xlu0 %5746 }
0x1dfe   :  { %v5751_v2 = vmul.f32 0.03125, %v5747_v52 }
0x1dff   :  { %v5754_v1 = vadd.f32 1e-05, %v5752_v51 }
0x1e00   :  { %v5753_v53 = vadd.f32 1e-05, %v5751_v2 }
0x1e01   :  { %7091 = vrsqrt.f32 %v5754_v1 }
0x1e02   :  { %7093 = vrsqrt.f32 %v5753_v53 }
0x1e0b   :  { %v7092_v54 = vpop.eup %7091 }
0x1e0c   :  { %v7094_v55 = vpop.eup %7093  ;;  %v5758_v56 = vmul.f32 %v7092_v54, %v5742_v43 }
0x1e0d   :  { %v5757_v57 = vmul.f32 %v7094_v55, %v5741_v44 }
0x1e0e   :  { %v5766_v58 = vmul.f32 %v6045_v38, %v5758_v56 }
0x1e0f   :  { %v5765_v59 = vmul.f32 %v6045_v38, %v5757_v57 }
0x1e10   :  { %v5774_v61 = vadd.f32 %v6046_v47, %v5766_v58 }
0x1e11   :  { %v5773_v60 = vadd.f32 %v6046_v47, %v5765_v59 }
0x1e12   :  { %5776 = vst.msk [vmem:[%s8038_s20 + $0x8] sm:$0xff] %vm80_vm0, %v5774_v61 }
0x1e13   :  { %5775 = vst.msk [vmem:[%s8038_s20] sm:$0xff] %vm80_vm0, %v5773_v60 }

</bundles_post_ra>
